<compile_context>
chip_gen: v5e
topology: v5e:2x2
jax: 0.10.0
libtpu: 0.0.40
codegen_flags: <defaults>
</compile_context>

<pallas_src>
import functools
import math

import numpy as np
import jax
import jax.numpy as jnp
from jax import lax
from jax.experimental import pallas as pl
from jax.experimental.pallas import tpu as pltpu

WINDOW_SIZE = 11
SIGMA = 1.5
SSIM_C1 = 0.01 ** 2
SSIM_C2 = 0.03 ** 2
_PAD = WINDOW_SIZE // 2


def _gaussian_1d(window_size=WINDOW_SIZE, sigma=SIGMA):
    g = np.array(
        [math.exp(-((x - window_size // 2) ** 2) / float(2 * sigma ** 2))
         for x in range(window_size)], dtype=np.float64)
    return (g / g.sum()).astype(np.float32)


def _gaussian_window_2d(window_size=WINDOW_SIZE, sigma=SIGMA):
    g = _gaussian_1d(window_size, sigma)
    return np.outer(g, g).astype(np.float32)


def _banded_toeplitz(n, g):
    """(n, n) matrix T with T[i, j] = g[j - i + P] for |i - j| <= P, else 0.

    Multiplying by T along one axis is exactly the zero-padded 1-D correlation
    with the symmetric gaussian window g (F.conv2d semantics, padding=P)."""
    p = len(g) // 2
    m = np.zeros((n, n), dtype=np.float32)
    for i in range(n):
        for j in range(max(0, i - p), min(n, i + p + 1)):
            m[i, j] = g[j - i + p]
    return m


def _hybrid_loss_kernel(kh_ref, kw_ref, logits_ref, target_ref, out_ref, *, B, C, H, W):
    n_total = float(B * C * H * W)
    CH = C * H

    x = logits_ref[0].astype(jnp.float32)           # (C*H, W)
    t = target_ref[0].astype(jnp.float32)           # (C*H, W)

    # ---- BCEWithLogits + sigmoid sharing a single exp(-|x|) ----
    e = jnp.exp(-jnp.abs(x))                        # one EUP exp pass
    bce_sum = jnp.sum(jnp.maximum(x, 0.0) - x * t + jnp.log(1.0 + e))
    inv_1pe = 1.0 / (1.0 + e)
    p = jnp.where(x >= 0.0, inv_1pe, e * inv_1pe)   # sigmoid(x)

    # ---- IOU term for this batch element (one grid step == one batch element) ----
    iand = jnp.sum(t * p)
    ior = jnp.sum(t) + jnp.sum(p) - iand            # no eps (matches PyTorch reference)
    iou_term = 1.0 - iand / ior

    # ---- SSIM: separable gaussian conv as banded-Toeplitz MXU matmuls ----
    kh = kh_ref[...]                                # (H, H), resident
    kw = kw_ref[...]                                # (W, W), resident
    hi = lax.Precision.HIGHEST

    # Horizontal (lane direction) pass for all 5 maps fused into ONE matmul:
    #   stack [p, t, p*p, t*t, p*t] along sublanes -> (5*C*H, W) @ (W, W)
    mh = jnp.concatenate([p, t, p * p, t * t, p * t], axis=0)
    hh = jnp.dot(mh, kw, precision=hi, preferred_element_type=jnp.float32)

    # Vertical (sublane direction) pass: depthwise (groups=channel) static loop.
    ssim_sum = jnp.float32(0.0)
    for c in range(C):
        r = c * H

        def vconv(map_idx, r=r):
            blk = hh[map_idx * CH + r: map_idx * CH + r + H, :]      # static slice
            return jnp.dot(kh, blk, precision=hi, preferred_element_type=jnp.float32)

        mu1 = vconv(0)
        mu2 = vconv(1)
        mu1_sq = mu1 * mu1
        mu2_sq = mu2 * mu2
        mu12 = mu1 * mu2
        s11 = vconv(2) - mu1_sq
        s22 = vconv(3) - mu2_sq
        s12 = vconv(4) - mu12
        num = (2.0 * mu12 + SSIM_C1) * (2.0 * s12 + SSIM_C2)
        den = (mu1_sq + mu2_sq + SSIM_C1) * (s11 + s22 + SSIM_C2)
        ssim_sum = ssim_sum + jnp.sum(num / den)

    # ---- fused, pre-scaled partial:  loss = 1 + sum_i(partial_i) ----
    partial = bce_sum / n_total - ssim_sum / n_total + iou_term / float(B)
    out_ref[...] = jnp.zeros(out_ref.shape, jnp.float32) + partial   # lane-dense store


def hybrid_loss_with_logits(logits, target):
    """BCEWithLogits(logits, t) + SSIM(sigmoid(logits), t) + IOU(sigmoid(logits), t)."""
    B, C, H, W = logits.shape
    g = _gaussian_1d()
    kh = jnp.asarray(_banded_toeplitz(H, g))        # (H, H)
    kw = jnp.asarray(_banded_toeplitz(W, g))        # (W, W)

    x2 = jnp.reshape(logits, (B, C * H, W))         # free host-side reshape
    t2 = jnp.reshape(target, (B, C * H, W))

    kernel = functools.partial(_hybrid_loss_kernel, B=B, C=C, H=H, W=W)
    partials = pl.pallas_call(
        kernel,
        out_shape=jax.ShapeDtypeStruct((B, 8, 128), jnp.float32),
        grid=(B,),
        in_specs=[
            pl.BlockSpec((H, H), lambda i: (0, 0)),             # K_h, resident across steps
            pl.BlockSpec((W, W), lambda i: (0, 0)),             # K_w, resident across steps
            pl.BlockSpec((1, C * H, W), lambda i: (i, 0, 0)),
            pl.BlockSpec((1, C * H, W), lambda i: (i, 0, 0)),
        ],
        out_specs=pl.BlockSpec((1, 8, 128), lambda i: (i, 0, 0)),
        compiler_params=pltpu.CompilerParams(
            dimension_semantics=("parallel",)),                  # megacore sharding on v7x
    )(kh, kw, x2, t2)
    return 1.0 + jnp.sum(partials[:, 0, 0])


def _reference(logits, target, window2d):
    """Pure-JAX reference (mirrors the PyTorch module)."""
    x = logits.astype(jnp.float32)
    t = target.astype(jnp.float32)
    B, C, H, W = x.shape
    bce = jnp.mean(jnp.maximum(x, 0.0) - x * t + jnp.log1p(jnp.exp(-jnp.abs(x))))
    p = jax.nn.sigmoid(x)
    # IOU
    iand = jnp.sum((t * p).reshape(B, -1), axis=1)
    ior = jnp.sum(t.reshape(B, -1), axis=1) + jnp.sum(p.reshape(B, -1), axis=1) - iand
    iou = jnp.mean(1.0 - iand / ior)
    # SSIM (depthwise conv, zero padding K//2)
    w = jnp.tile(jnp.asarray(window2d)[None, None], (C, 1, 1, 1))   # (C,1,K,K)
    conv = lambda img: lax.conv_general_dilated(
        img, w, (1, 1), [(_PAD, _PAD), (_PAD, _PAD)],
        dimension_numbers=("NCHW", "OIHW", "NCHW"), feature_group_count=C,
        precision=lax.Precision.HIGHEST)
    mu1, mu2 = conv(p), conv(t)
    s11 = conv(p * p) - mu1 ** 2
    s22 = conv(t * t) - mu2 ** 2
    s12 = conv(p * t) - mu1 * mu2
    ssim_map = ((2 * mu1 * mu2 + SSIM_C1) * (2 * s12 + SSIM_C2)) / (
        (mu1 ** 2 + mu2 ** 2 + SSIM_C1) * (s11 + s22 + SSIM_C2))
    ssim_loss = 1.0 - jnp.mean(ssim_map)
    return bce + ssim_loss + iou


if __name__ == "__main__":
    key = jax.random.PRNGKey(0)
    k1, k2 = jax.random.split(key)
    B, C, H, W = 2, 4, 16, 16
    logits = jax.random.normal(k1, (B, C, H, W), dtype=jnp.float32)
    target = jax.random.uniform(k2, (B, C, H, W), dtype=jnp.float32)  # soft mask in [0,1]

    loss = jax.block_until_ready(hybrid_loss_with_logits(logits, target))
    ref = jax.block_until_ready(_reference(logits, target, _gaussian_window_2d()))
    assert np.allclose(np.asarray(loss), np.asarray(ref), rtol=5e-4, atol=5e-4), (loss, ref)
    print("KERNEL_OK")
</pallas_src>

<mosaic_0001>
module attributes {stable_mosaic.version = 11 : i64} {
  func.func @_hybrid_loss_kernel(%arg0: i32, %arg1: memref<16x16xf32, #tpu.memory_space<vmem>>, %arg2: memref<16x16xf32, #tpu.memory_space<vmem>>, %arg3: memref<1x64x16xf32, #tpu.memory_space<vmem>>, %arg4: memref<1x64x16xf32, #tpu.memory_space<vmem>>, %arg5: memref<1x8x128xf32, #tpu.memory_space<vmem>>) attributes {dimension_semantics = [#tpu.dimension_semantics<parallel>], iteration_bounds = array<i64: 2>, scalar_prefetch = 0 : i64, scratch_operands = 0 : i64, tpu.core_type = #tpu.core_type<tc>, window_params = [{pipeline_mode = #tpu.pipeline_mode<synchronous>, transform_indices = @transform_0, window_bounds = array<i64: 16, 16>}, {pipeline_mode = #tpu.pipeline_mode<synchronous>, transform_indices = @transform_1, window_bounds = array<i64: 16, 16>}, {transform_indices = @transform_2, window_bounds = array<i64: 1, 64, 16>}, {transform_indices = @transform_3, window_bounds = array<i64: 1, 64, 16>}, {transform_indices = @transform_4, window_bounds = array<i64: 1, 8, 128>}]} {
    %c0 = arith.constant 0 : index
    %c0_0 = arith.constant 0 : index
    %c0_1 = arith.constant 0 : index
    %0 = vector.load %arg3[%c0, %c0_0, %c0_1] : memref<1x64x16xf32, #tpu.memory_space<vmem>>, vector<1x64x16xf32>
    %1 = vector.shape_cast %0 : vector<1x64x16xf32> to vector<64x16xf32>
    %c0_2 = arith.constant 0 : index
    %c0_3 = arith.constant 0 : index
    %c0_4 = arith.constant 0 : index
    %2 = vector.load %arg4[%c0_2, %c0_3, %c0_4] : memref<1x64x16xf32, #tpu.memory_space<vmem>>, vector<1x64x16xf32>
    %3 = vector.shape_cast %2 : vector<1x64x16xf32> to vector<64x16xf32>
    %4 = math.absf %1 : vector<64x16xf32>
    %cst = arith.constant 0.000000e+00 : f32
    %5 = vector.broadcast %cst : f32 to vector<64x16xf32>
    %6 = arith.subf %5, %4 : vector<64x16xf32>
    %7 = math.exp %6 : vector<64x16xf32>
    %cst_5 = arith.constant 0.000000e+00 : f32
    %8 = vector.broadcast %cst_5 : f32 to vector<64x16xf32>
    %9 = arith.maximumf %1, %8 : vector<64x16xf32>
    %10 = arith.mulf %1, %3 : vector<64x16xf32>
    %11 = arith.subf %9, %10 : vector<64x16xf32>
    %cst_6 = arith.constant 1.000000e+00 : f32
    %12 = vector.broadcast %cst_6 : f32 to vector<64x16xf32>
    %13 = arith.addf %12, %7 : vector<64x16xf32>
    %14 = math.log %13 : vector<64x16xf32>
    %15 = arith.addf %11, %14 : vector<64x16xf32>
    %16 = vector.shape_cast %15 : vector<64x16xf32> to vector<1x64x16xf32>
    %cst_7 = arith.constant dense<0.000000e+00> : vector<1xf32>
    %17 = vector.multi_reduction <add>, %16, %cst_7 [1, 2] : vector<1x64x16xf32> to vector<1xf32>
    %18 = vector.shape_cast %17 : vector<1xf32> to vector<1x1x1xf32>
    %19 = vector.extract %18[0, 0, 0] : f32 from vector<1x1x1xf32>
    %cst_8 = arith.constant 1.000000e+00 : f32
    %20 = vector.broadcast %cst_8 : f32 to vector<64x16xf32>
    %21 = arith.addf %20, %7 : vector<64x16xf32>
    %cst_9 = arith.constant 1.000000e+00 : f32
    %22 = vector.broadcast %cst_9 : f32 to vector<64x16xf32>
    %23 = arith.divf %22, %21 : vector<64x16xf32>
    %cst_10 = arith.constant 0.000000e+00 : f32
    %24 = vector.broadcast %cst_10 : f32 to vector<64x16xf32>
    %25 = arith.cmpf oge, %1, %24 : vector<64x16xf32>
    %26 = arith.mulf %7, %23 : vector<64x16xf32>
    %27 = arith.select %25, %23, %26 : vector<64x16xi1>, vector<64x16xf32>
    %28 = arith.mulf %3, %27 : vector<64x16xf32>
    %29 = vector.shape_cast %28 : vector<64x16xf32> to vector<1x64x16xf32>
    %cst_11 = arith.constant dense<0.000000e+00> : vector<1xf32>
    %30 = vector.multi_reduction <add>, %29, %cst_11 [1, 2] : vector<1x64x16xf32> to vector<1xf32>
    %31 = vector.shape_cast %30 : vector<1xf32> to vector<1x1x1xf32>
    %32 = vector.extract %31[0, 0, 0] : f32 from vector<1x1x1xf32>
    %33 = vector.shape_cast %3 : vector<64x16xf32> to vector<1x64x16xf32>
    %cst_12 = arith.constant dense<0.000000e+00> : vector<1xf32>
    %34 = vector.multi_reduction <add>, %33, %cst_12 [1, 2] : vector<1x64x16xf32> to vector<1xf32>
    %35 = vector.shape_cast %34 : vector<1xf32> to vector<1x1x1xf32>
    %36 = vector.extract %35[0, 0, 0] : f32 from vector<1x1x1xf32>
    %37 = vector.shape_cast %27 : vector<64x16xf32> to vector<1x64x16xf32>
    %cst_13 = arith.constant dense<0.000000e+00> : vector<1xf32>
    %38 = vector.multi_reduction <add>, %37, %cst_13 [1, 2] : vector<1x64x16xf32> to vector<1xf32>
    %39 = vector.shape_cast %38 : vector<1xf32> to vector<1x1x1xf32>
    %40 = vector.extract %39[0, 0, 0] : f32 from vector<1x1x1xf32>
    %41 = arith.addf %36, %40 : f32
    %42 = arith.subf %41, %32 : f32
    %43 = arith.divf %32, %42 : f32
    %cst_14 = arith.constant 1.000000e+00 : f32
    %44 = arith.subf %cst_14, %43 : f32
    %c0_15 = arith.constant 0 : index
    %c0_16 = arith.constant 0 : index
    %45 = vector.load %arg1[%c0_15, %c0_16] : memref<16x16xf32, #tpu.memory_space<vmem>>, vector<16x16xf32>
    %c0_17 = arith.constant 0 : index
    %c0_18 = arith.constant 0 : index
    %46 = vector.load %arg2[%c0_17, %c0_18] : memref<16x16xf32, #tpu.memory_space<vmem>>, vector<16x16xf32>
    %47 = arith.mulf %27, %27 : vector<64x16xf32>
    %48 = arith.mulf %3, %3 : vector<64x16xf32>
    %49 = arith.mulf %27, %3 : vector<64x16xf32>
    %50 = tpu.concatenate %27, %3, %47, %48, %49 in 0 : vector<64x16xf32>, vector<64x16xf32>, vector<64x16xf32>, vector<64x16xf32>, vector<64x16xf32> -> vector<320x16xf32>
    %cst_19 = arith.constant dense<0.000000e+00> : vector<320x16xf32>
    %51 = tpu.matmul %50, %46, %cst_19 {dimension_numbers = #tpu.dot_dimension_numbers<[1], [0], [0], [1], [0, 0, 1, 1], [], []>, precision = #tpu.contract_precision<fp32>} : vector<320x16xf32>, vector<16x16xf32>, vector<320x16xf32> -> vector<320x16xf32>
    %52 = vector.extract_strided_slice %51 {offsets = [0, 0], sizes = [16, 16], strides = [1, 1]} : vector<320x16xf32> to vector<16x16xf32>
    %cst_20 = arith.constant dense<0.000000e+00> : vector<16x16xf32>
    %53 = tpu.matmul %45, %52, %cst_20 {dimension_numbers = #tpu.dot_dimension_numbers<[1], [0], [0], [1], [0, 0, 1, 1], [], []>, precision = #tpu.contract_precision<fp32>} : vector<16x16xf32>, vector<16x16xf32>, vector<16x16xf32> -> vector<16x16xf32>
    %54 = vector.extract_strided_slice %51 {offsets = [64, 0], sizes = [16, 16], strides = [1, 1]} : vector<320x16xf32> to vector<16x16xf32>
    %cst_21 = arith.constant dense<0.000000e+00> : vector<16x16xf32>
    %55 = tpu.matmul %45, %54, %cst_21 {dimension_numbers = #tpu.dot_dimension_numbers<[1], [0], [0], [1], [0, 0, 1, 1], [], []>, precision = #tpu.contract_precision<fp32>} : vector<16x16xf32>, vector<16x16xf32>, vector<16x16xf32> -> vector<16x16xf32>
    %56 = arith.mulf %53, %53 : vector<16x16xf32>
    %57 = arith.mulf %55, %55 : vector<16x16xf32>
    %58 = arith.mulf %53, %55 : vector<16x16xf32>
    %59 = vector.extract_strided_slice %51 {offsets = [128, 0], sizes = [16, 16], strides = [1, 1]} : vector<320x16xf32> to vector<16x16xf32>
    %cst_22 = arith.constant dense<0.000000e+00> : vector<16x16xf32>
    %60 = tpu.matmul %45, %59, %cst_22 {dimension_numbers = #tpu.dot_dimension_numbers<[1], [0], [0], [1], [0, 0, 1, 1], [], []>, precision = #tpu.contract_precision<fp32>} : vector<16x16xf32>, vector<16x16xf32>, vector<16x16xf32> -> vector<16x16xf32>
    %61 = arith.subf %60, %56 : vector<16x16xf32>
    %62 = vector.extract_strided_slice %51 {offsets = [192, 0], sizes = [16, 16], strides = [1, 1]} : vector<320x16xf32> to vector<16x16xf32>
    %cst_23 = arith.constant dense<0.000000e+00> : vector<16x16xf32>
    %63 = tpu.matmul %45, %62, %cst_23 {dimension_numbers = #tpu.dot_dimension_numbers<[1], [0], [0], [1], [0, 0, 1, 1], [], []>, precision = #tpu.contract_precision<fp32>} : vector<16x16xf32>, vector<16x16xf32>, vector<16x16xf32> -> vector<16x16xf32>
    %64 = arith.subf %63, %57 : vector<16x16xf32>
    %65 = vector.extract_strided_slice %51 {offsets = [256, 0], sizes = [16, 16], strides = [1, 1]} : vector<320x16xf32> to vector<16x16xf32>
    %cst_24 = arith.constant dense<0.000000e+00> : vector<16x16xf32>
    %66 = tpu.matmul %45, %65, %cst_24 {dimension_numbers = #tpu.dot_dimension_numbers<[1], [0], [0], [1], [0, 0, 1, 1], [], []>, precision = #tpu.contract_precision<fp32>} : vector<16x16xf32>, vector<16x16xf32>, vector<16x16xf32> -> vector<16x16xf32>
    %67 = arith.subf %66, %58 : vector<16x16xf32>
    %cst_25 = arith.constant 2.000000e+00 : f32
    %68 = vector.broadcast %cst_25 : f32 to vector<16x16xf32>
    %69 = arith.mulf %68, %58 : vector<16x16xf32>
    %cst_26 = arith.constant 9.99999974E-5 : f32
    %70 = vector.broadcast %cst_26 : f32 to vector<16x16xf32>
    %71 = arith.addf %69, %70 : vector<16x16xf32>
    %cst_27 = arith.constant 2.000000e+00 : f32
    %72 = vector.broadcast %cst_27 : f32 to vector<16x16xf32>
    %73 = arith.mulf %72, %67 : vector<16x16xf32>
    %cst_28 = arith.constant 8.99999984E-4 : f32
    %74 = vector.broadcast %cst_28 : f32 to vector<16x16xf32>
    %75 = arith.addf %73, %74 : vector<16x16xf32>
    %76 = arith.mulf %71, %75 : vector<16x16xf32>
    %77 = arith.addf %56, %57 : vector<16x16xf32>
    %cst_29 = arith.constant 9.99999974E-5 : f32
    %78 = vector.broadcast %cst_29 : f32 to vector<16x16xf32>
    %79 = arith.addf %77, %78 : vector<16x16xf32>
    %80 = arith.addf %61, %64 : vector<16x16xf32>
    %cst_30 = arith.constant 8.99999984E-4 : f32
    %81 = vector.broadcast %cst_30 : f32 to vector<16x16xf32>
    %82 = arith.addf %80, %81 : vector<16x16xf32>
    %83 = arith.mulf %79, %82 : vector<16x16xf32>
    %84 = arith.divf %76, %83 : vector<16x16xf32>
    %85 = vector.shape_cast %84 : vector<16x16xf32> to vector<1x16x16xf32>
    %cst_31 = arith.constant dense<0.000000e+00> : vector<1xf32>
    %86 = vector.multi_reduction <add>, %85, %cst_31 [1, 2] : vector<1x16x16xf32> to vector<1xf32>
    %87 = vector.shape_cast %86 : vector<1xf32> to vector<1x1x1xf32>
    %88 = vector.extract %87[0, 0, 0] : f32 from vector<1x1x1xf32>
    %cst_32 = arith.constant 0.000000e+00 : f32
    %89 = arith.addf %cst_32, %88 : f32
    %90 = vector.extract_strided_slice %51 {offsets = [16, 0], sizes = [16, 16], strides = [1, 1]} : vector<320x16xf32> to vector<16x16xf32>
    %cst_33 = arith.constant dense<0.000000e+00> : vector<16x16xf32>
    %91 = tpu.matmul %45, %90, %cst_33 {dimension_numbers = #tpu.dot_dimension_numbers<[1], [0], [0], [1], [0, 0, 1, 1], [], []>, precision = #tpu.contract_precision<fp32>} : vector<16x16xf32>, vector<16x16xf32>, vector<16x16xf32> -> vector<16x16xf32>
    %92 = vector.extract_strided_slice %51 {offsets = [80, 0], sizes = [16, 16], strides = [1, 1]} : vector<320x16xf32> to vector<16x16xf32>
    %cst_34 = arith.constant dense<0.000000e+00> : vector<16x16xf32>
    %93 = tpu.matmul %45, %92, %cst_34 {dimension_numbers = #tpu.dot_dimension_numbers<[1], [0], [0], [1], [0, 0, 1, 1], [], []>, precision = #tpu.contract_precision<fp32>} : vector<16x16xf32>, vector<16x16xf32>, vector<16x16xf32> -> vector<16x16xf32>
    %94 = arith.mulf %91, %91 : vector<16x16xf32>
    %95 = arith.mulf %93, %93 : vector<16x16xf32>
    %96 = arith.mulf %91, %93 : vector<16x16xf32>
    %97 = vector.extract_strided_slice %51 {offsets = [144, 0], sizes = [16, 16], strides = [1, 1]} : vector<320x16xf32> to vector<16x16xf32>
    %cst_35 = arith.constant dense<0.000000e+00> : vector<16x16xf32>
    %98 = tpu.matmul %45, %97, %cst_35 {dimension_numbers = #tpu.dot_dimension_numbers<[1], [0], [0], [1], [0, 0, 1, 1], [], []>, precision = #tpu.contract_precision<fp32>} : vector<16x16xf32>, vector<16x16xf32>, vector<16x16xf32> -> vector<16x16xf32>
    %99 = arith.subf %98, %94 : vector<16x16xf32>
    %100 = vector.extract_strided_slice %51 {offsets = [208, 0], sizes = [16, 16], strides = [1, 1]} : vector<320x16xf32> to vector<16x16xf32>
    %cst_36 = arith.constant dense<0.000000e+00> : vector<16x16xf32>
    %101 = tpu.matmul %45, %100, %cst_36 {dimension_numbers = #tpu.dot_dimension_numbers<[1], [0], [0], [1], [0, 0, 1, 1], [], []>, precision = #tpu.contract_precision<fp32>} : vector<16x16xf32>, vector<16x16xf32>, vector<16x16xf32> -> vector<16x16xf32>
    %102 = arith.subf %101, %95 : vector<16x16xf32>
    %103 = vector.extract_strided_slice %51 {offsets = [272, 0], sizes = [16, 16], strides = [1, 1]} : vector<320x16xf32> to vector<16x16xf32>
    %cst_37 = arith.constant dense<0.000000e+00> : vector<16x16xf32>
    %104 = tpu.matmul %45, %103, %cst_37 {dimension_numbers = #tpu.dot_dimension_numbers<[1], [0], [0], [1], [0, 0, 1, 1], [], []>, precision = #tpu.contract_precision<fp32>} : vector<16x16xf32>, vector<16x16xf32>, vector<16x16xf32> -> vector<16x16xf32>
    %105 = arith.subf %104, %96 : vector<16x16xf32>
    %cst_38 = arith.constant 2.000000e+00 : f32
    %106 = vector.broadcast %cst_38 : f32 to vector<16x16xf32>
    %107 = arith.mulf %106, %96 : vector<16x16xf32>
    %cst_39 = arith.constant 9.99999974E-5 : f32
    %108 = vector.broadcast %cst_39 : f32 to vector<16x16xf32>
    %109 = arith.addf %107, %108 : vector<16x16xf32>
    %cst_40 = arith.constant 2.000000e+00 : f32
    %110 = vector.broadcast %cst_40 : f32 to vector<16x16xf32>
    %111 = arith.mulf %110, %105 : vector<16x16xf32>
    %cst_41 = arith.constant 8.99999984E-4 : f32
    %112 = vector.broadcast %cst_41 : f32 to vector<16x16xf32>
    %113 = arith.addf %111, %112 : vector<16x16xf32>
    %114 = arith.mulf %109, %113 : vector<16x16xf32>
    %115 = arith.addf %94, %95 : vector<16x16xf32>
    %cst_42 = arith.constant 9.99999974E-5 : f32
    %116 = vector.broadcast %cst_42 : f32 to vector<16x16xf32>
    %117 = arith.addf %115, %116 : vector<16x16xf32>
    %118 = arith.addf %99, %102 : vector<16x16xf32>
    %cst_43 = arith.constant 8.99999984E-4 : f32
    %119 = vector.broadcast %cst_43 : f32 to vector<16x16xf32>
    %120 = arith.addf %118, %119 : vector<16x16xf32>
    %121 = arith.mulf %117, %120 : vector<16x16xf32>
    %122 = arith.divf %114, %121 : vector<16x16xf32>
    %123 = vector.shape_cast %122 : vector<16x16xf32> to vector<1x16x16xf32>
    %cst_44 = arith.constant dense<0.000000e+00> : vector<1xf32>
    %124 = vector.multi_reduction <add>, %123, %cst_44 [1, 2] : vector<1x16x16xf32> to vector<1xf32>
    %125 = vector.shape_cast %124 : vector<1xf32> to vector<1x1x1xf32>
    %126 = vector.extract %125[0, 0, 0] : f32 from vector<1x1x1xf32>
    %127 = arith.addf %89, %126 : f32
    %128 = vector.extract_strided_slice %51 {offsets = [32, 0], sizes = [16, 16], strides = [1, 1]} : vector<320x16xf32> to vector<16x16xf32>
    %cst_45 = arith.constant dense<0.000000e+00> : vector<16x16xf32>
    %129 = tpu.matmul %45, %128, %cst_45 {dimension_numbers = #tpu.dot_dimension_numbers<[1], [0], [0], [1], [0, 0, 1, 1], [], []>, precision = #tpu.contract_precision<fp32>} : vector<16x16xf32>, vector<16x16xf32>, vector<16x16xf32> -> vector<16x16xf32>
    %130 = vector.extract_strided_slice %51 {offsets = [96, 0], sizes = [16, 16], strides = [1, 1]} : vector<320x16xf32> to vector<16x16xf32>
    %cst_46 = arith.constant dense<0.000000e+00> : vector<16x16xf32>
    %131 = tpu.matmul %45, %130, %cst_46 {dimension_numbers = #tpu.dot_dimension_numbers<[1], [0], [0], [1], [0, 0, 1, 1], [], []>, precision = #tpu.contract_precision<fp32>} : vector<16x16xf32>, vector<16x16xf32>, vector<16x16xf32> -> vector<16x16xf32>
    %132 = arith.mulf %129, %129 : vector<16x16xf32>
    %133 = arith.mulf %131, %131 : vector<16x16xf32>
    %134 = arith.mulf %129, %131 : vector<16x16xf32>
    %135 = vector.extract_strided_slice %51 {offsets = [160, 0], sizes = [16, 16], strides = [1, 1]} : vector<320x16xf32> to vector<16x16xf32>
    %cst_47 = arith.constant dense<0.000000e+00> : vector<16x16xf32>
    %136 = tpu.matmul %45, %135, %cst_47 {dimension_numbers = #tpu.dot_dimension_numbers<[1], [0], [0], [1], [0, 0, 1, 1], [], []>, precision = #tpu.contract_precision<fp32>} : vector<16x16xf32>, vector<16x16xf32>, vector<16x16xf32> -> vector<16x16xf32>
    %137 = arith.subf %136, %132 : vector<16x16xf32>
    %138 = vector.extract_strided_slice %51 {offsets = [224, 0], sizes = [16, 16], strides = [1, 1]} : vector<320x16xf32> to vector<16x16xf32>
    %cst_48 = arith.constant dense<0.000000e+00> : vector<16x16xf32>
    %139 = tpu.matmul %45, %138, %cst_48 {dimension_numbers = #tpu.dot_dimension_numbers<[1], [0], [0], [1], [0, 0, 1, 1], [], []>, precision = #tpu.contract_precision<fp32>} : vector<16x16xf32>, vector<16x16xf32>, vector<16x16xf32> -> vector<16x16xf32>
    %140 = arith.subf %139, %133 : vector<16x16xf32>
    %141 = vector.extract_strided_slice %51 {offsets = [288, 0], sizes = [16, 16], strides = [1, 1]} : vector<320x16xf32> to vector<16x16xf32>
    %cst_49 = arith.constant dense<0.000000e+00> : vector<16x16xf32>
    %142 = tpu.matmul %45, %141, %cst_49 {dimension_numbers = #tpu.dot_dimension_numbers<[1], [0], [0], [1], [0, 0, 1, 1], [], []>, precision = #tpu.contract_precision<fp32>} : vector<16x16xf32>, vector<16x16xf32>, vector<16x16xf32> -> vector<16x16xf32>
    %143 = arith.subf %142, %134 : vector<16x16xf32>
    %cst_50 = arith.constant 2.000000e+00 : f32
    %144 = vector.broadcast %cst_50 : f32 to vector<16x16xf32>
    %145 = arith.mulf %144, %134 : vector<16x16xf32>
    %cst_51 = arith.constant 9.99999974E-5 : f32
    %146 = vector.broadcast %cst_51 : f32 to vector<16x16xf32>
    %147 = arith.addf %145, %146 : vector<16x16xf32>
    %cst_52 = arith.constant 2.000000e+00 : f32
    %148 = vector.broadcast %cst_52 : f32 to vector<16x16xf32>
    %149 = arith.mulf %148, %143 : vector<16x16xf32>
    %cst_53 = arith.constant 8.99999984E-4 : f32
    %150 = vector.broadcast %cst_53 : f32 to vector<16x16xf32>
    %151 = arith.addf %149, %150 : vector<16x16xf32>
    %152 = arith.mulf %147, %151 : vector<16x16xf32>
    %153 = arith.addf %132, %133 : vector<16x16xf32>
    %cst_54 = arith.constant 9.99999974E-5 : f32
    %154 = vector.broadcast %cst_54 : f32 to vector<16x16xf32>
    %155 = arith.addf %153, %154 : vector<16x16xf32>
    %156 = arith.addf %137, %140 : vector<16x16xf32>
    %cst_55 = arith.constant 8.99999984E-4 : f32
    %157 = vector.broadcast %cst_55 : f32 to vector<16x16xf32>
    %158 = arith.addf %156, %157 : vector<16x16xf32>
    %159 = arith.mulf %155, %158 : vector<16x16xf32>
    %160 = arith.divf %152, %159 : vector<16x16xf32>
    %161 = vector.shape_cast %160 : vector<16x16xf32> to vector<1x16x16xf32>
    %cst_56 = arith.constant dense<0.000000e+00> : vector<1xf32>
    %162 = vector.multi_reduction <add>, %161, %cst_56 [1, 2] : vector<1x16x16xf32> to vector<1xf32>
    %163 = vector.shape_cast %162 : vector<1xf32> to vector<1x1x1xf32>
    %164 = vector.extract %163[0, 0, 0] : f32 from vector<1x1x1xf32>
    %165 = arith.addf %127, %164 : f32
    %166 = vector.extract_strided_slice %51 {offsets = [48, 0], sizes = [16, 16], strides = [1, 1]} : vector<320x16xf32> to vector<16x16xf32>
    %cst_57 = arith.constant dense<0.000000e+00> : vector<16x16xf32>
    %167 = tpu.matmul %45, %166, %cst_57 {dimension_numbers = #tpu.dot_dimension_numbers<[1], [0], [0], [1], [0, 0, 1, 1], [], []>, precision = #tpu.contract_precision<fp32>} : vector<16x16xf32>, vector<16x16xf32>, vector<16x16xf32> -> vector<16x16xf32>
    %168 = vector.extract_strided_slice %51 {offsets = [112, 0], sizes = [16, 16], strides = [1, 1]} : vector<320x16xf32> to vector<16x16xf32>
    %cst_58 = arith.constant dense<0.000000e+00> : vector<16x16xf32>
    %169 = tpu.matmul %45, %168, %cst_58 {dimension_numbers = #tpu.dot_dimension_numbers<[1], [0], [0], [1], [0, 0, 1, 1], [], []>, precision = #tpu.contract_precision<fp32>} : vector<16x16xf32>, vector<16x16xf32>, vector<16x16xf32> -> vector<16x16xf32>
    %170 = arith.mulf %167, %167 : vector<16x16xf32>
    %171 = arith.mulf %169, %169 : vector<16x16xf32>
    %172 = arith.mulf %167, %169 : vector<16x16xf32>
    %173 = vector.extract_strided_slice %51 {offsets = [176, 0], sizes = [16, 16], strides = [1, 1]} : vector<320x16xf32> to vector<16x16xf32>
    %cst_59 = arith.constant dense<0.000000e+00> : vector<16x16xf32>
    %174 = tpu.matmul %45, %173, %cst_59 {dimension_numbers = #tpu.dot_dimension_numbers<[1], [0], [0], [1], [0, 0, 1, 1], [], []>, precision = #tpu.contract_precision<fp32>} : vector<16x16xf32>, vector<16x16xf32>, vector<16x16xf32> -> vector<16x16xf32>
    %175 = arith.subf %174, %170 : vector<16x16xf32>
    %176 = vector.extract_strided_slice %51 {offsets = [240, 0], sizes = [16, 16], strides = [1, 1]} : vector<320x16xf32> to vector<16x16xf32>
    %cst_60 = arith.constant dense<0.000000e+00> : vector<16x16xf32>
    %177 = tpu.matmul %45, %176, %cst_60 {dimension_numbers = #tpu.dot_dimension_numbers<[1], [0], [0], [1], [0, 0, 1, 1], [], []>, precision = #tpu.contract_precision<fp32>} : vector<16x16xf32>, vector<16x16xf32>, vector<16x16xf32> -> vector<16x16xf32>
    %178 = arith.subf %177, %171 : vector<16x16xf32>
    %179 = vector.extract_strided_slice %51 {offsets = [304, 0], sizes = [16, 16], strides = [1, 1]} : vector<320x16xf32> to vector<16x16xf32>
    %cst_61 = arith.constant dense<0.000000e+00> : vector<16x16xf32>
    %180 = tpu.matmul %45, %179, %cst_61 {dimension_numbers = #tpu.dot_dimension_numbers<[1], [0], [0], [1], [0, 0, 1, 1], [], []>, precision = #tpu.contract_precision<fp32>} : vector<16x16xf32>, vector<16x16xf32>, vector<16x16xf32> -> vector<16x16xf32>
    %181 = arith.subf %180, %172 : vector<16x16xf32>
    %cst_62 = arith.constant 2.000000e+00 : f32
    %182 = vector.broadcast %cst_62 : f32 to vector<16x16xf32>
    %183 = arith.mulf %182, %172 : vector<16x16xf32>
    %cst_63 = arith.constant 9.99999974E-5 : f32
    %184 = vector.broadcast %cst_63 : f32 to vector<16x16xf32>
    %185 = arith.addf %183, %184 : vector<16x16xf32>
    %cst_64 = arith.constant 2.000000e+00 : f32
    %186 = vector.broadcast %cst_64 : f32 to vector<16x16xf32>
    %187 = arith.mulf %186, %181 : vector<16x16xf32>
    %cst_65 = arith.constant 8.99999984E-4 : f32
    %188 = vector.broadcast %cst_65 : f32 to vector<16x16xf32>
    %189 = arith.addf %187, %188 : vector<16x16xf32>
    %190 = arith.mulf %185, %189 : vector<16x16xf32>
    %191 = arith.addf %170, %171 : vector<16x16xf32>
    %cst_66 = arith.constant 9.99999974E-5 : f32
    %192 = vector.broadcast %cst_66 : f32 to vector<16x16xf32>
    %193 = arith.addf %191, %192 : vector<16x16xf32>
    %194 = arith.addf %175, %178 : vector<16x16xf32>
    %cst_67 = arith.constant 8.99999984E-4 : f32
    %195 = vector.broadcast %cst_67 : f32 to vector<16x16xf32>
    %196 = arith.addf %194, %195 : vector<16x16xf32>
    %197 = arith.mulf %193, %196 : vector<16x16xf32>
    %198 = arith.divf %190, %197 : vector<16x16xf32>
    %199 = vector.shape_cast %198 : vector<16x16xf32> to vector<1x16x16xf32>
    %cst_68 = arith.constant dense<0.000000e+00> : vector<1xf32>
    %200 = vector.multi_reduction <add>, %199, %cst_68 [1, 2] : vector<1x16x16xf32> to vector<1xf32>
    %201 = vector.shape_cast %200 : vector<1xf32> to vector<1x1x1xf32>
    %202 = vector.extract %201[0, 0, 0] : f32 from vector<1x1x1xf32>
    %203 = arith.addf %165, %202 : f32
    %cst_69 = arith.constant 2.048000e+03 : f32
    %204 = arith.divf %19, %cst_69 : f32
    %cst_70 = arith.constant 2.048000e+03 : f32
    %205 = arith.divf %203, %cst_70 : f32
    %206 = arith.subf %204, %205 : f32
    %cst_71 = arith.constant 2.000000e+00 : f32
    %207 = arith.divf %44, %cst_71 : f32
    %208 = arith.addf %206, %207 : f32
    %cst_72 = arith.constant 0.000000e+00 : f32
    %209 = vector.broadcast %cst_72 : f32 to vector<1x8x128xf32>
    %210 = vector.broadcast %208 : f32 to vector<1x8x128xf32>
    %211 = arith.addf %209, %210 : vector<1x8x128xf32>
    %c0_73 = arith.constant 0 : index
    %c0_74 = arith.constant 0 : index
    %c0_75 = arith.constant 0 : index
    %212 = vector.load %arg5[%c0_73, %c0_74, %c0_75] : memref<1x8x128xf32, #tpu.memory_space<vmem>>, vector<1x8x128xf32>
    tpu.vector_store %arg5[%c0_73, %c0_74, %c0_75], %211 {strides = array<i32>} : memref<1x8x128xf32, #tpu.memory_space<vmem>>, vector<1x8x128xf32>,
    return
  }
  func.func @transform_0(%arg0: i32) -> (i32, i32) {
    %c0_i32 = arith.constant 0 : i32
    %c0_i32_0 = arith.constant 0 : i32
    %c0_i32_1 = arith.constant 0 : i32
    return %c0_i32, %c0_i32_0 : i32, i32
  }
  func.func @transform_1(%arg0: i32) -> (i32, i32) {
    %c0_i32 = arith.constant 0 : i32
    %c0_i32_0 = arith.constant 0 : i32
    %c0_i32_1 = arith.constant 0 : i32
    return %c0_i32, %c0_i32_0 : i32, i32
  }
  func.func @transform_2(%arg0: i32) -> (i32, i32, i32) {
    %c0_i32 = arith.constant 0 : i32
    %c0_i32_0 = arith.constant 0 : i32
    %c0_i32_1 = arith.constant 0 : i32
    return %arg0, %c0_i32, %c0_i32_0 : i32, i32, i32
  }
  func.func @transform_3(%arg0: i32) -> (i32, i32, i32) {
    %c0_i32 = arith.constant 0 : i32
    %c0_i32_0 = arith.constant 0 : i32
    %c0_i32_1 = arith.constant 0 : i32
    return %arg0, %c0_i32, %c0_i32_0 : i32, i32, i32
  }
  func.func @transform_4(%arg0: i32) -> (i32, i32, i32) {
    %c0_i32 = arith.constant 0 : i32
    %c0_i32_0 = arith.constant 0 : i32
    %c0_i32_1 = arith.constant 0 : i32
    return %arg0, %c0_i32, %c0_i32_0 : i32, i32, i32
  }
}

</mosaic_0001>

<bundles_post_ra>
// kernel: tpu_custom_call.1
= control target key start
LH: loop header
LB: loop body
LE: loop exit
PB: predicated region body
PF: predicated region fallthrough
CT: control target
= control target key end

     0   :  { %s8967_s0 = inlined_call_operand.vmem [shape: f32[16,16], index: 0, kind: input, shape index: {}]   ;;  %s8968_s1 = inlined_call_operand.vmem [shape: f32[16,16], index: 1, kind: input, shape index: {}]   ;;  %s8969_s2 = inlined_call_operand.vmem [shape: f32[2,64,16], index: 2, kind: input, shape index: {}]   ;;  %s8970_s3 = inlined_call_operand.vmem [shape: f32[2,64,16], index: 3, kind: input, shape index: {}]   ;;  %s8971_s4 = inlined_call_operand.hbm [shape: f32[2,8,128], index: 4, kind: output, shape index: {}]  }
   0x1   :  { %9089 = sst [smem:[#allocation125_spill]] %s8967_s0 }
   0x2   :  { %9090 = sst [smem:[#allocation126_spill]] %s8968_s1 }
   0x3   :  { %9091 = sst [smem:[#allocation127_spill]] %s8969_s2 }
   0x4   :  { %9092 = sst [smem:[#allocation128_spill]] %s8970_s3 }
   0x5   :  { %9 = vsyncpa [#allocation3], 0 }
   0x6   :  { %11 = vsyncpa [#allocation3 + $0x1], 0  ;;  %s6577_s15 = smov 0   ;;  %s6579_s16 = smov 0  }
   0x7   :  { %s6581_s17 = smov 0   ;;  %s6583_s18 = smov 0  }
   0x8 LB: > { %9093 = sst [smem:[#allocation5_spill]] %s6540_s16  ;;  %s6598_s19 = sadd.s32 4294967295, %s6548_s18   ;;  %s6548_s18 = sphi %s6583_s18, %s9530_s18   ;;  %s6544_s17 = sphi %s6581_s17, %s9533_s17   ;;  %s6540_s16 = sphi %s6579_s16, %s9532_s16   ;;  %s6536_s15 = sphi %s6577_s15, %s9531_s15  }
   0x9   : > { %9094 = sst [smem:[#allocation6_spill]] %s6544_s17  ;;  %s6322_s20 = sadd.s32 4294967294, %s6548_s18  }
   0xa   : > { %s6602_s21 = sadd.s32 1, %s6548_s18   ;;  %s118_s22 = sadd.s32 1, %s6544_s17 }
   0xb   : > { %9095 = sst [smem:[#allocation7_spill]] %s6602_s21  ;;  %s115_s23 = ssub.s32 %s6548_s18, %s6602_s21 }
   0xc   : > { %p128_p0 = scmp.ne.s32.totalorder %s6544_s17, %s6540_s16  ;;  %p116_p1 = scmp.eq.s32.totalorder %s115_s23, 0 }
   0xd   : > { %p129_p2 = scmp.eq.s32.totalorder %s6598_s19, 1  ;;  %p134_p3 = scmp.ne.s32.totalorder %s6540_s16, %s6536_s15 }
   0xe   : > { %p135_p4 = scmp.eq.s32.totalorder %s6322_s20, 1  ;;  %p6325_p7 = scmp.ge.s32.totalorder %s6548_s18, 1 }
   0xf   : > { %s6613_s24 = scalar_select %p116_p1, %s6544_s17, %s118_s22  }
  0x10   : > { %p6615_p5 = por %p129_p2, %p128_p0  ;;  %p6619_p6 = por %p135_p4, %p134_p3 }
  0x11   : > { %9096 = sst [smem:[#allocation8_spill]] %s6613_s24  ;;  %p175_p8 = scmp.lt.s32.totalorder %s6548_s18, 3 }
  0x12   : > { %s9098_s26 = scalar_select %p6619_p6, 1, 0 }
  0x13   : > { %p176_p9 = pnand %p6325_p7, %p175_p8 }
  0x14   : > { %9099 = sst [smem:[#allocation9_spill]] %s9098_s26 }
  0x15   : > { %179 = sbr.rel (%p176_p9) target bundleno = 1585 (0x631), region = 36 }
  0x1a   : > { %s9100_s1 = sld [smem:[#allocation126_spill]]  ;;  %p206_p10 = scmp.lt.s32.totalorder %s6598_s19, 1  ;;  %vm320_vm5 = vcmask 130048  }
  0x1b   : > { %s9101_s2 = sld [smem:[#allocation127_spill]]  ;;  %s203_s8 = sand.u32 1, %s6540_s16  }
  0x1c   : > { %s6633_s5 = scalar_select %p206_p10, %s6598_s19, 1 }
  0x1d   : > { %s9140_s3 = sld [smem:[#allocation128_spill]]  ;;  %s6326_s11 = sshll.u32 %s203_s8, 3 }
  0x1e   : > { %s6335_s6 = sshll.u32 %s6633_s5, 6  ;;  %s9207_s0 = sld [smem:[#allocation125_spill]] }
  0x1f   : > { %s6332_s13 = sshll.u32 %s6598_s19, 3  ;;  %s205_s17 = scalar_lea.vmem [#allocation2], %s6326_s11 }
  0x20   : > { %v592_v0 = vld [vmem:[%s9100_s1 + $0x8] sm:$0xff]  ;;  %v591_v1 = vld [vmem:[%s9100_s1] sm:$0xff]  ;;  %s6248_s16 = sshll.u32 %s205_s17, 4  ;;  %s6249_s16 = int_to_ptr.vmem [resolvable:$true] %s6248_s16 }
  0x21   : > { %v743_v2 = vand.u32 4294901760, %v592_v0  ;;  %v745_v3 = vand.u32 4294901760, %v591_v1  ;;  %s6641_s9 = scalar_lea.vmem %s9101_s2, %s6335_s6 }
  0x22   : > { %v6644_v6 = vld [vmem:[%s6641_s9] sm:$0xff]  ;;  %v6647_v7 = vld [vmem:[%s6641_s9 + $0x8] sm:$0xff]  ;;  %v6650_v8 = vld [vmem:[%s6641_s9 + $0x10] sm:$0xff] }
  0x23   : > { %v1083_v4 = vsub.f32 %v592_v0, %v743_v2  ;;  %1491 = vmatpush.msra.mxu3 %v743_v2  ;;  %744 = vmatpush.msra.mxu0 %v743_v2  ;;  %v1089_v5 = vsub.f32 %v591_v1, %v745_v3  ;;  %v232_v9 = vand.u32 2147483647, %v6644_v6  ;;  %v233_v10 = vand.u32 2147483647, %v6647_v7  ;;  %v6655_v11 = vld [vmem:[%s6641_s9 + $0x18] sm:$0xff]  ;;  %v6660_v14 = vld [vmem:[%s6641_s9 + $0x20] sm:$0xff]  ;;  %s6937_s12 = scalar_lea.vmem %s9140_s3, %s6335_s6 }
  0x24   : > { %v234_v12 = vand.u32 2147483647, %v6650_v8  ;;  %v235_v13 = vand.u32 2147483647, %v6655_v11  ;;  %v236_v17 = vand.u32 2147483647, %v6660_v14 }
  0x25   : > { %1271 = vmatpush.msra.mxu2 %v1083_v4  ;;  %1493 = vmatpush.msra.mxu3 %v745_v3  ;;  %v240_v15 = vsub.f32 0.0, %v232_v9  ;;  %v241_v16 = vsub.f32 0.0, %v233_v10  ;;  %v1084_v23 = vand.u32 4294901760, %v1083_v4  ;;  %v1090_v28 = vand.u32 4294901760, %v1089_v5  ;;  %v6664_v29 = vld [vmem:[%s6641_s9 + $0x28] sm:$0xff] }
  0x26   : > { %746 = vmatpush.msra.mxu0 %v745_v3  ;;  %v242_v18 = vsub.f32 0.0, %v234_v12  ;;  %v243_v19 = vsub.f32 0.0, %v235_v13  ;;  %v244_v22 = vsub.f32 0.0, %v236_v17  ;;  %v237_v30 = vand.u32 2147483647, %v6664_v29 }
  0x27   : > { %1274 = vmatpush.msra.mxu2 %v1089_v5  ;;  %v248_v20 = vmul.f32 1.442695, %v240_v15  ;;  %v250_v21 = vmul.f32 1.442695, %v241_v16  ;;  %v1085_v27 = vsub.f32 %v1083_v4, %v1084_v23  ;;  %v1091_v32 = vsub.f32 %v1089_v5, %v1090_v28 }
  0x28   : > { %v252_v24 = vmul.f32 1.442695, %v242_v18  ;;  %v254_v25 = vmul.f32 1.442695, %v243_v19  ;;  %v256_v26 = vmul.f32 1.442695, %v244_v22  ;;  %1752 = vmatpush.msrb.mxu0 %v1084_v23 }
  0x29   : > { %6400 = vpow2.f32 %v248_v20  ;;  %v1086_v31 = vand.u32 4294901760, %v1085_v27  ;;  %v245_v33 = vsub.f32 0.0, %v237_v30  ;;  %v1092_v34 = vand.u32 4294901760, %v1091_v32  ;;  %v6765_v30 = vld [vmem:[%s6641_s9 + $0x38] sm:$0xff] }
  0x2a   : > { %6402 = vpow2.f32 %v250_v21  ;;  %1756 = vmatpush.msrb.mxu0 %v1090_v28  ;;  %vm465_vm3 = vcmp.ge.f32.partialorder %v6644_v6, 0.0  ;;  %vm466_vm7 = vcmp.ge.f32.partialorder %v6647_v7, 0.0  ;;  %vm467_vm12 = vcmp.ge.f32.partialorder %v6650_v8, 0.0 }
  0x2b   : > { %6404 = vpow2.f32 %v252_v24  ;;  %1087 = vmatpush.msra.mxu1 %v1086_v31  ;;  %v258_v36 = vmul.f32 1.442695, %v245_v33  ;;  %v6760_v24 = vld [vmem:[%s6641_s9 + $0x30] sm:$0xff]  ;;  %v239_v55 = vand.u32 2147483647, %v6765_v30 }
  0x2c   : > { %6406 = vpow2.f32 %v254_v25 }
  0x2d   : > { %6408 = vpow2.f32 %v256_v26  ;;  %1093 = vmatpush.msra.mxu1 %v1092_v34 }
  0x2e   : > { %6410 = vpow2.f32 %v258_v36 }
  0x2f   : > { %v6667_v35 = vpop.eup %6400  ;;  %1933 = vmatpush.msrb.mxu1 %v743_v2 }
  0x30   : > { %v6669_v37 = vpop.eup %6402  ;;  %v6672_v38 = vadd.f32 1.0, %v6667_v35 }
  0x31   : > { %v6674_v39 = vpop.eup %6404  ;;  %v6677_v40 = vadd.f32 1.0, %v6669_v37  ;;  %1935 = vmatpush.msrb.mxu1 %v745_v3 }
  0x32   : > { %9102 = vst [vmem:[#allocation10_spill] sm:$0xff] %v6672_v38  ;;  %v6679_v41 = vpop.eup %6406  ;;  %6412 = vrcp.f32 %v6672_v38  ;;  %v6686_v43 = vadd.f32 1.0, %v6674_v39  ;;  %v354_v44 = vand.u32 2147483647, %v6672_v38  ;;  %v356_v47 = vand.u32 2147483648, %v6672_v38 }
  0x33   : > { %9103 = vst [vmem:[#allocation11_spill] sm:$0xff] %v6677_v40  ;;  %v6682_v42 = vpop.eup %6408  ;;  %6414 = vrcp.f32 %v6677_v40  ;;  %v6690_v45 = vadd.f32 1.0, %v6679_v41  ;;  %v369_v48 = vand.u32 2147483647, %v6677_v40  ;;  %v371_v50 = vand.u32 2147483648, %v6677_v40 }
  0x34   : > { %9104 = vst [vmem:[#allocation12_spill] sm:$0xff] %v6686_v43  ;;  %v6693_v46 = vadd.f32 1.0, %v6682_v42  ;;  %6416 = vrcp.f32 %v6686_v43  ;;  %v6698_v49 = vpop.eup %6410  ;;  %vm350_vm0 = vweird.f32 %v6672_v38  ;;  %vm6708_vm1 = vcmp.eq.f32.partialorder %v354_v44, 8.507059e+37 }
  0x35   : > { %9105 = vst [vmem:[#allocation13_spill] sm:$0xff] %v6690_v45  ;;  %6418 = vrcp.f32 %v6690_v45  ;;  %v6704_v52 = vadd.f32 1.0, %v6698_v49  ;;  %vm365_vm2 = vweird.f32 %v6677_v40  ;;  %v357_v56 = vor.u32 1.1754944e-38, %v356_v47 }
  0x36   : > { %9106 = vst [vmem:[#allocation14_spill] sm:$0xff] %v6693_v46  ;;  %6420 = vrcp.f32 %v6693_v46  ;;  %vm6715_vm4 = vcmp.eq.f32.partialorder %v369_v48, 8.507059e+37  ;;  %v384_v59 = vand.u32 2147483647, %v6686_v43  ;;  %v372_v61 = vor.u32 1.1754944e-38, %v371_v50 }
  0x37   : > { %9107 = vst [vmem:[#allocation15_spill] sm:$0xff] %v6704_v52  ;;  %v386_v62 = vand.u32 2147483648, %v6686_v43  ;;  %v399_v1 = vand.u32 2147483647, %v6690_v45  ;;  %6422 = vrcp.f32 %v6704_v52  ;;  %vm380_vm9 = vweird.f32 %v6686_v43 }
  0x38   : > { %v6413_v51 = vpop.eup %6412  ;;  %v401_v5 = vand.u32 2147483648, %v6690_v45  ;;  %vm6738_vm11 = vcmp.eq.f32.partialorder %v384_v59, 8.507059e+37  ;;  %vm395_vm13 = vweird.f32 %v6690_v45  ;;  %v238_v50 = vand.u32 2147483647, %v6760_v24 }
  0x39   : > { %v6415_v53 = vpop.eup %6414  ;;  %v346_v54 = vmul.f32 %v6413_v51, %v6672_v38  ;;  %vm351_vm6 = vweird.f32 %v6413_v51  ;;  %v387_v21 = vor.u32 1.1754944e-38, %v386_v62  ;;  %v429_v34 = vand.u32 2147483647, %v6704_v52 }
  0x3a   : > { %v361_v57 = vmul.f32 %v6415_v53, %v6677_v40  ;;  %v6417_v63 = vpop.eup %6416  ;;  %vm366_vm8 = vweird.f32 %v6415_v53  ;;  %vm6734_vm10 = vmor %vm350_vm0, %vm351_vm6  ;;  %vm6755_vm0 = vcmp.eq.f32.partialorder %v399_v1, 8.507059e+37  ;;  %v402_v27 = vor.u32 1.1754944e-38, %v401_v5 }
  0x3b   : > { %v347_v60 = vsub.f32 1.0, %v346_v54  ;;  %v6724_v2 = vpop.eup %6418  ;;  %v376_v4 = vmul.f32 %v6417_v63, %v6686_v43  ;;  %vm6749_vm14 = vmor %vm365_vm2, %vm366_vm8  ;;  %vm381_vm15 = vweird.f32 %v6417_v63  ;;  %v246_v8 = vsub.f32 0.0, %v238_v50 }
  0x3c   : > { %v362_v0 = vsub.f32 1.0, %v361_v57  ;;  %v6729_v9 = vpop.eup %6420  ;;  %v391_v15 = vmul.f32 %v6724_v2, %v6690_v45  ;;  %vm6776_vm2 = vmor %vm380_vm9, %vm381_vm15  ;;  %vm396_vm6 = vweird.f32 %v6724_v2  ;;  %vm468_vm8 = vcmp.ge.f32.partialorder %v6655_v11, 0.0 }
  0x3d   : > { %v348_v3 = vmul.f32 %v6413_v51, %v347_v60  ;;  %v377_v18 = vsub.f32 1.0, %v376_v4  ;;  %v406_v19 = vmul.f32 %v6729_v9, %v6693_v46  ;;  %v6767_v31 = vpop.eup %6422  ;;  %v260_v23 = vmul.f32 1.442695, %v246_v8 }
  0x3e   : > { %v363_v12 = vmul.f32 %v6415_v53, %v362_v0  ;;  %v392_v22 = vsub.f32 1.0, %v391_v15  ;;  %v421_v58 = vmul.f32 %v6767_v31, %v6704_v52  ;;  %vm470_vm15 = vcmp.ge.f32.partialorder %v6664_v29, 0.0 }
  0x3f   : > { %v349_v16 = vadd.f32 %v6413_v51, %v348_v3  ;;  %v378_v26 = vmul.f32 %v6417_v63, %v377_v18  ;;  %v407_v28 = vsub.f32 1.0, %v406_v19  ;;  %v414_v3 = vand.u32 2147483647, %v6693_v46 }
  0x40   : > { %v364_v20 = vadd.f32 %v6415_v53, %v363_v12  ;;  %v393_v36 = vmul.f32 %v6724_v2, %v392_v22  ;;  %v422_v10 = vsub.f32 1.0, %v421_v58  ;;  %6424 = vpow2.f32 %v260_v23 }
  0x41   : > { %v353_v25 = vsel %vm6734_vm10, %v6413_v51, %v349_v16  ;;  %v379_v48 = vadd.f32 %v6417_v63, %v378_v26  ;;  %v408_v54 = vmul.f32 %v6729_v9, %v407_v28  ;;  %vm415_vm9 = vcmp.eq.f32.partialorder %v414_v3, 8.507059e+37 }
  0x42   : > { %v358_v32 = vsel %vm6708_vm1, %v357_v56, %v353_v25  ;;  %v368_v33 = vsel %vm6749_vm14, %v6415_v53, %v364_v20  ;;  %v394_v53 = vadd.f32 %v6724_v2, %v393_v36  ;;  %vm6798_vm1 = vmor %vm395_vm13, %vm396_vm6  ;;  %v247_v25 = vsub.f32 0.0, %v239_v55 }
  0x43   : > { %v473_v44 = vmul.f32 %v6667_v35, %v358_v32  ;;  %v373_v47 = vsel %vm6715_vm4, %v372_v61, %v368_v33  ;;  %v383_v35 = vsel %vm6776_vm2, %v6417_v63, %v379_v48  ;;  %vm411_vm4 = vweird.f32 %v6729_v9 }
  0x44   : > { %v474_v51 = vmul.f32 %v6669_v37, %v373_v47  ;;  %v416_v37 = vand.u32 2147483648, %v6693_v46  ;;  %v388_v60 = vsel %vm6738_vm11, %v387_v21, %v383_v35  ;;  %v398_v7 = vsel %vm6798_vm1, %v6724_v2, %v394_v53 }
  0x45   : > { %v6792_v56 = vsel %vm465_vm3, %v358_v32, %v473_v44  ;;  %vm410_vm3 = vweird.f32 %v6693_v46  ;;  %v475_v63 = vmul.f32 %v6674_v39, %v388_v60  ;;  %v409_v1 = vadd.f32 %v6729_v9, %v408_v54 }
  0x46   : > { %9122 = vst [vmem:[#allocation16_spill] sm:$0xff] %v6792_v56  ;;  %v610_v59 = vsel %vm320_vm5, %v6792_v56, 0  ;;  %v6809_v6 = vsel %vm466_vm7, %v373_v47, %v474_v51  ;;  %v403_v39 = vsel %vm6755_vm0, %v402_v27, %v398_v7  ;;  %vm6841_vm7 = vmor %vm410_vm3, %vm411_vm4  ;;  %v417_v18 = vor.u32 1.1754944e-38, %v416_v37  ;;  %v6425_v35 = vpop.eup %6424 }
  0x47   : > { %9125 = vst [vmem:[#allocation17_spill] sm:$0xff] %v6809_v6  ;;  %v6814_v61 = vand.u32 4294901760, %v610_v59  ;;  %v613_v62 = vsel %vm320_vm5, %v6809_v6, 0  ;;  %v6831_v5 = vsel %vm467_vm12, %v388_v60, %v475_v63  ;;  %v476_v13 = vmul.f32 %v6679_v41, %v403_v39 }
  0x48   : > { %v6820_v0 = vand.u32 4294901760, %v613_v62  ;;  %9126 = vst [vmem:[#allocation18_spill] sm:$0xff] %v6831_v5  ;;  %v616_v2 = vsel %vm320_vm5, %v6831_v5, 0  ;;  %v413_v41 = vsel %vm6841_vm7, %v6729_v9, %v409_v1  ;;  %v423_v21 = vmul.f32 %v6767_v31, %v422_v10 }
  0x49   : > { %v748_v4 = vsub.f32 %v610_v59, %v6814_v61  ;;  %1095 = vmatmul.f32.vlgmr.msra.gmra.mxu1 %v6814_v61  ;;  %v6846_v17 = vand.u32 4294901760, %v616_v2  ;;  %v6852_v22 = vsel %vm468_vm8, %v403_v39, %v476_v13  ;;  %vm425_vm10 = vweird.f32 %v6704_v52 }
  0x4a   : > { %v756_v12 = vsub.f32 %v613_v62, %v6820_v0  ;;  %9129 = vst [vmem:[#allocation19_spill] sm:$0xff] %v6852_v22  ;;  %vm426_vm11 = vweird.f32 %v6767_v31  ;;  %v418_v27 = vsel %vm415_vm9, %v417_v18, %v413_v41  ;;  %v431_v28 = vand.u32 2147483648, %v6704_v52 }
  0x4b   : > { %1277 = vmatmul.f32.vlgmr.msra.gmra.mxu2 %v748_v4  ;;  %v749_v16 = vand.u32 4294901760, %v748_v4  ;;  %v764_v11 = vsub.f32 %v616_v2, %v6846_v17  ;;  %v619_v9 = vsel %vm320_vm5, %v6852_v22, 0  ;;  %v424_v33 = vadd.f32 %v6767_v31, %v423_v21  ;;  %vm6863_vm12 = vmor %vm425_vm10, %vm426_vm11 }
  0x4c   : > { %v757_v20 = vand.u32 4294901760, %v756_v12  ;;  %v262_v44 = vmul.f32 1.442695, %v247_v25  ;;  %v477_v47 = vmul.f32 %v6682_v42, %v418_v27  ;;  %v6868_v50 = vand.u32 4294901760, %v619_v9 }
  0x4d   : > { %1497 = vmatmul.f32.vlgmr.msra.gmra.mxu3 %v749_v16  ;;  %v750_v19 = vsub.f32 %v748_v4, %v749_v16  ;;  %v765_v48 = vand.u32 4294901760, %v764_v11  ;;  %vm469_vm13 = vcmp.ge.f32.partialorder %v6660_v14, 0.0  ;;  %v432_v51 = vor.u32 1.1754944e-38, %v431_v28 }
  0x4e   : > { %v758_v32 = vsub.f32 %v756_v12, %v757_v20  ;;  %v428_v54 = vsel %vm6863_vm12, %v6767_v31, %v424_v33  ;;  %vm430_vm14 = vcmp.eq.f32.partialorder %v429_v34, 8.507059e+37  ;;  %6426 = vpow2.f32 %v262_v44 }
  0x4f   : > { %v751_v26 = vand.u32 4294901760, %v750_v19  ;;  %v6874_v55 = vsel %vm469_vm13, %v418_v27, %v477_v47  ;;  %v433_v57 = vsel %vm430_vm14, %v432_v51, %v428_v54  ;;  %v766_v42 = vsub.f32 %v764_v11, %v765_v48 }
  0x50   : > { %v759_v53 = vand.u32 4294901760, %v758_v32  ;;  %9132 = vst [vmem:[#allocation20_spill] sm:$0xff] %v6874_v55  ;;  %v772_v37 = vsub.f32 %v619_v9, %v6868_v50  ;;  %v6878_v14 = vadd.f32 1.0, %v6425_v35  ;;  %v622_v58 = vsel %vm320_vm5, %v6874_v55, 0 }
  0x51   : > { %752 = vmatmul.f32.vlgmr.msra.gmra.mxu0 %v751_v26  ;;  %1099 = vmatmul.f32.gmra.mxu1 %v6820_v0  ;;  %v478_v31 = vmul.f32 %v6698_v49, %v433_v57  ;;  %v767_v62 = vand.u32 4294901760, %v766_v42  ;;  %v6890_v7 = vand.u32 4294901760, %v622_v58  ;;  %vm471_vm8 = vcmp.ge.f32.partialorder %v6760_v24, 0.0 }
  0x52   : > { %9133 = vst [vmem:[#allocation21_spill] sm:$0xff] %v6878_v14  ;;  %6428 = vrcp.f32 %v6878_v14  ;;  %v773_v63 = vand.u32 4294901760, %v772_v37  ;;  %v446_v10 = vand.u32 2147483648, %v6878_v14  ;;  %vm440_vm0 = vweird.f32 %v6878_v14 }
  0x53   : > { %1282 = vmatmul.f32.gmra.mxu2 %v756_v12  ;;  %v6893_v1 = vsel %vm470_vm15, %v433_v57, %v478_v31  ;;  %v780_v49 = vsub.f32 %v622_v58, %v6890_v7  ;;  %v444_v13 = vand.u32 2147483647, %v6878_v14  ;;  %vm472_vm10 = vcmp.ge.f32.partialorder %v6765_v30, 0.0 }
  0x54   : > { %v6882_v59 = vpop.eup %6426  ;;  %9135 = vst [vmem:[#allocation23_spill] sm:$0xff] %v6893_v1  ;;  %v774_v4 = vsub.f32 %v772_v37, %v773_v63  ;;  %v625_v29 = vsel %vm320_vm5, %v6893_v1, 0 }
  0x55   : > { %1503 = vmatmul.f32.gmra.mxu3 %v757_v20  ;;  %v6888_v60 = vadd.f32 1.0, %v6882_v59  ;;  %v781_v8 = vand.u32 4294901760, %v780_v49  ;;  %v6903_v16 = vand.u32 4294901760, %v625_v29  ;;  %v447_v20 = vor.u32 1.1754944e-38, %v446_v10  ;;  %v6951_v10 = vld [vmem:[%s6937_s12 + $0x8] sm:$0xff] }
  0x56   : > { %v775_v15 = vand.u32 4294901760, %v774_v4  ;;  %vm445_vm4 = vcmp.eq.f32.partialorder %v444_v13, 8.507059e+37  ;;  %v637_v13 = vsel %vm320_vm5, %v6951_v10, 0 }
  0x57   : > { %9134 = vst [vmem:[#allocation22_spill] sm:$0xff] %v6888_v60  ;;  %6430 = vrcp.f32 %v6888_v60  ;;  %v461_v41 = vand.u32 2147483648, %v6888_v60  ;;  %vm455_vm1 = vweird.f32 %v6888_v60  ;;  %v459_v25 = vand.u32 2147483647, %v6888_v60 }
  0x58   : > { %v6429_v3 = vpop.eup %6428  ;;  %v788_v27 = vsub.f32 %v625_v29, %v6903_v16 }
  0x59   : > { %760 = vmatmul.f32.gmra.mxu0 %v759_v53  ;;  %1103 = vmatmul.f32.gmra.mxu1 %v6846_v17  ;;  %v436_v39 = vmul.f32 %v6429_v3, %v6878_v14  ;;  %vm441_vm2 = vweird.f32 %v6429_v3  ;;  %v462_v9 = vor.u32 1.1754944e-38, %v461_v41  ;;  %vm460_vm9 = vcmp.eq.f32.partialorder %v459_v25, 8.507059e+37 }
  0x5a   : > { %vm6907_vm6 = vmor %vm440_vm0, %vm441_vm2  ;;  %v789_v47 = vand.u32 4294901760, %v788_v27 }
  0x5b   : > { %1287 = vmatmul.f32.gmra.mxu2 %v764_v11  ;;  %v437_v2 = vsub.f32 1.0, %v436_v39  ;;  %v782_v11 = vsub.f32 %v780_v49, %v781_v8 }
  0x5c   : > { %v790_v24 = vsub.f32 %v788_v27, %v789_v47 }
  0x5d   : > { %1509 = vmatmul.f32.gmra.mxu3 %v765_v48  ;;  %v6431_v12 = vpop.eup %6430  ;;  %v438_v19 = vmul.f32 %v6429_v3, %v437_v2  ;;  %v783_v44 = vand.u32 4294901760, %v782_v11  ;;  %v6969_v11 = vld [vmem:[%s6937_s12 + $0x18] sm:$0xff] }
  0x5e   : > { %v451_v18 = vmul.f32 %v6431_v12, %v6888_v60  ;;  %vm456_vm3 = vweird.f32 %v6431_v12  ;;  %v791_v30 = vand.u32 4294901760, %v790_v24  ;;  %v6987_v24 = vld [vmem:[%s6937_s12 + $0x28] sm:$0xff] }
  0x5f   : > { %v439_v26 = vadd.f32 %v6429_v3, %v438_v19  ;;  %vm457_vm7 = vmor %vm455_vm1, %vm456_vm3  ;;  %v6960_v19 = vld [vmem:[%s6937_s12 + $0x10] sm:$0xff] }
  0x60   : > { %v452_v23 = vsub.f32 1.0, %v451_v18  ;;  %v6957_v18 = vand.u32 4294901760, %v637_v13  ;;  %v640_v21 = vsel %vm320_vm5, %v6960_v19, 0 }
  0x61   : > { %768 = vmatmul.f32.gmra.mxu0 %v767_v62  ;;  %1107 = vmatmul.f32.gmra.mxu1 %v6868_v50  ;;  %v443_v32 = vsel %vm6907_vm6, %v6429_v3, %v439_v26  ;;  %v6942_v62 = vld [vmem:[%s6937_s12] sm:$0xff]  ;;  %v6966_v26 = vand.u32 4294901760, %v640_v21 }
  0x62   : > { %v453_v28 = vmul.f32 %v6431_v12, %v452_v23  ;;  %v448_v33 = vsel %vm445_vm4, %v447_v20, %v443_v32  ;;  %v634_v4 = vsel %vm320_vm5, %v6942_v62, 0  ;;  %v820_v41 = vsub.f32 %v637_v13, %v6957_v18 }
  0x63   : > { %1292 = vmatmul.f32.gmra.mxu2 %v772_v37  ;;  %v479_v36 = vmul.f32 %v6425_v35, %v448_v33  ;;  %v6948_v39 = vand.u32 4294901760, %v634_v4  ;;  %v643_v32 = vsel %vm320_vm5, %v6969_v11, 0 }
  0x64   : > { %v454_v34 = vadd.f32 %v6431_v12, %v453_v28  ;;  %v821_v25 = vand.u32 4294901760, %v820_v41  ;;  %v828_v28 = vsub.f32 %v640_v21, %v6966_v26 }
  0x65   : > { %1515 = vmatmul.f32.gmra.mxu3 %v773_v63  ;;  %v6918_v51 = vsel %vm471_vm8, %v448_v33, %v479_v36  ;;  %v812_v2 = vsub.f32 %v634_v4, %v6948_v39  ;;  %v6978_v36 = vld [vmem:[%s6937_s12 + $0x20] sm:$0xff]  ;;  %v6996_v4 = vld [vmem:[%s6937_s12 + $0x30] sm:$0xff] }
  0x66   : > { %v458_v48 = vsel %vm457_vm7, %v6431_v12, %v454_v34  ;;  %9138 = vst [vmem:[#allocation24_spill] sm:$0xff] %v6918_v51  ;;  %v628_v54 = vsel %vm320_vm5, %v6918_v51, 0  ;;  %v829_v33 = vand.u32 4294901760, %v828_v28  ;;  %v6975_v34 = vand.u32 4294901760, %v643_v32 }
  0x67   : > { %v463_v53 = vsel %vm460_vm9, %v462_v9, %v458_v48  ;;  %v6924_v42 = vand.u32 4294901760, %v628_v54  ;;  %v646_v48 = vsel %vm320_vm5, %v6978_v36, 0 }
  0x68   : > { %v480_v57 = vmul.f32 %v6882_v59, %v463_v53 }
  0x69   : > { %776 = vmatmul.f32.gmra.mxu0 %v775_v15  ;;  %1111 = vmatmul.f32.gmra.mxu1 %v6890_v7  ;;  %v796_v37 = vsub.f32 %v628_v54, %v6924_v42 }
  0x6a   : > { %v6927_v35 = vsel %vm472_vm10, %v463_v53, %v480_v57  ;;  %v6984_v57 = vand.u32 4294901760, %v646_v48 }
  0x6b   : > { %1297 = vmatmul.f32.gmra.mxu2 %v780_v49  ;;  %9139 = vst [vmem:[#allocation25_spill] sm:$0xff] %v6927_v35  ;;  %v631_v58 = vsel %vm320_vm5, %v6927_v35, 0  ;;  %v797_v59 = vand.u32 4294901760, %v796_v37 }
  0x6c   : > { %v6939_v31 = vand.u32 4294901760, %v631_v58 }
  0x6d   : > { %1521 = vmatmul.f32.gmra.mxu3 %v781_v8  ;;  %v798_v63 = vsub.f32 %v796_v37, %v797_v59  ;;  %v813_v8 = vand.u32 4294901760, %v812_v2 }
  0x6e   : > { %v804_v3 = vsub.f32 %v631_v58, %v6939_v31  ;;  %v844_v58 = vsub.f32 %v646_v48, %v6984_v57 }
  0x6f   : > { %v799_v49 = vand.u32 4294901760, %v798_v63  ;;  %v814_v20 = vsub.f32 %v812_v2, %v813_v8 }
  0x70   : > { %v805_v29 = vand.u32 4294901760, %v804_v3  ;;  %v845_v63 = vand.u32 4294901760, %v844_v58 }
  0x71   : > { %784 = vmatmul.f32.gmra.mxu0 %v783_v44  ;;  %1115 = vmatmul.f32.gmra.mxu1 %v6903_v16  ;;  %v815_v23 = vand.u32 4294901760, %v814_v20  ;;  %v830_v44 = vsub.f32 %v828_v28, %v829_v33 }
  0x72   : > { %v806_v12 = vsub.f32 %v804_v3, %v805_v29 }
  0x73   : > { %1302 = vmatmul.f32.gmra.mxu2 %v788_v27  ;;  %v822_v27 = vsub.f32 %v820_v41, %v821_v25  ;;  %v831_v53 = vand.u32 4294901760, %v830_v44 }
  0x74   : > { %v807_v15 = vand.u32 4294901760, %v806_v12  ;;  %v652_v12 = vsel %vm320_vm5, %v6996_v4, 0 }
  0x75   : > { %1527 = vmatmul.f32.gmra.mxu3 %v789_v47  ;;  %v823_v9 = vand.u32 4294901760, %v822_v27  ;;  %v836_v47 = vsub.f32 %v643_v32, %v6975_v34 }
  0x77   : > { %v837_v54 = vand.u32 4294901760, %v836_v47 }
  0x79   : > { %792 = vmatmul.f32.gmra.mxu0 %v791_v30  ;;  %1119 = vmatmul.f32.gmra.mxu1 %v6924_v42  ;;  %v649_v30 = vsel %vm320_vm5, %v6987_v24, 0 }
  0x7b   : > { %1307 = vmatmul.f32.gmra.mxu2 %v796_v37  ;;  %v838_v37 = vsub.f32 %v836_v47, %v837_v54 }
  0x7d   : > { %1533 = vmatmul.f32.gmra.mxu3 %v797_v59  ;;  %v839_v59 = vand.u32 4294901760, %v838_v37 }
  0x81   : > { %800 = vmatmul.f32.gmra.mxu0 %v799_v49  ;;  %1123 = vmatmul.f32.gmra.mxu1 %v6939_v31  ;;  %v846_v49 = vsub.f32 %v844_v58, %v845_v63 }
  0x83   : > { %1312 = vmatmul.f32.gmra.mxu2 %v804_v3  ;;  %v6993_v3 = vand.u32 4294901760, %v649_v30 }
  0x85   : > { %1539 = vmatmul.f32.gmra.mxu3 %v805_v29  ;;  %v852_v29 = vsub.f32 %v649_v30, %v6993_v3 }
  0x87   : > { %v853_v13 = vand.u32 4294901760, %v852_v29 }
  0x89   : > { %808 = vmatmul.f32.gmra.mxu0 %v807_v15  ;;  %1127 = vmatmul.f32.gmra.mxu1 %v6948_v39  ;;  %v7002_v15 = vand.u32 4294901760, %v652_v12  ;;  %v854_v20 = vsub.f32 %v852_v29, %v853_v13 }
  0x8b   : > { %1317 = vmatmul.f32.gmra.mxu2 %v812_v2  ;;  %v847_v2 = vand.u32 4294901760, %v846_v49 }
  0x8d   : > { %1545 = vmatmul.f32.gmra.mxu3 %v813_v8  ;;  %v7005_v8 = vld [vmem:[%s6937_s12 + $0x38] sm:$0xff] }
  0x8e   : > { %v655_v21 = vsel %vm320_vm5, %v7005_v8, 0 }
  0x8f   : > { %v7011_v27 = vand.u32 4294901760, %v655_v21 }
  0x91   : > { %816 = vmatmul.f32.gmra.mxu0 %v815_v23  ;;  %1131 = vmatmul.f32.gmra.mxu1 %v6957_v18  ;;  %v855_v23 = vand.u32 4294901760, %v854_v20 }
  0x93   : > { %1322 = vmatmul.f32.gmra.mxu2 %v820_v41  ;;  %v860_v41 = vsub.f32 %v652_v12, %v7002_v15 }
  0x95   : > { %1551 = vmatmul.f32.gmra.mxu3 %v821_v25  ;;  %v861_v25 = vand.u32 4294901760, %v860_v41 }
  0x97   : > { %v862_v32 = vsub.f32 %v860_v41, %v861_v25 }
  0x99   : > { %824 = vmatmul.f32.gmra.mxu0 %v823_v9  ;;  %1135 = vmatmul.f32.gmra.mxu1 %v6966_v26  ;;  %v868_v9 = vsub.f32 %v655_v21, %v7011_v27  ;;  %v863_v44 = vand.u32 4294901760, %v862_v32 }
  0x9b   : > { %1327 = vmatmul.f32.gmra.mxu2 %v828_v28  ;;  %v593_v28 = vmul.f32 %v6792_v56, %v6792_v56 }
  0x9d   : > { %1557 = vmatmul.f32.gmra.mxu3 %v829_v33  ;;  %v658_v33 = vsel %vm320_vm5, %v593_v28, 0  ;;  %v596_v28 = vmul.f32 %v6852_v22, %v6852_v22 }
  0x9e   : > { %v7018_v48 = vand.u32 4294901760, %v658_v33 }
  0xa0   : > { %v876_v37 = vsub.f32 %v658_v33, %v7018_v48 }
  0xa1   : > { %832 = vmatmul.f32.gmra.mxu0 %v831_v53  ;;  %1139 = vmatmul.f32.gmra.mxu1 %v6975_v34  ;;  %v594_v53 = vmul.f32 %v6809_v6, %v6809_v6 }
  0xa3   : > { %1332 = vmatmul.f32.gmra.mxu2 %v836_v47  ;;  %v869_v47 = vand.u32 4294901760, %v868_v9 }
  0xa5   : > { %1563 = vmatmul.f32.gmra.mxu3 %v837_v54  ;;  %v870_v54 = vsub.f32 %v868_v9, %v869_v47 }
  0xa7   : > { %v871_v30 = vand.u32 4294901760, %v870_v54  ;;  %v667_v54 = vsel %vm320_vm5, %v596_v28, 0 }
  0xa9   : > { %840 = vmatmul.f32.gmra.mxu0 %v839_v59  ;;  %1143 = vmatmul.f32.gmra.mxu1 %v6984_v57  ;;  %v877_v59 = vand.u32 4294901760, %v876_v37 }
  0xab   : > { %1337 = vmatmul.f32.gmra.mxu2 %v844_v58  ;;  %v661_v58 = vsel %vm320_vm5, %v594_v53, 0  ;;  %v878_v12 = vsub.f32 %v876_v37, %v877_v59 }
  0xad   : > { %1569 = vmatmul.f32.gmra.mxu3 %v845_v63  ;;  %v7025_v63 = vand.u32 4294901760, %v661_v58  ;;  %v879_v20 = vand.u32 4294901760, %v878_v12  ;;  %v597_v12 = vmul.f32 %v6874_v55, %v6874_v55 }
  0xb1   : > { %848 = vmatmul.f32.gmra.mxu0 %v847_v2  ;;  %1147 = vmatmul.f32.gmra.mxu1 %v6993_v3  ;;  %v884_v2 = vsub.f32 %v661_v58, %v7025_v63 }
  0xb3   : > { %1342 = vmatmul.f32.gmra.mxu2 %v852_v29  ;;  %v595_v29 = vmul.f32 %v6831_v5, %v6831_v5 }
  0xb5   : > { %1575 = vmatmul.f32.gmra.mxu3 %v853_v13  ;;  %v664_v13 = vsel %vm320_vm5, %v595_v29, 0 }
  0xb6   : > { %v7032_v21 = vand.u32 4294901760, %v664_v13 }
  0xb8   : > { %v892_v53 = vsub.f32 %v664_v13, %v7032_v21 }
  0xb9   : > { %856 = vmatmul.f32.gmra.mxu0 %v855_v23  ;;  %1151 = vmatmul.f32.gmra.mxu1 %v7002_v15 }
  0xbb   : > { %1347 = vmatmul.f32.gmra.mxu2 %v860_v41  ;;  %v885_v41 = vand.u32 4294901760, %v884_v2 }
  0xbd   : > { %1581 = vmatmul.f32.gmra.mxu3 %v861_v25 }
  0xc1   : > { %864 = vmatmul.f32.gmra.mxu0 %v863_v44  ;;  %1155 = vmatmul.f32.gmra.mxu1 %v7011_v27 }
  0xc3   : > { %1352 = vmatmul.f32.gmra.mxu2 %v868_v9 }
  0xc5   : > { %1587 = vmatmul.f32.gmra.mxu3 %v869_v47  ;;  %v886_v47 = vsub.f32 %v884_v2, %v885_v41 }
  0xc6   : > { %v1096_v49 = vpop.f32.mrf.mxu1 }
  0xc7   : > { %v887_v58 = vand.u32 4294901760, %v886_v47 }
  0xc9   : > { %872 = vmatmul.f32.gmra.mxu0 %v871_v30  ;;  %1159 = vmatmul.f32.gmra.mxu1 %v7018_v48  ;;  %v893_v30 = vand.u32 4294901760, %v892_v53 }
  0xcb   : > { %1357 = vmatmul.f32.gmra.mxu2 %v876_v37  ;;  %v894_v13 = vsub.f32 %v892_v53, %v893_v30 }
  0xcd   : > { %1593 = vmatmul.f32.gmra.mxu3 %v877_v59  ;;  %v7041_v59 = vand.u32 4294901760, %v667_v54 }
  0xce   : > { %v753_v23 = vpop.f32.mrf.mxu0  ;;  %v1278_v25 = vpop.f32.mrf.mxu2 }
  0xcf   : > { %v1097_v32 = vadd.f32 %v1096_v49, %v753_v23  ;;  %v1100_v9 = vpop.f32.mrf.mxu1 }
  0xd0   : > { %v1498_v33 = vpop.f32.mrf.mxu3 }
  0xd1   : > { %v1279_v44 = vadd.f32 %v1278_v25, %v1097_v32  ;;  %880 = vmatmul.f32.gmra.mxu0 %v879_v20  ;;  %1163 = vmatmul.f32.gmra.mxu1 %v7025_v63 }
  0xd3   : > { %v7039_v37 = vadd.f32 %v1498_v33, %v1279_v44  ;;  %1362 = vmatmul.f32.gmra.mxu2 %v884_v2  ;;  %v900_v2 = vsub.f32 %v667_v54, %v7041_v59  ;;  %v895_v33 = vand.u32 4294901760, %v894_v13 }
  0xd5   : > { %1599 = vmatmul.f32.gmra.mxu3 %v885_v41  ;;  %v670_v41 = vsel %vm320_vm5, %v597_v12, 0  ;;  %v901_v44 = vand.u32 4294901760, %v900_v2 }
  0xd6   : > { %v761_v49 = vpop.f32.mrf.mxu0  ;;  %v1283_v29 = vpop.f32.mrf.mxu2  ;;  %v7050_v47 = vand.u32 4294901760, %v670_v41 }
  0xd7   : > { %v1101_v20 = vadd.f32 %v1100_v9, %v761_v49  ;;  %v1104_v23 = vpop.f32.mrf.mxu1  ;;  %v902_v54 = vsub.f32 %v900_v2, %v901_v44 }
  0xd8   : > { %v1504_v25 = vpop.f32.mrf.mxu3 }
  0xd9   : > { %v1284_v32 = vadd.f32 %v1283_v29, %v1101_v20  ;;  %888 = vmatmul.f32.gmra.mxu0 %v887_v58  ;;  %1167 = vmatmul.f32.gmra.mxu1 %v7032_v21  ;;  %v598_v58 = vmul.f32 %v6893_v1, %v6893_v1 }
  0xdb   : > { %v7048_v28 = vadd.f32 %v1504_v25, %v1284_v32  ;;  %1367 = vmatmul.f32.gmra.mxu2 %v892_v53  ;;  %v908_v53 = vsub.f32 %v670_v41, %v7050_v47  ;;  %v903_v25 = vand.u32 4294901760, %v902_v54 }
  0xdd   : > { %1605 = vmatmul.f32.gmra.mxu3 %v893_v30  ;;  %v673_v30 = vsel %vm320_vm5, %v598_v58, 0  ;;  %v909_v32 = vand.u32 4294901760, %v908_v53 }
  0xde   : > { %v769_v9 = vpop.f32.mrf.mxu0  ;;  %v1288_v49 = vpop.f32.mrf.mxu2  ;;  %v7059_v13 = vand.u32 4294901760, %v673_v30 }
  0xdf   : > { %v1105_v29 = vadd.f32 %v1104_v23, %v769_v9  ;;  %v1108_v20 = vpop.f32.mrf.mxu1  ;;  %v910_v41 = vsub.f32 %v908_v53, %v909_v32 }
  0xe0   : > { %v1510_v60 = vpop.f32.mrf.mxu3  ;;  %9141 = vst [vmem:[#allocation26_spill] sm:$0xff] %v7059_v13 }
  0xe1   : > { %v1289_v14 = vadd.f32 %v1288_v49, %v1105_v29  ;;  %896 = vmatmul.f32.gmra.mxu0 %v895_v33  ;;  %1171 = vmatmul.f32.gmra.mxu1 %v7041_v59  ;;  %v599_v33 = vmul.f32 %v6918_v51, %v6918_v51 }
  0xe3   : > { %v7057_v12 = vadd.f32 %v1510_v60, %v1289_v14  ;;  %1372 = vmatmul.f32.gmra.mxu2 %v900_v2  ;;  %v916_v14 = vsub.f32 %v673_v30, %v7059_v13  ;;  %v676_v60 = vsel %vm320_vm5, %v599_v33, 0 }
  0xe4   : > { %v7068_v54 = vand.u32 4294901760, %v676_v60 }
  0xe5   : > { %1611 = vmatmul.f32.gmra.mxu3 %v901_v44  ;;  %v911_v44 = vand.u32 4294901760, %v910_v41  ;;  %v917_v58 = vand.u32 4294901760, %v916_v14 }
  0xe6   : > { %v777_v23 = vpop.f32.mrf.mxu0  ;;  %v1293_v9 = vpop.f32.mrf.mxu2  ;;  %9142 = vst [vmem:[#allocation27_spill] sm:$0xff] %v7068_v54 }
  0xe7   : > { %v1109_v49 = vadd.f32 %v1108_v20, %v777_v23  ;;  %v1112_v29 = vpop.f32.mrf.mxu1  ;;  %v918_v30 = vsub.f32 %v916_v14, %v917_v58 }
  0xe8   : > { %v1516_v52 = vpop.f32.mrf.mxu3 }
  0xe9   : > { %v1294_v46 = vadd.f32 %v1293_v9, %v1109_v49  ;;  %904 = vmatmul.f32.gmra.mxu0 %v903_v25  ;;  %1175 = vmatmul.f32.gmra.mxu1 %v7050_v47  ;;  %v600_v25 = vmul.f32 %v6927_v35, %v6927_v35 }
  0xeb   : > { %v7066_v2 = vadd.f32 %v1516_v52, %v1294_v46  ;;  %1377 = vmatmul.f32.gmra.mxu2 %v908_v53  ;;  %v924_v46 = vsub.f32 %v676_v60, %v7068_v54  ;;  %v679_v52 = vsel %vm320_vm5, %v600_v25, 0 }
  0xec   : > { %v7077_v41 = vand.u32 4294901760, %v679_v52 }
  0xed   : > { %1617 = vmatmul.f32.gmra.mxu3 %v909_v32  ;;  %v919_v32 = vand.u32 4294901760, %v918_v30  ;;  %v925_v33 = vand.u32 4294901760, %v924_v46 }
  0xee   : > { %v785_v20 = vpop.f32.mrf.mxu0  ;;  %v1298_v23 = vpop.f32.mrf.mxu2  ;;  %9144 = vst [vmem:[#allocation29_spill] sm:$0xff] %v7077_v41 }
  0xef   : > { %v1113_v9 = vadd.f32 %v1112_v29, %v785_v20  ;;  %v1116_v49 = vpop.f32.mrf.mxu1  ;;  %v926_v60 = vsub.f32 %v924_v46, %v925_v33 }
  0xf0   : > { %v1522_v45 = vpop.f32.mrf.mxu3 }
  0xf1   : > { %v1299_v43 = vadd.f32 %v1298_v23, %v1113_v9  ;;  %912 = vmatmul.f32.gmra.mxu0 %v911_v44  ;;  %1179 = vmatmul.f32.gmra.mxu1 %v7059_v13  ;;  %v601_v44 = vmul.f32 %v6942_v62, %v6942_v62 }
  0xf3   : > { %v7075_v53 = vadd.f32 %v1522_v45, %v1299_v43  ;;  %1382 = vmatmul.f32.gmra.mxu2 %v916_v14  ;;  %v932_v43 = vsub.f32 %v679_v52, %v7077_v41  ;;  %v682_v45 = vsel %vm320_vm5, %v601_v44, 0 }
  0xf4   : > { %v7086_v30 = vand.u32 4294901760, %v682_v45 }
  0xf5   : > { %9143 = vst [vmem:[#allocation28_spill] sm:$0xff] %v7075_v53  ;;  %1623 = vmatmul.f32.gmra.mxu3 %v917_v58  ;;  %v927_v58 = vand.u32 4294901760, %v926_v60  ;;  %v933_v25 = vand.u32 4294901760, %v932_v43 }
  0xf6   : > { %v793_v29 = vpop.f32.mrf.mxu0  ;;  %v1303_v20 = vpop.f32.mrf.mxu2  ;;  %9146 = vst [vmem:[#allocation31_spill] sm:$0xff] %v7086_v30 }
  0xf7   : > { %v1117_v23 = vadd.f32 %v1116_v49, %v793_v29  ;;  %v1120_v9 = vpop.f32.mrf.mxu1  ;;  %v934_v52 = vsub.f32 %v932_v43, %v933_v25 }
  0xf8   : > { %v1528_v40 = vpop.f32.mrf.mxu3 }
  0xf9   : > { %v1304_v38 = vadd.f32 %v1303_v20, %v1117_v23  ;;  %920 = vmatmul.f32.gmra.mxu0 %v919_v32  ;;  %1183 = vmatmul.f32.gmra.mxu1 %v7068_v54  ;;  %v602_v32 = vmul.f32 %v6951_v10, %v6951_v10 }
  0xfb   : > { %v7084_v14 = vadd.f32 %v1528_v40, %v1304_v38  ;;  %1387 = vmatmul.f32.gmra.mxu2 %v924_v46  ;;  %v940_v38 = vsub.f32 %v682_v45, %v7086_v30  ;;  %v685_v40 = vsel %vm320_vm5, %v602_v32, 0 }
  0xfc   : > { %v7095_v60 = vand.u32 4294901760, %v685_v40 }
  0xfd   : > { %9145 = vst [vmem:[#allocation30_spill] sm:$0xff] %v7084_v14  ;;  %1629 = vmatmul.f32.gmra.mxu3 %v925_v33  ;;  %v935_v33 = vand.u32 4294901760, %v934_v52  ;;  %v941_v44 = vand.u32 4294901760, %v940_v38 }
  0xfe   : > { %v801_v49 = vpop.f32.mrf.mxu0  ;;  %v1308_v29 = vpop.f32.mrf.mxu2  ;;  %9148 = vst [vmem:[#allocation33_spill] sm:$0xff] %v7095_v60 }
  0xff   : > { %v1121_v20 = vadd.f32 %v1120_v9, %v801_v49  ;;  %v1124_v23 = vpop.f32.mrf.mxu1  ;;  %v942_v45 = vsub.f32 %v940_v38, %v941_v44 }
 0x100   : > { %v1534_v54 = vpop.f32.mrf.mxu3 }
 0x101   : > { %v1309_v13 = vadd.f32 %v1308_v29, %v1121_v20  ;;  %928 = vmatmul.f32.gmra.mxu0 %v927_v58  ;;  %1187 = vmatmul.f32.gmra.mxu1 %v7077_v41  ;;  %v603_v58 = vmul.f32 %v6960_v19, %v6960_v19 }
 0x103   : > { %v7093_v46 = vadd.f32 %v1534_v54, %v1309_v13  ;;  %1392 = vmatmul.f32.gmra.mxu2 %v932_v43  ;;  %v948_v13 = vsub.f32 %v685_v40, %v7095_v60  ;;  %v688_v54 = vsel %vm320_vm5, %v603_v58, 0 }
 0x104   : > { %v7104_v52 = vand.u32 4294901760, %v688_v54 }
 0x105   : > { %9147 = vst [vmem:[#allocation32_spill] sm:$0xff] %v7093_v46  ;;  %1635 = vmatmul.f32.gmra.mxu3 %v933_v25  ;;  %v943_v25 = vand.u32 4294901760, %v942_v45  ;;  %v949_v32 = vand.u32 4294901760, %v948_v13 }
 0x106   : > { %v809_v9 = vpop.f32.mrf.mxu0  ;;  %v1313_v49 = vpop.f32.mrf.mxu2  ;;  %9150 = vst [vmem:[#allocation35_spill] sm:$0xff] %v7104_v52 }
 0x107   : > { %v1125_v29 = vadd.f32 %v1124_v23, %v809_v9  ;;  %v1128_v20 = vpop.f32.mrf.mxu1  ;;  %v950_v40 = vsub.f32 %v948_v13, %v949_v32 }
 0x108   : > { %v1540_v41 = vpop.f32.mrf.mxu3 }
 0x109   : > { %v1314_v14 = vadd.f32 %v1313_v49, %v1125_v29  ;;  %936 = vmatmul.f32.gmra.mxu0 %v935_v33  ;;  %1191 = vmatmul.f32.gmra.mxu1 %v7086_v30  ;;  %v604_v33 = vmul.f32 %v6969_v11, %v6969_v11 }
 0x10b   : > { %v7102_v43 = vadd.f32 %v1540_v41, %v1314_v14  ;;  %1397 = vmatmul.f32.gmra.mxu2 %v940_v38  ;;  %v956_v41 = vsub.f32 %v688_v54, %v7104_v52  ;;  %v691_v14 = vsel %vm320_vm5, %v604_v33, 0 }
 0x10c   : > { %v7113_v45 = vand.u32 4294901760, %v691_v14 }
 0x10d   : > { %9149 = vst [vmem:[#allocation34_spill] sm:$0xff] %v7102_v43  ;;  %1641 = vmatmul.f32.gmra.mxu3 %v941_v44  ;;  %v951_v44 = vand.u32 4294901760, %v950_v40  ;;  %v957_v58 = vand.u32 4294901760, %v956_v41 }
 0x10e   : > { %v817_v23 = vpop.f32.mrf.mxu0  ;;  %v1318_v9 = vpop.f32.mrf.mxu2  ;;  %9152 = vst [vmem:[#allocation37_spill] sm:$0xff] %v7113_v45 }
 0x10f   : > { %v1129_v49 = vadd.f32 %v1128_v20, %v817_v23  ;;  %v1132_v29 = vpop.f32.mrf.mxu1  ;;  %v958_v54 = vsub.f32 %v956_v41, %v957_v58 }
 0x110   : > { %v1546_v30 = vpop.f32.mrf.mxu3 }
 0x111   : > { %v1319_v46 = vadd.f32 %v1318_v9, %v1129_v49  ;;  %944 = vmatmul.f32.gmra.mxu0 %v943_v25  ;;  %1195 = vmatmul.f32.gmra.mxu1 %v7095_v60  ;;  %v605_v25 = vmul.f32 %v6978_v36, %v6978_v36 }
 0x113   : > { %v7111_v38 = vadd.f32 %v1546_v30, %v1319_v46  ;;  %1402 = vmatmul.f32.gmra.mxu2 %v948_v13  ;;  %v964_v30 = vsub.f32 %v691_v14, %v7113_v45  ;;  %v694_v46 = vsel %vm320_vm5, %v605_v25, 0 }
 0x114   : > { %v7122_v40 = vand.u32 4294901760, %v694_v46 }
 0x115   : > { %9151 = vst [vmem:[#allocation36_spill] sm:$0xff] %v7111_v38  ;;  %1647 = vmatmul.f32.gmra.mxu3 %v949_v32  ;;  %v959_v32 = vand.u32 4294901760, %v958_v54  ;;  %v965_v33 = vand.u32 4294901760, %v964_v30 }
 0x116   : > { %v825_v20 = vpop.f32.mrf.mxu0  ;;  %v1323_v23 = vpop.f32.mrf.mxu2  ;;  %9154 = vst [vmem:[#allocation39_spill] sm:$0xff] %v7122_v40 }
 0x117   : > { %v1133_v9 = vadd.f32 %v1132_v29, %v825_v20  ;;  %v1136_v49 = vpop.f32.mrf.mxu1  ;;  %v966_v14 = vsub.f32 %v964_v30, %v965_v33 }
 0x118   : > { %v1552_v60 = vpop.f32.mrf.mxu3 }
 0x119   : > { %v1324_v43 = vadd.f32 %v1323_v23, %v1133_v9  ;;  %952 = vmatmul.f32.gmra.mxu0 %v951_v44  ;;  %1199 = vmatmul.f32.gmra.mxu1 %v7104_v52  ;;  %v606_v44 = vmul.f32 %v6987_v24, %v6987_v24 }
 0x11b   : > { %v7120_v13 = vadd.f32 %v1552_v60, %v1324_v43  ;;  %1407 = vmatmul.f32.gmra.mxu2 %v956_v41  ;;  %v972_v60 = vsub.f32 %v694_v46, %v7122_v40  ;;  %v697_v43 = vsel %vm320_vm5, %v606_v44, 0 }
 0x11c   : > { %v7131_v54 = vand.u32 4294901760, %v697_v43 }
 0x11d   : > { %9153 = vst [vmem:[#allocation38_spill] sm:$0xff] %v7120_v13  ;;  %1653 = vmatmul.f32.gmra.mxu3 %v957_v58  ;;  %v967_v58 = vand.u32 4294901760, %v966_v14  ;;  %v973_v25 = vand.u32 4294901760, %v972_v60 }
 0x11e   : > { %v833_v29 = vpop.f32.mrf.mxu0  ;;  %v1328_v20 = vpop.f32.mrf.mxu2  ;;  %9156 = vst [vmem:[#allocation41_spill] sm:$0xff] %v7131_v54 }
 0x11f   : > { %v1137_v23 = vadd.f32 %v1136_v49, %v833_v29  ;;  %v1140_v9 = vpop.f32.mrf.mxu1  ;;  %v607_v49 = vmul.f32 %v6996_v4, %v6996_v4  ;;  %v974_v46 = vsub.f32 %v972_v60, %v973_v25 }
 0x120   : > { %v1558_v52 = vpop.f32.mrf.mxu3 }
 0x121   : > { %v1329_v38 = vadd.f32 %v1328_v20, %v1137_v23  ;;  %960 = vmatmul.f32.gmra.mxu0 %v959_v32  ;;  %1203 = vmatmul.f32.gmra.mxu1 %v7113_v45  ;;  %v975_v44 = vand.u32 4294901760, %v974_v46 }
 0x123   : > { %v7129_v41 = vadd.f32 %v1558_v52, %v1329_v38  ;;  %1412 = vmatmul.f32.gmra.mxu2 %v964_v30  ;;  %v980_v52 = vsub.f32 %v697_v43, %v7131_v54  ;;  %v700_v38 = vsel %vm320_vm5, %v607_v49, 0  ;;  %v489_v43 = vmul.f32 %v6792_v56, %v6942_v62 }
 0x124   : > { %v490_v49 = vmul.f32 %v6809_v6, %v6951_v10 }
 0x125   : > { %9155 = vst [vmem:[#allocation40_spill] sm:$0xff] %v7129_v41  ;;  %1659 = vmatmul.f32.gmra.mxu3 %v965_v33  ;;  %v7140_v33 = vand.u32 4294901760, %v700_v38  ;;  %v981_v14 = vand.u32 4294901760, %v980_v52 }
 0x126   : > { %v841_v29 = vpop.f32.mrf.mxu0  ;;  %v1333_v32 = vpop.f32.mrf.mxu2  ;;  %v498_v62 = vsel %vm320_vm5, %v490_v49, 0.0 }
 0x127   : > { %v1141_v20 = vadd.f32 %v1140_v9, %v841_v29  ;;  %v1144_v23 = vpop.f32.mrf.mxu1 }
 0x128   : > { %v1564_v45 = vpop.f32.mrf.mxu3 }
 0x129   : > { %v1334_v13 = vadd.f32 %v1333_v32, %v1141_v20  ;;  %968 = vmatmul.f32.gmra.mxu0 %v967_v58  ;;  %1207 = vmatmul.f32.gmra.mxu1 %v7122_v40  ;;  %v608_v58 = vmul.f32 %v7005_v8, %v7005_v8 }
 0x12b   : > { %v7138_v30 = vadd.f32 %v1564_v45, %v1334_v13  ;;  %1417 = vmatmul.f32.gmra.mxu2 %v972_v60  ;;  %v988_v45 = vsub.f32 %v700_v38, %v7140_v33  ;;  %v982_v60 = vsub.f32 %v980_v52, %v981_v14  ;;  %v703_v46 = vsel %vm320_vm5, %v608_v58, 0 }
 0x12d   : > { %9157 = vst [vmem:[#allocation42_spill] sm:$0xff] %v7138_v30  ;;  %1665 = vmatmul.f32.gmra.mxu3 %v973_v25  ;;  %v497_v25 = vsel %vm320_vm5, %v489_v43, 0.0  ;;  %v983_v38 = vand.u32 4294901760, %v982_v60 }
 0x12e   : > { %v849_v9 = vpop.f32.mrf.mxu0  ;;  %v1338_v29 = vpop.f32.mrf.mxu2  ;;  %v499_v56 = vadd.f32 %v498_v62, %v497_v25 }
 0x12f   : > { %v1145_v32 = vadd.f32 %v1144_v23, %v849_v9  ;;  %v1148_v20 = vpop.f32.mrf.mxu1  ;;  %v989_v9 = vand.u32 4294901760, %v988_v45 }
 0x130   : > { %v1570_v40 = vpop.f32.mrf.mxu3 }
 0x131   : > { %v1339_v13 = vadd.f32 %v1338_v29, %v1145_v32  ;;  %976 = vmatmul.f32.gmra.mxu0 %v975_v44  ;;  %1211 = vmatmul.f32.gmra.mxu1 %v7131_v54  ;;  %v7155_v44 = vand.u32 4294901760, %v703_v46  ;;  %v990_v53 = vsub.f32 %v988_v45, %v989_v9 }
 0x133   : > { %v7152_v23 = vadd.f32 %v1570_v40, %v1339_v13  ;;  %1422 = vmatmul.f32.gmra.mxu2 %v980_v52  ;;  %v996_v40 = vsub.f32 %v703_v46, %v7155_v44  ;;  %v491_v52 = vmul.f32 %v6831_v5, %v6960_v19  ;;  %v991_v60 = vand.u32 4294901760, %v990_v53 }
 0x135   : > { %1671 = vmatmul.f32.gmra.mxu3 %v981_v14  ;;  %v706_v14 = vsel %vm320_vm5, %v489_v43, 0  ;;  %v500_v13 = vsel %vm320_vm5, %v491_v52, 0.0 }
 0x136   : > { %v857_v29 = vpop.f32.mrf.mxu0  ;;  %v1343_v32 = vpop.f32.mrf.mxu2  ;;  %v7167_v25 = vand.u32 4294901760, %v706_v14 }
 0x137   : > { %v1149_v54 = vadd.f32 %v1148_v20, %v857_v29  ;;  %v1152_v30 = vpop.f32.mrf.mxu1  ;;  %v7165_v20 = vadd.f32 %v500_v13, %v499_v56  ;;  %v709_v56 = vsel %vm320_vm5, %v490_v49, 0 }
 0x138   : > { %v1576_v41 = vpop.f32.mrf.mxu3 }
 0x139   : > { %v1344_v10 = vadd.f32 %v1343_v32, %v1149_v54  ;;  %984 = vmatmul.f32.gmra.mxu0 %v983_v38  ;;  %1215 = vmatmul.f32.gmra.mxu1 %v7140_v33  ;;  %9158 = vst [vmem:[#allocation43_spill] sm:$0xff] %v7165_v20  ;;  %v997_v54 = vand.u32 4294901760, %v996_v40 }
 0x13b   : > { %v7162_v58 = vadd.f32 %v1576_v41, %v1344_v10  ;;  %1427 = vmatmul.f32.gmra.mxu2 %v988_v45  ;;  %v998_v43 = vsub.f32 %v996_v40, %v997_v54  ;;  %v1004_v41 = vsub.f32 %v706_v14, %v7167_v25  ;;  %v7174_v10 = vand.u32 4294901760, %v709_v56 }
 0x13d   : > { %1677 = vmatmul.f32.gmra.mxu3 %v989_v9  ;;  %v999_v53 = vand.u32 4294901760, %v998_v43  ;;  %v1005_v9 = vand.u32 4294901760, %v1004_v41  ;;  %v1012_v49 = vsub.f32 %v709_v56, %v7174_v10  ;;  %v7189_v43 = vmul.f32 %v6852_v22, %v6969_v11 }
 0x13e   : > { %v865_v62 = vpop.f32.mrf.mxu0  ;;  %v1348_v38 = vpop.f32.mrf.mxu2  ;;  %v7203_v11 = vmul.f32 %v6874_v55, %v6978_v36  ;;  %v7217_v36 = vmul.f32 %v6893_v1, %v6987_v24  ;;  %v7231_v24 = vmul.f32 %v6918_v51, %v6996_v4  ;;  %v7245_v4 = vmul.f32 %v6927_v35, %v7005_v8 }
 0x13f   : > { %v1153_v46 = vadd.f32 %v1152_v30, %v865_v62  ;;  %v1156_v29 = vpop.f32.mrf.mxu1  ;;  %v1006_v20 = vsub.f32 %v1004_v41, %v1005_v9  ;;  %9159 = vst [vmem:[#allocation44_spill] sm:$0xff] %v7189_v43 }
 0x140   : > { %v1582_v32 = vpop.f32.mrf.mxu3  ;;  %9160 = vst [vmem:[#allocation45_spill] sm:$0xff] %v7203_v11 }
 0x141   : > { %v1349_v19 = vadd.f32 %v1348_v38, %v1153_v46  ;;  %992 = vmatmul.f32.gmra.mxu0 %v991_v60  ;;  %1219 = vmatmul.f32.gmra.mxu1 %v7155_v44  ;;  %9161 = vst [vmem:[#allocation46_spill] sm:$0xff] %v7217_v36 }
 0x142   : > { %9162 = vst [vmem:[#allocation47_spill] sm:$0xff] %v7231_v24 }
 0x143   : > { %v7172_v45 = vadd.f32 %v1582_v32, %v1349_v19  ;;  %1432 = vmatmul.f32.gmra.mxu2 %v996_v40  ;;  %v712_v40 = vsel %vm320_vm5, %v491_v52, 0  ;;  %v1013_v32 = vand.u32 4294901760, %v1012_v49  ;;  %9165 = vst [vmem:[#allocation50_spill] sm:$0xff] %v7245_v4 }
 0x144   : > { %v7183_v19 = vand.u32 4294901760, %v712_v40 }
 0x145   : > { %1683 = vmatmul.f32.gmra.mxu3 %v997_v54  ;;  %v1007_v54 = vand.u32 4294901760, %v1006_v20  ;;  %v1014_v56 = vsub.f32 %v1012_v49, %v1013_v32  ;;  %v715_v20 = vsel %vm320_vm5, %v7189_v43, 0 }
 0x146   : > { %v873_v30 = vpop.f32.mrf.mxu0  ;;  %v1353_v13 = vpop.f32.mrf.mxu2  ;;  %v1020_v52 = vsub.f32 %v712_v40, %v7183_v19 }
 0x147   : > { %v1157_v62 = vadd.f32 %v1156_v29, %v873_v30  ;;  %v7176_v38 = vpop.f32.mrf.mxu1  ;;  %v7197_v30 = vand.u32 4294901760, %v715_v20 }
 0x148   : > { %v1588_v60 = vpop.f32.mrf.mxu3 }
 0x149   : > { %v1354_v46 = vadd.f32 %v1353_v13, %v1157_v62  ;;  %1000 = vmatmul.f32.gmra.mxu0 %v999_v53  ;;  %1223 = vmatmul.f32.gmra.mxu1 %v7167_v25 }
 0x14b   : > { %v7181_v14 = vadd.f32 %v1588_v60, %v1354_v46  ;;  %1437 = vmatmul.f32.gmra.mxu2 %v1004_v41  ;;  %v1015_v41 = vand.u32 4294901760, %v1014_v56  ;;  %v1028_v46 = vsub.f32 %v715_v20, %v7197_v30 }
 0x14d   : > { %1689 = vmatmul.f32.gmra.mxu3 %v1005_v9  ;;  %v1021_v9 = vand.u32 4294901760, %v1020_v52 }
 0x14e   : > { %v7185_v29 = vpop.f32.mrf.mxu0 }
 0x14f   : > { %v7191_v53 = vpop.f32.mrf.mxu1  ;;  %v1022_v60 = vsub.f32 %v1020_v52, %v1021_v9 }
 0x151   : > { %1008 = vmatmul.f32.gmra.mxu0 %v1007_v54  ;;  %1227 = vmatmul.f32.gmra.mxu1 %v7174_v10  ;;  %v1023_v40 = vand.u32 4294901760, %v1022_v60  ;;  %v1029_v54 = vand.u32 4294901760, %v1028_v46 }
 0x153   : > { %1442 = vmatmul.f32.gmra.mxu2 %v1012_v49  ;;  %v718_v49 = vsel %vm320_vm5, %v7203_v11, 0  ;;  %v1030_v55 = vsub.f32 %v1028_v46, %v1029_v54 }
 0x155   : > { %1695 = vmatmul.f32.gmra.mxu3 %v1013_v32  ;;  %v7211_v32 = vand.u32 4294901760, %v718_v49 }
 0x156   : > { %v7199_v13 = vpop.f32.mrf.mxu0 }
 0x157   : > { %v7205_v62 = vpop.f32.mrf.mxu1  ;;  %v1036_v20 = vsub.f32 %v718_v49, %v7211_v32 }
 0x159   : > { %1016 = vmatmul.f32.gmra.mxu0 %v1015_v41  ;;  %1231 = vmatmul.f32.gmra.mxu1 %v7183_v19  ;;  %v1037_v60 = vand.u32 4294901760, %v1036_v20 }
 0x15b   : > { %1447 = vmatmul.f32.gmra.mxu2 %v1020_v52  ;;  %v721_v52 = vsel %vm320_vm5, %v7217_v36, 0  ;;  %v1038_v1 = vsub.f32 %v1036_v20, %v1037_v60 }
 0x15c   : > { %v7225_v11 = vand.u32 4294901760, %v721_v52 }
 0x15d   : > { %1701 = vmatmul.f32.gmra.mxu3 %v1021_v9  ;;  %v1031_v9 = vand.u32 4294901760, %v1030_v55  ;;  %v724_v55 = vsel %vm320_vm5, %v7231_v24, 0 }
 0x15e   : > { %v7213_v56 = vpop.f32.mrf.mxu0  ;;  %v1044_v49 = vsub.f32 %v721_v52, %v7225_v11  ;;  %v7239_v36 = vand.u32 4294901760, %v724_v55 }
 0x15f   : > { %v7219_v41 = vpop.f32.mrf.mxu1 }
 0x160   : > { %v1052_v52 = vsub.f32 %v724_v55, %v7239_v36 }
 0x161   : > { %1024 = vmatmul.f32.gmra.mxu0 %v1023_v40  ;;  %1235 = vmatmul.f32.gmra.mxu1 %v7197_v30 }
 0x163   : > { %1452 = vmatmul.f32.gmra.mxu2 %v1028_v46  ;;  %v1039_v46 = vand.u32 4294901760, %v1038_v1  ;;  %v727_v1 = vsel %vm320_vm5, %v7245_v4, 0 }
 0x164   : > { %v7253_v24 = vand.u32 4294901760, %v727_v1 }
 0x165   : > { %1707 = vmatmul.f32.gmra.mxu3 %v1029_v54  ;;  %v1045_v54 = vand.u32 4294901760, %v1044_v49 }
 0x166   : > { %v7227_v22 = vpop.f32.mrf.mxu0  ;;  %v1060_v35 = vsub.f32 %v727_v1, %v7253_v24 }
 0x167   : > { %v7233_v40 = vpop.f32.mrf.mxu1  ;;  %v1046_v51 = vsub.f32 %v1044_v49, %v1045_v54 }
 0x168   : > { %9163 = vst [vmem:[#allocation48_spill] sm:$0xff] %v7233_v40  ;;  %v1061_v4 = vand.u32 4294901760, %v1060_v35 }
 0x169   : > { %1032 = vmatmul.f32.gmra.mxu0 %v1031_v9  ;;  %1239 = vmatmul.f32.gmra.mxu1 %v7211_v32 }
 0x16b   : > { %1457 = vmatmul.f32.gmra.mxu2 %v1036_v20  ;;  %v1047_v20 = vand.u32 4294901760, %v1046_v51 }
 0x16d   : > { %1713 = vmatmul.f32.gmra.mxu3 %v1037_v60  ;;  %v1053_v60 = vand.u32 4294901760, %v1052_v52 }
 0x16e   : > { %v7241_v5 = vpop.f32.mrf.mxu0 }
 0x16f   : > { %9164 = vst [vmem:[#allocation49_spill] sm:$0xff] %v7241_v5  ;;  %v7247_v9 = vpop.f32.mrf.mxu1 }
 0x170   : > { %9166 = vst [vmem:[#allocation51_spill] sm:$0xff] %v7247_v9 }
 0x171   : > { %1040 = vmatmul.f32.gmra.mxu0 %v1039_v46  ;;  %1243 = vmatmul.f32.gmra.mxu1 %v7225_v11  ;;  %v1054_v46 = vsub.f32 %v1052_v52, %v1053_v60 }
 0x173   : > { %1462 = vmatmul.f32.gmra.mxu2 %v1044_v49  ;;  %v1055_v55 = vand.u32 4294901760, %v1054_v46 }
 0x175   : > { %1719 = vmatmul.f32.gmra.mxu3 %v1045_v54  ;;  %v1062_v54 = vsub.f32 %v1060_v35, %v1061_v4 }
 0x176   : > { %v7255_v43 = vpop.f32.mrf.mxu0 }
 0x177   : > { %9167 = vst [vmem:[#allocation52_spill] sm:$0xff] %v7255_v43  ;;  %v7257_v8 = vpop.f32.mrf.mxu1 }
 0x178   : > { %9168 = vst [vmem:[#allocation53_spill] sm:$0xff] %v7257_v8 }
 0x179   : > { %1048 = vmatmul.f32.gmra.mxu0 %v1047_v20  ;;  %1247 = vmatmul.f32.gmra.mxu1 %v7239_v36  ;;  %v1063_v20 = vand.u32 4294901760, %v1062_v54 }
 0x17b   : > { %1467 = vmatmul.f32.gmra.mxu2 %v1052_v52 }
 0x17d   : > { %1725 = vmatmul.f32.gmra.mxu3 %v1053_v60 }
 0x17e   : > { %v7261_v49 = vpop.f32.mrf.mxu0 }
 0x17f   : > { %9169 = vst [vmem:[#allocation54_spill] sm:$0xff] %v7261_v49  ;;  %v7263_v51 = vpop.f32.mrf.mxu1 }
 0x180   : > { %9170 = vst [vmem:[#allocation55_spill] sm:$0xff] %v7263_v51 }
 0x181   : > { %1056 = vmatmul.f32.gmra.mxu0 %v1055_v55  ;;  %1251 = vmatmul.f32.gmra.mxu1 %v7253_v24 }
 0x183   : > { %1472 = vmatmul.f32.gmra.mxu2 %v1060_v35 }
 0x185   : > { %1731 = vmatmul.f32.gmra.mxu3 %v1061_v4 }
 0x186   : > { %v7266_v8 = vpop.f32.mrf.mxu0 }
 0x187   : > { %9171 = vst [vmem:[#allocation56_spill] sm:$0xff] %v7266_v8  ;;  %v7268_v6 = vpop.f32.mrf.mxu1 }
 0x189   : > { %1064 = vmatmul.f32.gmra.mxu0 %v1063_v20  ;;  %1937 = vmatmul.f32.vlgmr.msrb.gmra.mxu1 %v6814_v61 }
 0x18e   : > { %v7271_v52 = vpop.f32.mrf.mxu0 }
 0x18f   : > { %v7273_v1 = vpop.f32.mrf.mxu1 }
 0x190   : > { %9172 = vst [vmem:[#allocation57_spill] sm:$0xff] %v7273_v1  ;;  %v9245_v1 = vld [vmem:[#allocation42_spill] sm:$0xff] }
 0x191   : > { %1758 = vmatmul.f32.vlgmr.msrb.gmra.mxu0 %v6814_v61  ;;  %1941 = vmatmul.f32.gmra.mxu1 %v6820_v0 }
 0x196   : > { %v7277_v60 = vpop.f32.mrf.mxu0 }
 0x197   : > { %9173 = vst [vmem:[#allocation58_spill] sm:$0xff] %v7277_v60  ;;  %v7279_v35 = vpop.f32.mrf.mxu1 }
 0x198   : > { %9174 = vst [vmem:[#allocation59_spill] sm:$0xff] %v7279_v35 }
 0x199   : > { %1762 = vmatmul.f32.gmra.mxu0 %v6820_v0  ;;  %1945 = vmatmul.f32.gmra.mxu1 %v6846_v17 }
 0x19e   : > { %v7283_v4 = vpop.f32.mrf.mxu0 }
 0x19f   : > { %9175 = vst [vmem:[#allocation60_spill] sm:$0xff] %v7283_v4  ;;  %v7285_v46 = vpop.f32.mrf.mxu1 }
 0x1a0   : > { %9176 = vst [vmem:[#allocation61_spill] sm:$0xff] %v7285_v46 }
 0x1a1   : > { %1766 = vmatmul.f32.gmra.mxu0 %v6846_v17  ;;  %1949 = vmatmul.f32.gmra.mxu1 %v6868_v50 }
 0x1a6   : > { %v7289_v55 = vpop.f32.mrf.mxu0 }
 0x1a7   : > { %9177 = vst [vmem:[#allocation62_spill] sm:$0xff] %v7289_v55  ;;  %v7291_v61 = vpop.f32.mrf.mxu1 }
 0x1a8   : > { %9178 = vst [vmem:[#allocation63_spill] sm:$0xff] %v7291_v61 }
 0x1a9   : > { %1770 = vmatmul.f32.gmra.mxu0 %v6868_v50  ;;  %1953 = vmatmul.f32.gmra.mxu1 %v6890_v7 }
 0x1ae   : > { %v7295_v54 = vpop.f32.mrf.mxu0 }
 0x1af   : > { %9179 = vst [vmem:[#allocation64_spill] sm:$0xff] %v7295_v54  ;;  %v7297_v0 = vpop.f32.mrf.mxu1 }
 0x1b0   : > { %9180 = vst [vmem:[#allocation65_spill] sm:$0xff] %v7297_v0 }
 0x1b1   : > { %1774 = vmatmul.f32.gmra.mxu0 %v6890_v7  ;;  %1957 = vmatmul.f32.gmra.mxu1 %v6903_v16 }
 0x1b6   : > { %v7301_v20 = vpop.f32.mrf.mxu0 }
 0x1b7   : > { %9181 = vst [vmem:[#allocation66_spill] sm:$0xff] %v7301_v20  ;;  %v7303_v17 = vpop.f32.mrf.mxu1 }
 0x1b8   : > { %9182 = vst [vmem:[#allocation67_spill] sm:$0xff] %v7303_v17  ;;  %v7319_v17 = vpop.f32.mrf.mxu2 }
 0x1b9   : > { %1778 = vmatmul.f32.gmra.mxu0 %v6903_v16  ;;  %1961 = vmatmul.f32.gmra.mxu1 %v6924_v42  ;;  %v7321_v16 = vpop.f32.mrf.mxu3 }
 0x1be   : > { %v7307_v51 = vpop.f32.mrf.mxu0 }
 0x1bf   : > { %9183 = vst [vmem:[#allocation68_spill] sm:$0xff] %v7307_v51  ;;  %v7309_v50 = vpop.f32.mrf.mxu1 }
 0x1c0   : > { %9184 = vst [vmem:[#allocation69_spill] sm:$0xff] %v7309_v50 }
 0x1c1   : > { %1782 = vmatmul.f32.gmra.mxu0 %v6924_v42  ;;  %1965 = vmatmul.f32.gmra.mxu1 %v6939_v31  ;;  %v7329_v42 = vpop.f32.mrf.mxu2 }
 0x1c6   : > { %v7313_v8 = vpop.f32.mrf.mxu0 }
 0x1c7   : > { %9185 = vst [vmem:[#allocation70_spill] sm:$0xff] %v7313_v8  ;;  %v7315_v7 = vpop.f32.mrf.mxu1 }
 0x1c8   : > { %9186 = vst [vmem:[#allocation71_spill] sm:$0xff] %v7315_v7 }
 0x1c9   : > { %1786 = vmatmul.f32.gmra.mxu0 %v6939_v31  ;;  %1969 = vmatmul.f32.gmra.mxu1 %v6948_v39  ;;  %v7335_v31 = vpop.f32.mrf.mxu3  ;;  %v7341_v20 = vpop.f32.mrf.mxu2 }
 0x1ce   : > { %v7323_v49 = vpop.f32.mrf.mxu0 }
 0x1cf   : > { %9187 = vst [vmem:[#allocation72_spill] sm:$0xff] %v7323_v49  ;;  %v7325_v51 = vpop.f32.mrf.mxu1 }
 0x1d0   : > { %9188 = vst [vmem:[#allocation73_spill] sm:$0xff] %v7325_v51 }
 0x1d1   : > { %1790 = vmatmul.f32.gmra.mxu0 %v6948_v39  ;;  %1973 = vmatmul.f32.gmra.mxu1 %v6957_v18  ;;  %v7347_v39 = vpop.f32.mrf.mxu3  ;;  %v7353_v5 = vpop.f32.mrf.mxu2 }
 0x1d6   : > { %v7331_v50 = vpop.f32.mrf.mxu0 }
 0x1d7   : > { %9189 = vst [vmem:[#allocation74_spill] sm:$0xff] %v7331_v50  ;;  %v7333_v8 = vpop.f32.mrf.mxu1 }
 0x1d8   : > { %9190 = vst [vmem:[#allocation75_spill] sm:$0xff] %v7333_v8 }
 0x1d9   : > { %1794 = vmatmul.f32.gmra.mxu0 %v6957_v18  ;;  %1977 = vmatmul.f32.gmra.mxu1 %v6966_v26  ;;  %v7357_v18 = vpop.f32.mrf.mxu3 }
 0x1de   : > { %v7339_v0 = vpop.f32.mrf.mxu0 }
 0x1df   : > { %9191 = vst [vmem:[#allocation76_spill] sm:$0xff] %v7339_v0  ;;  %v7343_v61 = vpop.f32.mrf.mxu1 }
 0x1e0   : > { %9192 = vst [vmem:[#allocation77_spill] sm:$0xff] %v7343_v61 }
 0x1e1   : > { %1798 = vmatmul.f32.gmra.mxu0 %v6966_v26  ;;  %1981 = vmatmul.f32.gmra.mxu1 %v6975_v34  ;;  %v7365_v26 = vpop.f32.mrf.mxu2  ;;  %v7367_v61 = vpop.f32.mrf.mxu3 }
 0x1e2   : > { %9197 = vst [vmem:[#allocation82_spill] sm:$0xff] %v7365_v26 }
 0x1e3   : > { %9198 = vst [vmem:[#allocation83_spill] sm:$0xff] %v7367_v61 }
 0x1e6   : > { %v7349_v54 = vpop.f32.mrf.mxu0 }
 0x1e7   : > { %9193 = vst [vmem:[#allocation78_spill] sm:$0xff] %v7349_v54  ;;  %v7351_v40 = vpop.f32.mrf.mxu1 }
 0x1e8   : > { %9194 = vst [vmem:[#allocation79_spill] sm:$0xff] %v7351_v40 }
 0x1e9   : > { %1802 = vmatmul.f32.gmra.mxu0 %v6975_v34  ;;  %1985 = vmatmul.f32.gmra.mxu1 %v6984_v57  ;;  %v7375_v34 = vpop.f32.mrf.mxu2 }
 0x1ea   : > { %9201 = vst [vmem:[#allocation86_spill] sm:$0xff] %v7375_v34 }
 0x1ee   : > { %v7359_v9 = vpop.f32.mrf.mxu0 }
 0x1ef   : > { %9195 = vst [vmem:[#allocation80_spill] sm:$0xff] %v7359_v9  ;;  %v7361_v43 = vpop.f32.mrf.mxu1 }
 0x1f0   : > { %9196 = vst [vmem:[#allocation81_spill] sm:$0xff] %v7361_v43 }
 0x1f1   : > { %1806 = vmatmul.f32.gmra.mxu0 %v6984_v57  ;;  %1989 = vmatmul.f32.gmra.mxu1 %v6993_v3  ;;  %v7381_v57 = vpop.f32.mrf.mxu3 }
 0x1f2   : > { %9204 = vst [vmem:[#allocation89_spill] sm:$0xff] %v7381_v57 }
 0x1f6   : > { %v7369_v40 = vpop.f32.mrf.mxu0 }
 0x1f7   : > { %9199 = vst [vmem:[#allocation84_spill] sm:$0xff] %v7369_v40  ;;  %v7371_v54 = vpop.f32.mrf.mxu1  ;;  %v7387_v40 = vpop.f32.mrf.mxu2 }
 0x1f8   : > { %9200 = vst [vmem:[#allocation85_spill] sm:$0xff] %v7371_v54 }
 0x1f9   : > { %1810 = vmatmul.f32.gmra.mxu0 %v6993_v3  ;;  %1993 = vmatmul.f32.gmra.mxu1 %v7002_v15  ;;  %9206 = vst [vmem:[#allocation91_spill] sm:$0xff] %v7387_v40  ;;  %v589_v3 = vld [vmem:[%s9207_s0] sm:$0xff] }
 0x1fe   : > { %v7377_v9 = vpop.f32.mrf.mxu0 }
 0x1ff   : > { %9202 = vst [vmem:[#allocation87_spill] sm:$0xff] %v7377_v9  ;;  %v7379_v43 = vpop.f32.mrf.mxu1  ;;  %v7394_v9 = vpop.f32.mrf.mxu3 }
 0x200   : > { %9203 = vst [vmem:[#allocation88_spill] sm:$0xff] %v7379_v43  ;;  %v2098_v43 = vsel %vm320_vm5, %v589_v3, 0  ;;  %v7400_v40 = vpop.f32.mrf.mxu2  ;;  %v590_v3 = vld [vmem:[%s9207_s0 + $0x8] sm:$0xff] }
 0x201   : > { %1814 = vmatmul.f32.gmra.mxu0 %v7002_v15  ;;  %1997 = vmatmul.f32.gmra.mxu1 %v7011_v27  ;;  %9208 = vst [vmem:[#allocation92_spill] sm:$0xff] %v7394_v9  ;;  %v7397_v15 = vand.u32 4294901760, %v2098_v43  ;;  %v2101_v8 = vsel %vm320_vm5, %v590_v3, 0 }
 0x202   : > { %9209 = vst [vmem:[#allocation93_spill] sm:$0xff] %v7400_v40  ;;  %v7417_v40 = vand.u32 4294901760, %v2101_v8 }
 0x204   : > { %v7426_v50 = vsub.f32 %v2101_v8, %v7417_v40 }
 0x206   : > { %v7385_v61 = vpop.f32.mrf.mxu0  ;;  %v7434_v46 = vand.u32 4294901760, %v7426_v50 }
 0x207   : > { %9205 = vst [vmem:[#allocation90_spill] sm:$0xff] %v7385_v61  ;;  %v1938_v54 = vpop.f32.mrf.mxu1  ;;  %v7410_v9 = vpop.f32.mrf.mxu3 }
 0x208   : > { %9210 = vst [vmem:[#allocation94_spill] sm:$0xff] %v7410_v9  ;;  %v7423_v3 = vpop.f32.mrf.mxu2 }
 0x209   : > { %1818 = vmatmul.f32.gmra.mxu0 %v7011_v27  ;;  %2001 = vmatmul.f32.gmra.mxu1 %v7018_v48  ;;  %v7405_v27 = vsub.f32 %v2098_v43, %v7397_v15 }
 0x20e   : > { %v1759_v57 = vpop.f32.mrf.mxu0 }
 0x20f   : > { %v1760_v61 = vadd.f32 %v1759_v57, %v7039_v37  ;;  %v1942_v26 = vpop.f32.mrf.mxu1  ;;  %v7414_v57 = vand.u32 4294901760, %v7405_v27 }
 0x211   : > { %v1939_v34 = vadd.f32 %v1938_v54, %v1760_v61  ;;  %1822 = vmatmul.f32.gmra.mxu0 %v7018_v48  ;;  %2005 = vmatmul.f32.gmra.mxu1 %v7025_v63  ;;  %v2124_v9 = vsub.f32 %v7405_v27, %v7414_v57 }
 0x213   : > { %v2119_v37 = vand.u32 4294901760, %v1939_v34 }
 0x215   : > { %v2159_v43 = vsub.f32 %v1939_v34, %v2119_v37  ;;  %v7430_v34 = vpop.f32.mrf.mxu3 }
 0x216   : > { %v1763_v61 = vpop.f32.mrf.mxu0 }
 0x217   : > { %v1764_v48 = vadd.f32 %v1763_v61, %v7048_v28  ;;  %v1946_v54 = vpop.f32.mrf.mxu1  ;;  %v7428_v28 = vand.u32 4294901760, %v2124_v9  ;;  %v2160_v61 = vand.u32 4294901760, %v2159_v43 }
 0x219   : > { %v1943_v0 = vadd.f32 %v1942_v26, %v1764_v48  ;;  %1826 = vmatmul.f32.gmra.mxu0 %v7025_v63  ;;  %2009 = vmatmul.f32.gmra.mxu1 %v7032_v21  ;;  %v2161_v8 = vsub.f32 %v2159_v43, %v2160_v61 }
 0x21b   : > { %v2117_v51 = vand.u32 4294901760, %v1943_v0 }
 0x21d   : > { %v2153_v7 = vsub.f32 %v1943_v0, %v2117_v51  ;;  %2118 = vmatpush.msrb.mxu2 %v2117_v51  ;;  %v2132_v0 = vsub.f32 %v7426_v50, %v7434_v46 }
 0x21e   : > { %v1767_v26 = vpop.f32.mrf.mxu0 }
 0x21f   : > { %v1768_v63 = vadd.f32 %v1767_v26, %v7057_v12  ;;  %2120 = vmatpush.msrb.mxu2 %v2119_v37  ;;  %v2154_v48 = vand.u32 4294901760, %v2153_v7  ;;  %v1950_v49 = vpop.f32.mrf.mxu1  ;;  %v7443_v26 = vpop.f32.mrf.mxu2 }
 0x220   : > { %2126 = vmatmul.f32.vlgmr.msrb.gmra.mxu2 %v7428_v28  ;;  %9212 = vst [vmem:[#allocation96_spill] sm:$0xff] %v7443_v26 }
 0x221   : > { %2189 = vmatpush.msra.mxu2 %v2153_v7  ;;  %v7436_v55 = vadd.f32 %v1946_v54, %v1768_v63  ;;  %1830 = vmatmul.f32.gmra.mxu0 %v7032_v21  ;;  %v2155_v9 = vsub.f32 %v2153_v7, %v2154_v48  ;;  %v2162_v54 = vand.u32 4294901760, %v2161_v8  ;;  %v7446_v7 = vand.u32 4294901760, %v2132_v0 }
 0x222   : > { %2013 = vmatmul.f32.gmra.mxu1 %v7041_v59 }
 0x223   : > { %9211 = vst [vmem:[#allocation95_spill] sm:$0xff] %v7436_v55  ;;  %2192 = vmatpush.msra.mxu2 %v2159_v43  ;;  %v2156_v12 = vand.u32 4294901760, %v2155_v9  ;;  %v7448_v43 = vpop.f32.mrf.mxu3  ;;  %v9216_v9 = vld [vmem:[#allocation28_spill] sm:$0xff] }
 0x224   : > { %9213 = vst [vmem:[#allocation97_spill] sm:$0xff] %v7448_v43 }
 0x225   : > { %2252 = vmatpush.msrb.mxu2 %v2154_v48  ;;  %2157 = vmatpush.msrb.mxu3 %v2156_v12 }
 0x226   : > { %v1771_v63 = vpop.f32.mrf.mxu0 }
 0x227   : > { %2256 = vmatpush.msrb.mxu2 %v2160_v61  ;;  %v1772_v21 = vadd.f32 %v1771_v63, %v7066_v2  ;;  %2163 = vmatpush.msrb.mxu3 %v2162_v54  ;;  %v1954_v55 = vpop.f32.mrf.mxu1  ;;  %v7456_v61 = vpop.f32.mrf.mxu2 }
 0x228   : > { %2165 = vmatmul.f32.vlgmr.msrb.gmra.mxu3 %v7397_v15  ;;  %2134 = vmatmul.f32.gmra.mxu2 %v7446_v7  ;;  %9215 = vst [vmem:[#allocation99_spill] sm:$0xff] %v7456_v61 }
 0x229   : > { %2219 = vmatpush.msra.mxu3 %v2117_v51  ;;  %v7450_v48 = vadd.f32 %v1950_v49, %v1772_v21  ;;  %1834 = vmatmul.f32.gmra.mxu0 %v7041_v59  ;;  %v9219_v49 = vld [vmem:[#allocation26_spill] sm:$0xff] }
 0x22a   : > { %2017 = vmatmul.f32.gmra.mxu1 %v7050_v47 }
 0x22b   : > { %9214 = vst [vmem:[#allocation98_spill] sm:$0xff] %v7450_v48  ;;  %2221 = vmatpush.msra.mxu3 %v2119_v37  ;;  %v7463_v59 = vpop.f32.mrf.mxu3 }
 0x22c   : > { %9218 = vst [vmem:[#allocation100_spill] sm:$0xff] %v7463_v59 }
 0x22d   : > { %2281 = vmatpush.msrb.mxu3 %v2117_v51 }
 0x22e   : > { %v1775_v2 = vpop.f32.mrf.mxu0 }
 0x22f   : > { %2283 = vmatpush.msrb.mxu3 %v2119_v37  ;;  %v1776_v8 = vadd.f32 %v1775_v2, %v9216_v9  ;;  %v1958_v12 = vpop.f32.mrf.mxu1  ;;  %v9220_v37 = vld [vmem:[#allocation30_spill] sm:$0xff]  ;;  %v7468_v21 = vpop.f32.mrf.mxu2 }
 0x230   : > { %2169 = vmatmul.f32.gmra.mxu3 %v7417_v40  ;;  %2195 = vmatmul.f32.vlgmr.msra.gmra.mxu2 %v7405_v27  ;;  %9221 = vst [vmem:[#allocation26_spill] sm:$0xff] %v7468_v21 }
 0x231   : > { %v7459_v0 = vadd.f32 %v1954_v55, %v1776_v8  ;;  %1838 = vmatmul.f32.gmra.mxu0 %v7050_v47  ;;  %v9223_v47 = vld [vmem:[#allocation27_spill] sm:$0xff]  ;;  %v9225_v8 = vld [vmem:[#allocation32_spill] sm:$0xff] }
 0x232   : > { %2021 = vmatmul.f32.gmra.mxu1 %v9219_v49 }
 0x233   : > { %9217 = vst [vmem:[#allocation28_spill] sm:$0xff] %v7459_v0  ;;  %v7476_v55 = vpop.f32.mrf.mxu3 }
 0x234   : > { %9224 = vst [vmem:[#allocation27_spill] sm:$0xff] %v7476_v55 }
 0x236   : > { %v1779_v51 = vpop.f32.mrf.mxu0 }
 0x237   : > { %v1780_v54 = vadd.f32 %v1779_v51, %v9220_v37  ;;  %v1962_v63 = vpop.f32.mrf.mxu1 }
 0x238   : > { %2225 = vmatmul.f32.vlgmr.msra.gmra.mxu3 %v7414_v57  ;;  %2200 = vmatmul.f32.gmra.mxu2 %v7426_v50 }
 0x239   : > { %v7470_v2 = vadd.f32 %v1958_v12, %v1780_v54  ;;  %1842 = vmatmul.f32.gmra.mxu0 %v9219_v49  ;;  %v9227_v12 = vld [vmem:[#allocation29_spill] sm:$0xff]  ;;  %v7484_v49 = vpop.f32.mrf.mxu2 }
 0x23a   : > { %2025 = vmatmul.f32.gmra.mxu1 %v9223_v47  ;;  %9228 = vst [vmem:[#allocation29_spill] sm:$0xff] %v7484_v49 }
 0x23b   : > { %9222 = vst [vmem:[#allocation30_spill] sm:$0xff] %v7470_v2  ;;  %v7487_v37 = vpop.f32.mrf.mxu3  ;;  %v9230_v2 = vld [vmem:[#allocation34_spill] sm:$0xff] }
 0x23c   : > { %9229 = vst [vmem:[#allocation101_spill] sm:$0xff] %v7487_v37 }
 0x23e   : > { %v1783_v9 = vpop.f32.mrf.mxu0 }
 0x23f   : > { %v1784_v48 = vadd.f32 %v1783_v9, %v9225_v8  ;;  %v1966_v0 = vpop.f32.mrf.mxu1  ;;  %v9234_v8 = vld [vmem:[#allocation36_spill] sm:$0xff] }
 0x240   : > { %2231 = vmatmul.f32.gmra.mxu3 %v7434_v46  ;;  %2258 = vmatmul.f32.vlgmr.msrb.gmra.mxu2 %v7397_v15 }
 0x241   : > { %v7479_v51 = vadd.f32 %v1962_v63, %v1784_v48  ;;  %1846 = vmatmul.f32.gmra.mxu0 %v9223_v47  ;;  %v9232_v48 = vld [vmem:[#allocation31_spill] sm:$0xff]  ;;  %v7496_v63 = vpop.f32.mrf.mxu2 }
 0x242   : > { %2029 = vmatmul.f32.gmra.mxu1 %v9227_v12  ;;  %9233 = vst [vmem:[#allocation31_spill] sm:$0xff] %v7496_v63 }
 0x243   : > { %9226 = vst [vmem:[#allocation32_spill] sm:$0xff] %v7479_v51  ;;  %v7499_v49 = vpop.f32.mrf.mxu3 }
 0x244   : > { %9235 = vst [vmem:[#allocation36_spill] sm:$0xff] %v7499_v49 }
 0x246   : > { %v1787_v54 = vpop.f32.mrf.mxu0 }
 0x247   : > { %v1788_v55 = vadd.f32 %v1787_v54, %v9230_v2  ;;  %v1970_v21 = vpop.f32.mrf.mxu1 }
 0x248   : > { %2285 = vmatmul.f32.vlgmr.msrb.gmra.mxu3 %v7397_v15  ;;  %2262 = vmatmul.f32.gmra.mxu2 %v7417_v40 }
 0x249   : > { %v7490_v9 = vadd.f32 %v1966_v0, %v1788_v55  ;;  %1850 = vmatmul.f32.gmra.mxu0 %v9227_v12  ;;  %v9236_v0 = vld [vmem:[#allocation33_spill] sm:$0xff]  ;;  %v7504_v54 = vpop.f32.mrf.mxu2 }
 0x24a   : > { %2033 = vmatmul.f32.gmra.mxu1 %v9232_v48  ;;  %9237 = vst [vmem:[#allocation33_spill] sm:$0xff] %v7504_v54 }
 0x24b   : > { %9231 = vst [vmem:[#allocation34_spill] sm:$0xff] %v7490_v9  ;;  %v9238_v9 = vld [vmem:[#allocation38_spill] sm:$0xff] }
 0x24e   : > { %v1791_v47 = vpop.f32.mrf.mxu0 }
 0x24f   : > { %v1792_v51 = vadd.f32 %v1791_v47, %v9234_v8  ;;  %v1974_v37 = vpop.f32.mrf.mxu1  ;;  %v7508_v47 = vpop.f32.mrf.mxu3 }
 0x250   : > { %2289 = vmatmul.f32.gmra.mxu3 %v7417_v40  ;;  %9239 = vst [vmem:[#allocation38_spill] sm:$0xff] %v7508_v47 }
 0x251   : > { %v1971_v2 = vadd.f32 %v1970_v21, %v1792_v51  ;;  %1854 = vmatmul.f32.gmra.mxu0 %v9232_v48  ;;  %v9240_v21 = vld [vmem:[#allocation35_spill] sm:$0xff]  ;;  %v7511_v54 = vpop.f32.mrf.mxu2 }
 0x252   : > { %2037 = vmatmul.f32.gmra.mxu1 %v9236_v0  ;;  %9241 = vst [vmem:[#allocation35_spill] sm:$0xff] %v7511_v54 }
 0x253   : > { %v2309_v55 = vand.u32 4294901760, %v1971_v2 }
 0x255   : > { %v2349_v61 = vsub.f32 %v1971_v2, %v2309_v55 }
 0x256   : > { %v1795_v12 = vpop.f32.mrf.mxu0 }
 0x257   : > { %v1796_v59 = vadd.f32 %v1795_v12, %v9238_v9  ;;  %v1978_v63 = vpop.f32.mrf.mxu1  ;;  %v2350_v8 = vand.u32 4294901760, %v2349_v61  ;;  %v9242_v9 = vld [vmem:[#allocation40_spill] sm:$0xff]  ;;  %v7517_v12 = vpop.f32.mrf.mxu3 }
 0x258   : > { %9244 = vst [vmem:[#allocation40_spill] sm:$0xff] %v7517_v12 }
 0x259   : > { %v1975_v35 = vadd.f32 %v1974_v37, %v1796_v59  ;;  %1858 = vmatmul.f32.gmra.mxu0 %v9236_v0  ;;  %v2351_v37 = vsub.f32 %v2349_v61, %v2350_v8  ;;  %v9243_v0 = vld [vmem:[#allocation37_spill] sm:$0xff] }
 0x25a   : > { %2041 = vmatmul.f32.gmra.mxu1 %v9240_v21 }
 0x25b   : > { %v2307_v51 = vand.u32 4294901760, %v1975_v35  ;;  %v2352_v47 = vand.u32 4294901760, %v2351_v37 }
 0x25d   : > { %v2343_v48 = vsub.f32 %v1975_v35, %v2307_v51  ;;  %2308 = vmatpush.msra.mxu2 %v2307_v51 }
 0x25e   : > { %v1799_v49 = vpop.f32.mrf.mxu0 }
 0x25f   : > { %2310 = vmatpush.msra.mxu2 %v2309_v55  ;;  %v2344_v4 = vand.u32 4294901760, %v2343_v48  ;;  %v1982_v43 = vpop.f32.mrf.mxu1  ;;  %v1800_v2 = vadd.f32 %v1799_v49, %v9242_v9  ;;  %v7525_v49 = vpop.f32.mrf.mxu2 }
 0x260   : > { %2316 = vmatmul.f32.vlgmr.msra.gmra.mxu2 %v7428_v28 }
 0x261   : > { %2379 = vmatpush.msrb.mxu2 %v2343_v48  ;;  %1862 = vmatmul.f32.gmra.mxu0 %v9240_v21  ;;  %v2345_v59 = vsub.f32 %v2343_v48, %v2344_v4  ;;  %v1979_v26 = vadd.f32 %v1978_v63, %v1800_v2 }
 0x262   : > { %2045 = vmatmul.f32.gmra.mxu1 %v9243_v0 }
 0x263   : > { %2382 = vmatpush.msrb.mxu2 %v2349_v61  ;;  %v2346_v35 = vand.u32 4294901760, %v2345_v59  ;;  %v7522_v61 = vand.u32 4294901760, %v1979_v26 }
 0x265   : > { %2442 = vmatpush.msra.mxu2 %v2344_v4  ;;  %2347 = vmatpush.msra.mxu3 %v2346_v35  ;;  %v9246_v4 = vld [vmem:[#allocation39_spill] sm:$0xff]  ;;  %v7537_v63 = vsub.f32 %v1979_v26, %v7522_v61 }
 0x266   : > { %v1803_v54 = vpop.f32.mrf.mxu0 }
 0x267   : > { %2446 = vmatpush.msra.mxu2 %v2350_v8  ;;  %v1804_v21 = vadd.f32 %v1803_v54, %v9245_v1  ;;  %2353 = vmatpush.msra.mxu3 %v2352_v47  ;;  %v1986_v60 = vpop.f32.mrf.mxu1  ;;  %v9017_v26 = vand.u32 4294901760, %v7537_v63 }
 0x268   : > { %2355 = vmatmul.f32.vlgmr.msra.gmra.mxu3 %v7397_v15  ;;  %2324 = vmatmul.f32.gmra.mxu2 %v7446_v7 }
 0x269   : > { %2409 = vmatpush.msrb.mxu3 %v2307_v51  ;;  %v1983_v48 = vadd.f32 %v1982_v43, %v1804_v21  ;;  %1866 = vmatmul.f32.gmra.mxu0 %v9243_v0  ;;  %v7534_v43 = vpop.f32.mrf.mxu3 }
 0x26a   : > { %2049 = vmatmul.f32.gmra.mxu1 %v9246_v4 }
 0x26b   : > { %2411 = vmatpush.msrb.mxu3 %v2309_v55  ;;  %v7527_v8 = vand.u32 4294901760, %v1983_v48 }
 0x26d   : > { %2471 = vmatpush.msra.mxu3 %v2307_v51  ;;  %v7531_v1 = vsub.f32 %v1983_v48, %v7527_v8  ;;  %3496 = vmatpush.msra.mxu1 %v7527_v8 }
 0x26e   : > { %v1807_v54 = vpop.f32.mrf.mxu0 }
 0x26f   : > { %2473 = vmatpush.msra.mxu3 %v2309_v55  ;;  %v1808_v47 = vadd.f32 %v1807_v54, %v7152_v23  ;;  %3498 = vmatpush.msra.mxu1 %v7522_v61  ;;  %v9018_v51 = vand.u32 4294901760, %v7531_v1  ;;  %v1990_v59 = vpop.f32.mrf.mxu1  ;;  %v9247_v55 = vld [vmem:[#allocation41_spill] sm:$0xff]  ;;  %v7553_v23 = vpop.f32.mrf.mxu2 }
 0x270   : > { %2359 = vmatmul.f32.gmra.mxu3 %v7417_v40  ;;  %2385 = vmatmul.f32.vlgmr.msrb.gmra.mxu2 %v7405_v27 }
 0x271   : > { %v7542_v37 = vadd.f32 %v1986_v60, %v1808_v47  ;;  %1870 = vmatmul.f32.gmra.mxu0 %v9246_v4  ;;  %v7556_v0 = vpop.f32.mrf.mxu3 }
 0x272   : > { %3467 = vmatpush.msra.mxu0 %v9018_v51  ;;  %2053 = vmatmul.f32.gmra.mxu1 %v9247_v55 }
 0x274   : > { %3471 = vmatpush.msra.mxu0 %v9017_v26 }
 0x276   : > { %v1811_v60 = vpop.f32.mrf.mxu0 }
 0x277   : > { %v1812_v9 = vadd.f32 %v1811_v60, %v7162_v58  ;;  %v1994_v2 = vpop.f32.mrf.mxu1  ;;  %v7564_v48 = vpop.f32.mrf.mxu2 }
 0x278   : > { %2415 = vmatmul.f32.vlgmr.msrb.gmra.mxu3 %v7414_v57  ;;  %2390 = vmatmul.f32.gmra.mxu2 %v7426_v50 }
 0x279   : > { %v7558_v35 = vadd.f32 %v1990_v59, %v1812_v9  ;;  %1874 = vmatmul.f32.gmra.mxu0 %v9247_v55  ;;  %v7571_v47 = vpop.f32.mrf.mxu3  ;;  %v1161_v59 = vadd.f32 %v7176_v38, %v7185_v29 }
 0x27a   : > { %2057 = vmatmul.f32.gmra.mxu1 %v7140_v33 }
 0x27b   : > { %v1359_v9 = vadd.f32 %v7319_v17, %v1161_v59 }
 0x27d   : > { %v1595_v38 = vadd.f32 %v7321_v16, %v1359_v9 }
 0x27e   : > { %v1815_v21 = vpop.f32.mrf.mxu0 }
 0x27f   : > { %v1816_v4 = vadd.f32 %v1815_v21, %v7172_v45  ;;  %v1998_v54 = vpop.f32.mrf.mxu1 }
 0x280   : > { %2421 = vmatmul.f32.gmra.mxu3 %v7434_v46  ;;  %2448 = vmatmul.f32.vlgmr.msra.gmra.mxu2 %v7397_v15 }
 0x281   : > { %v7567_v58 = vadd.f32 %v1994_v2, %v1816_v4  ;;  %1878 = vmatmul.f32.gmra.mxu0 %v7140_v33  ;;  %v7579_v2 = vpop.f32.mrf.mxu2  ;;  %v7587_v21 = vpop.f32.mrf.mxu3 }
 0x282   : > { %2061 = vmatmul.f32.gmra.mxu1 %v7155_v44 }
 0x283   : > { %9248 = vst [vmem:[#allocation37_spill] sm:$0xff] %v7567_v58 }
 0x286   : > { %v1819_v55 = vpop.f32.mrf.mxu0 }
 0x287   : > { %v1820_v60 = vadd.f32 %v1819_v55, %v7181_v14  ;;  %v2002_v45 = vpop.f32.mrf.mxu1  ;;  %v1165_v14 = vadd.f32 %v7191_v53, %v7199_v13 }
 0x288   : > { %2475 = vmatmul.f32.vlgmr.msra.gmra.mxu3 %v7397_v15  ;;  %2452 = vmatmul.f32.gmra.mxu2 %v7417_v40 }
 0x289   : > { %v7581_v33 = vadd.f32 %v1998_v54, %v1820_v60  ;;  %1882 = vmatmul.f32.gmra.mxu0 %v7155_v44  ;;  %v1364_v54 = vadd.f32 %v7329_v42, %v1165_v14  ;;  %v7596_v44 = vpop.f32.mrf.mxu2  ;;  %v7599_v60 = vpop.f32.mrf.mxu3 }
 0x28a   : > { %2065 = vmatmul.f32.gmra.mxu1 %v7167_v25 }
 0x28b   : > { %9249 = vst [vmem:[#allocation42_spill] sm:$0xff] %v7581_v33  ;;  %v1601_v55 = vadd.f32 %v7335_v31, %v1364_v54 }
 0x28e   : > { %v1823_v29 = vpop.f32.mrf.mxu0 }
 0x28f   : > { %v1824_v17 = vadd.f32 %v1823_v29, %v1595_v38  ;;  %v2006_v4 = vpop.f32.mrf.mxu1 }
 0x290   : > { %2479 = vmatmul.f32.gmra.mxu3 %v7417_v40 }
 0x291   : > { %v2003_v59 = vadd.f32 %v2002_v45, %v1824_v17  ;;  %1886 = vmatmul.f32.gmra.mxu0 %v7167_v25  ;;  %v1169_v25 = vadd.f32 %v7205_v62, %v7213_v56  ;;  %v1173_v45 = vadd.f32 %v7219_v41, %v7227_v22  ;;  %v7607_v31 = vpop.f32.mrf.mxu2 }
 0x292   : > { %2069 = vmatmul.f32.gmra.mxu1 %v7174_v10 }
 0x293   : > { %v2505_v16 = vand.u32 4294901760, %v2003_v59  ;;  %v1369_v54 = vadd.f32 %v7341_v20, %v1169_v25  ;;  %v1374_v62 = vadd.f32 %v7353_v5, %v1173_v45 }
 0x295   : > { %v2545_v38 = vsub.f32 %v2003_v59, %v2505_v16  ;;  %v1607_v41 = vadd.f32 %v7347_v39, %v1369_v54 }
 0x296   : > { %v1827_v53 = vpop.f32.mrf.mxu0 }
 0x297   : > { %v1828_v13 = vadd.f32 %v1827_v53, %v1601_v55  ;;  %v2010_v9 = vpop.f32.mrf.mxu1  ;;  %v2546_v17 = vand.u32 4294901760, %v2545_v38  ;;  %v7610_v55 = vpop.f32.mrf.mxu3 }
 0x299   : > { %v2007_v29 = vadd.f32 %v2006_v4, %v1828_v13  ;;  %1890 = vmatmul.f32.gmra.mxu0 %v7174_v10  ;;  %v2547_v56 = vsub.f32 %v2545_v38, %v2546_v17  ;;  %v1613_v13 = vadd.f32 %v7357_v18, %v1374_v62  ;;  %v7618_v25 = vpop.f32.mrf.mxu2 }
 0x29a   : > { %2073 = vmatmul.f32.gmra.mxu1 %v7183_v19  ;;  %9250 = vst [vmem:[#allocation39_spill] sm:$0xff] %v7618_v25 }
 0x29b   : > { %v2503_v42 = vand.u32 4294901760, %v2007_v29 }
 0x29d   : > { %v2539_v14 = vsub.f32 %v2007_v29, %v2503_v42  ;;  %2504 = vmatpush.msrb.mxu2 %v2503_v42  ;;  %v2548_v29 = vand.u32 4294901760, %v2547_v56 }
 0x29e   : > { %v1831_v59 = vpop.f32.mrf.mxu0 }
 0x29f   : > { %2506 = vmatpush.msrb.mxu2 %v2505_v16  ;;  %v2540_v4 = vand.u32 4294901760, %v2539_v14  ;;  %v2014_v10 = vpop.f32.mrf.mxu1  ;;  %v1832_v53 = vadd.f32 %v1831_v59, %v1607_v41  ;;  %v1193_v41 = vadd.f32 %v7268_v6, %v7271_v52 }
 0x2a0   : > { %2512 = vmatmul.f32.vlgmr.msrb.gmra.mxu2 %v7428_v28 }
 0x2a1   : > { %2575 = vmatpush.msra.mxu2 %v2539_v14  ;;  %1894 = vmatmul.f32.gmra.mxu0 %v7183_v19  ;;  %v2541_v22 = vsub.f32 %v2539_v14, %v2540_v4  ;;  %v2011_v14 = vadd.f32 %v2010_v9, %v1832_v53  ;;  %v7645_v59 = vpop.f32.mrf.mxu2 }
 0x2a2   : > { %2077 = vmatmul.f32.gmra.mxu1 %v7197_v30  ;;  %9252 = vst [vmem:[#allocation102_spill] sm:$0xff] %v7645_v59 }
 0x2a3   : > { %2578 = vmatpush.msra.mxu2 %v2545_v38  ;;  %v2542_v20 = vand.u32 4294901760, %v2541_v22  ;;  %v7624_v38 = vpop.f32.mrf.mxu3 }
 0x2a4   : > { %9251 = vst [vmem:[#allocation41_spill] sm:$0xff] %v7624_v38  ;;  %v9266_v38 = vld [vmem:[#allocation60_spill] sm:$0xff] }
 0x2a5   : > { %2638 = vmatpush.msrb.mxu2 %v2540_v4  ;;  %2543 = vmatpush.msrb.mxu3 %v2542_v20 }
 0x2a6   : > { %v1835_v5 = vpop.f32.mrf.mxu0 }
 0x2a7   : > { %2642 = vmatpush.msrb.mxu2 %v2546_v17  ;;  %v1836_v19 = vadd.f32 %v1835_v5, %v1613_v13  ;;  %2549 = vmatpush.msrb.mxu3 %v2548_v29  ;;  %v7620_v45 = vpop.f32.mrf.mxu1  ;;  %v7630_v17 = vand.u32 4294901760, %v2011_v14  ;;  %v1399_v29 = vadd.f32 %v7423_v3, %v1193_v41  ;;  %v9260_v5 = vld [vmem:[#allocation58_spill] sm:$0xff]  ;;  %v9264_v3 = vld [vmem:[#allocation96_spill] sm:$0xff] }
 0x2a8   : > { %2551 = vmatmul.f32.vlgmr.msrb.gmra.mxu3 %v7397_v15  ;;  %2520 = vmatmul.f32.gmra.mxu2 %v7446_v7 }
 0x2a9   : > { %2605 = vmatpush.msra.mxu3 %v2503_v42  ;;  %v2015_v39 = vadd.f32 %v2014_v10, %v1836_v19  ;;  %1898 = vmatmul.f32.gmra.mxu0 %v7197_v30  ;;  %v7660_v62 = vpop.f32.mrf.mxu2  ;;  %v9261_v19 = vld [vmem:[#allocation57_spill] sm:$0xff] }
 0x2aa   : > { %2081 = vmatmul.f32.gmra.mxu1 %v7211_v32  ;;  %v1197_v6 = vadd.f32 %v9261_v19, %v9260_v5  ;;  %v9267_v5 = vld [vmem:[#allocation59_spill] sm:$0xff] }
 0x2ab   : > { %2607 = vmatpush.msra.mxu3 %v2505_v16  ;;  %v7627_v18 = vand.u32 4294901760, %v2015_v39  ;;  %v1201_v19 = vadd.f32 %v9267_v5, %v9266_v38  ;;  %v9273_v5 = vld [vmem:[#allocation100_spill] sm:$0xff] }
 0x2ad   : > { %2667 = vmatpush.msrb.mxu3 %v2503_v42  ;;  %v7633_v9 = vsub.f32 %v2015_v39, %v7627_v18  ;;  %3630 = vmatpush.msrb.mxu1 %v7627_v18  ;;  %v7643_v42 = vsub.f32 %v2011_v14, %v7630_v17 }
 0x2ae   : > { %v7636_v30 = vpop.f32.mrf.mxu0 }
 0x2af   : > { %2669 = vmatpush.msrb.mxu3 %v2505_v16  ;;  %3600 = vmatpush.msrb.mxu0 %v7633_v9  ;;  %v7640_v54 = vpop.f32.mrf.mxu1  ;;  %v7652_v16 = vpop.f32.mrf.mxu3 }
 0x2b0   : > { %3632 = vmatpush.msrb.mxu1 %v7630_v17  ;;  %2555 = vmatmul.f32.gmra.mxu3 %v7417_v40  ;;  %9253 = vst [vmem:[#allocation103_spill] sm:$0xff] %v7652_v16 }
 0x2b1   : > { %1902 = vmatmul.f32.gmra.mxu0 %v7211_v32  ;;  %2581 = vmatmul.f32.vlgmr.msra.gmra.mxu2 %v7405_v27 }
 0x2b2   : > { %3603 = vmatpush.msrb.mxu0 %v7643_v42  ;;  %2085 = vmatmul.f32.gmra.mxu1 %v7225_v11 }
 0x2b6   : > { %v7654_v4 = vpop.f32.mrf.mxu0 }
 0x2b7   : > { %v7656_v10 = vpop.f32.mrf.mxu1  ;;  %v7664_v32 = vpop.f32.mrf.mxu3 }
 0x2b8   : > { %9254 = vst [vmem:[#allocation104_spill] sm:$0xff] %v7656_v10  ;;  %2611 = vmatmul.f32.vlgmr.msra.gmra.mxu3 %v7414_v57  ;;  %v9272_v10 = vld [vmem:[#allocation61_spill] sm:$0xff] }
 0x2b9   : > { %1906 = vmatmul.f32.gmra.mxu0 %v7225_v11  ;;  %2586 = vmatmul.f32.gmra.mxu2 %v7426_v50  ;;  %v7674_v11 = vpop.f32.mrf.mxu2 }
 0x2ba   : > { %2089 = vmatmul.f32.gmra.mxu1 %v7239_v36  ;;  %9257 = vst [vmem:[#allocation107_spill] sm:$0xff] %v7674_v11 }
 0x2be   : > { %v7666_v22 = vpop.f32.mrf.mxu0 }
 0x2bf   : > { %9255 = vst [vmem:[#allocation105_spill] sm:$0xff] %v7666_v22  ;;  %v7668_v56 = vpop.f32.mrf.mxu1  ;;  %v7680_v53 = vpop.f32.mrf.mxu3 }
 0x2c0   : > { %9256 = vst [vmem:[#allocation106_spill] sm:$0xff] %v7668_v56  ;;  %2617 = vmatmul.f32.gmra.mxu3 %v7434_v46  ;;  %v9269_v56 = vld [vmem:[#allocation99_spill] sm:$0xff] }
 0x2c1   : > { %1910 = vmatmul.f32.gmra.mxu0 %v7239_v36  ;;  %2644 = vmatmul.f32.vlgmr.msrb.gmra.mxu2 %v7397_v15  ;;  %9259 = vst [vmem:[#allocation109_spill] sm:$0xff] %v7680_v53  ;;  %v1643_v36 = vadd.f32 %v7430_v34, %v1399_v29  ;;  %v7690_v52 = vpop.f32.mrf.mxu2  ;;  %v9265_v34 = vld [vmem:[#allocation97_spill] sm:$0xff] }
 0x2c2   : > { %2093 = vmatmul.f32.gmra.mxu1 %v7253_v24  ;;  %9262 = vst [vmem:[#allocation58_spill] sm:$0xff] %v7690_v52 }
 0x2c6   : > { %v7678_v20 = vpop.f32.mrf.mxu0 }
 0x2c7   : > { %9258 = vst [vmem:[#allocation108_spill] sm:$0xff] %v7678_v20  ;;  %v2034_v13 = vpop.f32.mrf.mxu1  ;;  %v7692_v51 = vpop.f32.mrf.mxu3 }
 0x2c8   : > { %2671 = vmatmul.f32.vlgmr.msrb.gmra.mxu3 %v7397_v15  ;;  %9263 = vst [vmem:[#allocation57_spill] sm:$0xff] %v7692_v51 }
 0x2c9   : > { %1914 = vmatmul.f32.gmra.mxu0 %v7253_v24  ;;  %2648 = vmatmul.f32.gmra.mxu2 %v7417_v40  ;;  %v1404_v24 = vadd.f32 %v9264_v3, %v1197_v6  ;;  %v7701_v59 = vpop.f32.mrf.mxu2  ;;  %v1409_v6 = vadd.f32 %v9269_v56, %v1201_v19 }
 0x2ca   : > { %3500 = vmatmul.f32.vlgmr.msra.gmra.mxu1 %v7397_v15  ;;  %9268 = vst [vmem:[#allocation96_spill] sm:$0xff] %v7701_v59  ;;  %v9300_v59 = vld [vmem:[#allocation77_spill] sm:$0xff] }
 0x2cb   : > { %v1649_v29 = vadd.f32 %v9265_v34, %v1404_v24  ;;  %v9271_v34 = vld [vmem:[#allocation62_spill] sm:$0xff]  ;;  %v1655_v20 = vadd.f32 %v9273_v5, %v1409_v6  ;;  %v9277_v6 = vld [vmem:[#allocation27_spill] sm:$0xff] }
 0x2cc   : > { %v1205_v38 = vadd.f32 %v9272_v10, %v9271_v34 }
 0x2ce   : > { %v1855_v14 = vpop.f32.mrf.mxu0 }
 0x2cf   : > { %v1856_v39 = vadd.f32 %v1855_v14, %v1643_v36  ;;  %v2038_v26 = vpop.f32.mrf.mxu1  ;;  %v7706_v3 = vpop.f32.mrf.mxu3 }
 0x2d0   : > { %2675 = vmatmul.f32.gmra.mxu3 %v7417_v40  ;;  %9270 = vst [vmem:[#allocation97_spill] sm:$0xff] %v7706_v3 }
 0x2d1   : > { %v2035_v41 = vadd.f32 %v2034_v13, %v1856_v39  ;;  %3473 = vmatmul.f32.vlgmr.msra.gmra.mxu0 %v7397_v15  ;;  %v7714_v10 = vpop.f32.mrf.mxu2 }
 0x2d2   : > { %3504 = vmatmul.f32.gmra.mxu1 %v7417_v40  ;;  %9275 = vst [vmem:[#allocation60_spill] sm:$0xff] %v7714_v10 }
 0x2d3   : > { %v2697_v16 = vand.u32 4294901760, %v2035_v41 }
 0x2d5   : > { %v2737_v13 = vsub.f32 %v2035_v41, %v2697_v16  ;;  %v9274_v41 = vld [vmem:[#allocation26_spill] sm:$0xff] }
 0x2d6   : > { %v1859_v25 = vpop.f32.mrf.mxu0  ;;  %v1414_v19 = vadd.f32 %v9274_v41, %v1205_v38 }
 0x2d7   : > { %v1860_v36 = vadd.f32 %v1859_v25, %v1649_v29  ;;  %v2042_v14 = vpop.f32.mrf.mxu1  ;;  %v2738_v29 = vand.u32 4294901760, %v2737_v13 }
 0x2d9   : > { %v2039_v39 = vadd.f32 %v2038_v26, %v1860_v36  ;;  %3477 = vmatmul.f32.gmra.mxu0 %v7417_v40  ;;  %v2739_v51 = vsub.f32 %v2737_v13, %v2738_v29 }
 0x2da   : > { %3636 = vmatmul.f32.vlgmr.msrb.gmra.mxu1 %v7414_v57 }
 0x2db   : > { %v2695_v24 = vand.u32 4294901760, %v2039_v39 }
 0x2dd   : > { %v2731_v25 = vsub.f32 %v2039_v39, %v2695_v24  ;;  %2696 = vmatpush.msra.mxu2 %v2695_v24  ;;  %v1661_v39 = vadd.f32 %v9277_v6, %v1414_v19 }
 0x2de   : > { %v1863_v22 = vpop.f32.mrf.mxu0 }
 0x2df   : > { %v1864_v12 = vadd.f32 %v1863_v22, %v1655_v20  ;;  %2698 = vmatpush.msra.mxu2 %v2697_v16  ;;  %v2732_v56 = vand.u32 4294901760, %v2731_v25  ;;  %v2046_v26 = vpop.f32.mrf.mxu1  ;;  %v7717_v20 = vpop.f32.mrf.mxu3 }
 0x2e0   : > { %2704 = vmatmul.f32.vlgmr.msra.gmra.mxu2 %v7428_v28  ;;  %9276 = vst [vmem:[#allocation59_spill] sm:$0xff] %v7717_v20 }
 0x2e1   : > { %2767 = vmatpush.msrb.mxu2 %v2731_v25  ;;  %v2043_v36 = vadd.f32 %v2042_v14, %v1864_v12  ;;  %v2733_v3 = vsub.f32 %v2731_v25, %v2732_v56  ;;  %3606 = vmatmul.f32.vlgmr.msrb.gmra.mxu0 %v7405_v27  ;;  %v2740_v12 = vand.u32 4294901760, %v2739_v51  ;;  %v7732_v51 = vpop.f32.mrf.mxu2 }
 0x2e2   : > { %3642 = vmatmul.f32.gmra.mxu1 %v7434_v46  ;;  %9281 = vst [vmem:[#allocation100_spill] sm:$0xff] %v7732_v51 }
 0x2e3   : > { %2770 = vmatpush.msrb.mxu2 %v2737_v13  ;;  %v2734_v22 = vand.u32 4294901760, %v2733_v3  ;;  %v7720_v34 = vand.u32 4294901760, %v2043_v36 }
 0x2e5   : > { %2830 = vmatpush.msra.mxu2 %v2732_v56  ;;  %9278 = vst [vmem:[#allocation99_spill] sm:$0xff] %v7720_v34  ;;  %2735 = vmatpush.msra.mxu3 %v2734_v22  ;;  %v7725_v13 = vsub.f32 %v2043_v36, %v7720_v34 }
 0x2e6   : > { %v1867_v14 = vpop.f32.mrf.mxu0 }
 0x2e7   : > { %2834 = vmatpush.msra.mxu2 %v2738_v29  ;;  %v1868_v38 = vadd.f32 %v1867_v14, %v1661_v39  ;;  %2741 = vmatpush.msra.mxu3 %v2740_v12  ;;  %v7722_v5 = vpop.f32.mrf.mxu1  ;;  %9279 = vst [vmem:[#allocation62_spill] sm:$0xff] %v7725_v13  ;;  %v3763_v56 = vand.u32 4294901760, %v7725_v13  ;;  %v7741_v41 = vpop.f32.mrf.mxu3 }
 0x2e8   : > { %2743 = vmatmul.f32.vlgmr.msra.gmra.mxu3 %v7397_v15  ;;  %2712 = vmatmul.f32.gmra.mxu2 %v7446_v7  ;;  %9283 = vst [vmem:[#allocation27_spill] sm:$0xff] %v7741_v41 }
 0x2e9   : > { %2797 = vmatpush.msrb.mxu3 %v2695_v24  ;;  %v2047_v25 = vadd.f32 %v2046_v26, %v1868_v38  ;;  %3611 = vmatmul.f32.gmra.mxu0 %v7426_v50  ;;  %v3764_v22 = vsub.f32 %v7725_v13, %v3763_v56  ;;  %v7752_v39 = vpop.f32.mrf.mxu2 }
 0x2eb   : > { %2799 = vmatpush.msrb.mxu3 %v2697_v16  ;;  %v7730_v3 = vand.u32 4294901760, %v2047_v25  ;;  %v3765_v6 = vand.u32 4294901760, %v3764_v22  ;;  %v9288_v22 = vld [vmem:[#allocation72_spill] sm:$0xff] }
 0x2ed   : > { %9280 = vst [vmem:[#allocation61_spill] sm:$0xff] %v7730_v3  ;;  %2859 = vmatpush.msra.mxu3 %v2695_v24  ;;  %v7735_v29 = vsub.f32 %v2047_v25, %v7730_v3  ;;  %3721 = vmatpush.msra.mxu0 %v7730_v3 }
 0x2ee   : > { %v7739_v26 = vpop.f32.mrf.mxu0 }
 0x2ef   : > { %9282 = vst [vmem:[#allocation26_spill] sm:$0xff] %v7735_v29  ;;  %2861 = vmatpush.msra.mxu3 %v2697_v16  ;;  %3723 = vmatpush.msra.mxu0 %v7720_v34  ;;  %v3757_v19 = vand.u32 4294901760, %v7735_v29  ;;  %v7745_v36 = vpop.f32.mrf.mxu1  ;;  %v7759_v38 = vpop.f32.mrf.mxu3 }
 0x2f0   : > { %2747 = vmatmul.f32.gmra.mxu3 %v7417_v40  ;;  %2773 = vmatmul.f32.vlgmr.msrb.gmra.mxu2 %v7405_v27 }
 0x2f1   : > { %3855 = vmatpush.msrb.mxu0 %v3757_v19  ;;  %v3758_v24 = vsub.f32 %v7735_v29, %v3757_v19  ;;  %v7770_v19 = vpop.f32.mrf.mxu2 }
 0x2f2   : > { %3729 = vmatmul.f32.vlgmr.msra.gmra.mxu0 %v7428_v28 }
 0x2f3   : > { %3859 = vmatpush.msrb.mxu0 %v3763_v56  ;;  %v3759_v16 = vand.u32 4294901760, %v3758_v24 }
 0x2f5   : > { %3760 = vmatpush.msra.mxu1 %v3759_v16  ;;  %v9289_v16 = vld [vmem:[#allocation71_spill] sm:$0xff] }
 0x2f6   : > { %v7754_v12 = vpop.f32.mrf.mxu0 }
 0x2f7   : > { %3766 = vmatpush.msra.mxu1 %v3765_v6  ;;  %v7756_v14 = vpop.f32.mrf.mxu1  ;;  %v7775_v24 = vpop.f32.mrf.mxu3  ;;  %v1225_v6 = vadd.f32 %v9289_v16, %v9288_v22  ;;  %v9293_v22 = vld [vmem:[#allocation74_spill] sm:$0xff]  ;;  %v9294_v16 = vld [vmem:[#allocation73_spill] sm:$0xff] }
 0x2f8   : > { %9284 = vst [vmem:[#allocation110_spill] sm:$0xff] %v7756_v14  ;;  %2803 = vmatmul.f32.vlgmr.msrb.gmra.mxu3 %v7414_v57  ;;  %3768 = vmatmul.f32.vlgmr.msra.gmra.mxu1 %v7397_v15 }
 0x2f9   : > { %3884 = vmatpush.msrb.mxu1 %v7730_v3  ;;  %2778 = vmatmul.f32.gmra.mxu2 %v7426_v50  ;;  %9287 = vst [vmem:[#allocation113_spill] sm:$0xff] %v7775_v24  ;;  %v7785_v41 = vpop.f32.mrf.mxu2 }
 0x2fa   : > { %3737 = vmatmul.f32.gmra.mxu0 %v7446_v7  ;;  %9291 = vst [vmem:[#allocation71_spill] sm:$0xff] %v7785_v41 }
 0x2fb   : > { %3886 = vmatpush.msrb.mxu1 %v7720_v34 }
 0x2fe   : > { %v7766_v25 = vpop.f32.mrf.mxu0 }
 0x2ff   : > { %9285 = vst [vmem:[#allocation111_spill] sm:$0xff] %v7766_v25  ;;  %v7768_v56 = vpop.f32.mrf.mxu1  ;;  %v7789_v34 = vpop.f32.mrf.mxu3 }
 0x300   : > { %9286 = vst [vmem:[#allocation112_spill] sm:$0xff] %v7768_v56  ;;  %2809 = vmatmul.f32.gmra.mxu3 %v7434_v46  ;;  %3772 = vmatmul.f32.gmra.mxu1 %v7417_v40  ;;  %v1439_v56 = vadd.f32 %v7525_v49, %v1225_v6 }
 0x301   : > { %2836 = vmatmul.f32.vlgmr.msra.gmra.mxu2 %v7397_v15  ;;  %9292 = vst [vmem:[#allocation114_spill] sm:$0xff] %v7789_v34  ;;  %v7797_v13 = vpop.f32.mrf.mxu2 }
 0x302   : > { %3861 = vmatmul.f32.vlgmr.msrb.gmra.mxu0 %v7397_v15  ;;  %v1691_v20 = vadd.f32 %v7534_v43, %v1439_v56  ;;  %9295 = vst [vmem:[#allocation74_spill] sm:$0xff] %v7797_v13 }
 0x306   : > { %v7780_v14 = vpop.f32.mrf.mxu0 }
 0x307   : > { %9290 = vst [vmem:[#allocation72_spill] sm:$0xff] %v7780_v14  ;;  %v2066_v25 = vpop.f32.mrf.mxu1  ;;  %v1229_v14 = vadd.f32 %v9294_v16, %v9293_v22  ;;  %v7800_v43 = vpop.f32.mrf.mxu3 }
 0x308   : > { %2863 = vmatmul.f32.vlgmr.msra.gmra.mxu3 %v7397_v15  ;;  %3888 = vmatmul.f32.vlgmr.msrb.gmra.mxu1 %v7397_v15  ;;  %9296 = vst [vmem:[#allocation73_spill] sm:$0xff] %v7800_v43 }
 0x309   : > { %2840 = vmatmul.f32.gmra.mxu2 %v7417_v40  ;;  %v1444_v49 = vadd.f32 %v7553_v23, %v1229_v14  ;;  %v7806_v41 = vpop.f32.mrf.mxu2 }
 0x30a   : > { %3865 = vmatmul.f32.gmra.mxu0 %v7417_v40 }
 0x30b   : > { %v1697_v58 = vadd.f32 %v7556_v0, %v1444_v49 }
 0x30e   : > { %v1887_v3 = vpop.f32.mrf.mxu0 }
 0x30f   : > { %v1888_v51 = vadd.f32 %v1887_v3, %v1691_v20  ;;  %v2070_v10 = vpop.f32.mrf.mxu1  ;;  %v9297_v20 = vld [vmem:[#allocation76_spill] sm:$0xff]  ;;  %v9298_v3 = vld [vmem:[#allocation75_spill] sm:$0xff] }
 0x310   : > { %2867 = vmatmul.f32.gmra.mxu3 %v7417_v40  ;;  %3892 = vmatmul.f32.gmra.mxu1 %v7417_v40  ;;  %v1233_v23 = vadd.f32 %v9298_v3, %v9297_v20  ;;  %9301 = vst [vmem:[#allocation76_spill] sm:$0xff] %v7806_v41  ;;  %v9305_v3 = vld [vmem:[#allocation28_spill] sm:$0xff] }
 0x311   : > { %v2067_v6 = vadd.f32 %v2066_v25, %v1888_v51  ;;  %v9299_v25 = vld [vmem:[#allocation78_spill] sm:$0xff] }
 0x312   : > { %v1237_v33 = vadd.f32 %v9300_v59, %v9299_v25  ;;  %v1449_v0 = vadd.f32 %v7564_v48, %v1233_v23  ;;  %v7818_v25 = vand.u32 4294901760, %v9305_v3 }
 0x313   : > { %v2889_v29 = vand.u32 4294901760, %v2067_v6 }
 0x314   : > { %v1703_v20 = vadd.f32 %v7571_v47, %v1449_v0  ;;  %9306 = vst [vmem:[#allocation77_spill] sm:$0xff] %v7818_v25  ;;  %v9309_v0 = vld [vmem:[#allocation98_spill] sm:$0xff] }
 0x315   : > { %v2929_v22 = vsub.f32 %v2067_v6, %v2889_v29  ;;  %v7813_v6 = vpop.f32.mrf.mxu3 }
 0x316   : > { %v1891_v34 = vpop.f32.mrf.mxu0  ;;  %9304 = vst [vmem:[#allocation78_spill] sm:$0xff] %v7813_v6 }
 0x317   : > { %v1892_v56 = vadd.f32 %v1891_v34, %v1697_v58  ;;  %v2074_v14 = vpop.f32.mrf.mxu1  ;;  %v2930_v13 = vand.u32 4294901760, %v2929_v22  ;;  %v9302_v34 = vld [vmem:[#allocation30_spill] sm:$0xff] }
 0x319   : > { %v2071_v16 = vadd.f32 %v2070_v10, %v1892_v56  ;;  %v7810_v10 = vand.u32 4294901760, %v9302_v34  ;;  %v1454_v56 = vadd.f32 %v7579_v2, %v1237_v33  ;;  %v7827_v33 = vsub.f32 %v9305_v3, %v7818_v25 }
 0x31b   : > { %v2887_v51 = vand.u32 4294901760, %v2071_v16  ;;  %9303 = vst [vmem:[#allocation75_spill] sm:$0xff] %v7810_v10  ;;  %v7822_v23 = vsub.f32 %v9302_v34, %v7810_v10  ;;  %v1709_v6 = vadd.f32 %v7587_v21, %v1454_v56  ;;  %v7832_v34 = vpop.f32.mrf.mxu2  ;;  %v9311_v21 = vld [vmem:[#allocation95_spill] sm:$0xff] }
 0x31c   : > { %9308 = vst [vmem:[#allocation28_spill] sm:$0xff] %v7827_v33  ;;  %v7838_v56 = vand.u32 4294901760, %v9311_v21 }
 0x31d   : > { %v2923_v52 = vsub.f32 %v2071_v16, %v2887_v51  ;;  %2888 = vmatpush.msrb.mxu2 %v2887_v51  ;;  %v2931_v16 = vsub.f32 %v2929_v22, %v2930_v13  ;;  %9307 = vst [vmem:[#allocation30_spill] sm:$0xff] %v7822_v23 }
 0x31e   : > { %v1895_v49 = vpop.f32.mrf.mxu0  ;;  %9310 = vst [vmem:[#allocation98_spill] sm:$0xff] %v7832_v34  ;;  %v9352_v34 = vld [vmem:[#allocation80_spill] sm:$0xff] }
 0x31f   : > { %2890 = vmatpush.msrb.mxu2 %v2889_v29  ;;  %v2924_v58 = vand.u32 4294901760, %v2923_v52  ;;  %v1896_v41 = vadd.f32 %v1895_v49, %v1703_v20  ;;  %v2932_v2 = vand.u32 4294901760, %v2931_v16  ;;  %v4204_v49 = vand.u32 4294901760, %v7822_v23  ;;  %v7841_v20 = vpop.f32.mrf.mxu3 }
 0x320   : > { %2896 = vmatmul.f32.vlgmr.msrb.gmra.mxu2 %v7428_v28  ;;  %v4210_v16 = vand.u32 4294901760, %v7827_v33  ;;  %9312 = vst [vmem:[#allocation95_spill] sm:$0xff] %v7841_v20  ;;  %v9323_v20 = vld [vmem:[#allocation86_spill] sm:$0xff] }
 0x321   : > { %2959 = vmatpush.msra.mxu2 %v2923_v52  ;;  %v2925_v59 = vsub.f32 %v2923_v52, %v2924_v58  ;;  %v2078_v52 = vpop.f32.mrf.mxu1 }
 0x323   : > { %2962 = vmatpush.msra.mxu2 %v2929_v22  ;;  %v2926_v48 = vand.u32 4294901760, %v2925_v59  ;;  %v7830_v22 = vand.u32 4294901760, %v9309_v0 }
 0x325   : > { %3022 = vmatpush.msrb.mxu2 %v2924_v58  ;;  %2927 = vmatpush.msrb.mxu3 %v2926_v48  ;;  %v2075_v58 = vadd.f32 %v2074_v14, %v1896_v41  ;;  %v4205_v14 = vsub.f32 %v7822_v23, %v4204_v49  ;;  %v7854_v48 = vsub.f32 %v9311_v21, %v7838_v56 }
 0x326   : > { %v1899_v47 = vpop.f32.mrf.mxu0 }
 0x327   : > { %3026 = vmatpush.msrb.mxu2 %v2930_v13  ;;  %v1900_v59 = vadd.f32 %v1899_v47, %v1709_v6  ;;  %2933 = vmatpush.msrb.mxu3 %v2932_v2  ;;  %v7845_v6 = vsub.f32 %v9309_v0, %v7830_v22  ;;  %v7849_v41 = vand.u32 4294901760, %v2075_v58  ;;  %v4211_v47 = vsub.f32 %v7827_v33, %v4210_v16  ;;  %v9317_v0 = vld [vmem:[#allocation51_spill] sm:$0xff]  ;;  %v9321_v33 = vld [vmem:[#allocation48_spill] sm:$0xff] }
 0x328   : > { %2904 = vmatmul.f32.gmra.mxu2 %v7446_v7  ;;  %2935 = vmatmul.f32.vlgmr.msrb.gmra.mxu3 %v7397_v15 }
 0x329   : > { %v2079_v13 = vadd.f32 %v2078_v52, %v1900_v59  ;;  %2989 = vmatpush.msra.mxu3 %v2887_v51  ;;  %9314 = vst [vmem:[#allocation116_spill] sm:$0xff] %v7849_v41  ;;  %v9316_v52 = vld [vmem:[#allocation52_spill] sm:$0xff]  ;;  %v7869_v21 = vsub.f32 %v2075_v58, %v7849_v41 }
 0x32a   : > { %v1181_v59 = vadd.f32 %v9317_v0, %v9316_v52  ;;  %v9031_v52 = vand.u32 4294901760, %v7854_v48  ;;  %v4212_v0 = vand.u32 4294901760, %v4211_v47 }
 0x32b   : > { %v7847_v3 = vand.u32 4294901760, %v2079_v13  ;;  %2991 = vmatpush.msra.mxu3 %v2889_v29  ;;  %9319 = vst [vmem:[#allocation51_spill] sm:$0xff] %v7869_v21  ;;  %v7879_v58 = vpop.f32.mrf.mxu3 }
 0x32c   : > { %v3186_v47 = vsub.f32 %v7854_v48, %v9031_v52 }
 0x32d   : > { %9313 = vst [vmem:[#allocation115_spill] sm:$0xff] %v7847_v3  ;;  %3051 = vmatpush.msrb.mxu3 %v2887_v51  ;;  %v7857_v2 = vsub.f32 %v2079_v13, %v7847_v3  ;;  %4014 = vmatpush.msra.mxu1 %v7847_v3  ;;  %v7866_v51 = vpop.f32.mrf.mxu2  ;;  %v9320_v13 = vld [vmem:[#allocation49_spill] sm:$0xff] }
 0x32e   : > { %9318 = vst [vmem:[#allocation52_spill] sm:$0xff] %v7866_v51  ;;  %v1177_v23 = vadd.f32 %v9321_v33, %v9320_v13  ;;  %v9324_v33 = vand.u32 4294901760, %v7845_v6  ;;  %v9325_v13 = vld [vmem:[#allocation82_spill] sm:$0xff] }
 0x32f   : > { %9315 = vst [vmem:[#allocation117_spill] sm:$0xff] %v7857_v2  ;;  %3053 = vmatpush.msrb.mxu3 %v2889_v29  ;;  %3984 = vmatpush.msra.mxu0 %v7857_v2  ;;  %v4206_v29 = vand.u32 4294901760, %v4205_v14  ;;  %v9351_v2 = vld [vmem:[#allocation36_spill] sm:$0xff] }
 0x330   : > { %4016 = vmatpush.msra.mxu1 %v7849_v41  ;;  %2939 = vmatmul.f32.gmra.mxu3 %v7417_v40  ;;  %9322 = vst [vmem:[#allocation49_spill] sm:$0xff] %v7879_v58  ;;  %v1384_v41 = vadd.f32 %v9323_v20, %v1181_v59  ;;  %v3180_v14 = vsub.f32 %v7845_v6, %v9324_v33  ;;  %v9326_v20 = vld [vmem:[#allocation89_spill] sm:$0xff] }
 0x331   : > { %2965 = vmatmul.f32.vlgmr.msra.gmra.mxu2 %v7405_v27  ;;  %4020 = vmatmul.f32.vlgmr.msra.gmra.mxu1 %v7414_v57 }
 0x332   : > { %3143 = vmatpush.msra.mxu2 %v7830_v22  ;;  %4207 = vmatpush.msrb.mxu1 %v4206_v29  ;;  %v1379_v29 = vadd.f32 %v9325_v13, %v1177_v23  ;;  %v1625_v59 = vadd.f32 %v9326_v20, %v1384_v41  ;;  %v3187_v13 = vand.u32 4294901760, %v3186_v47 }
 0x333   : > { %3987 = vmatpush.msra.mxu0 %v7869_v21  ;;  %v3181_v21 = vand.u32 4294901760, %v3180_v14  ;;  %v7905_v41 = vpop.f32.mrf.mxu3 }
 0x334   : > { %3145 = vmatpush.msra.mxu2 %v7838_v56  ;;  %3990 = vmatmul.f32.vlgmr.msra.gmra.mxu0 %v7405_v27  ;;  %v1844_v33 = vadd.f32 %v7654_v4, %v1625_v59  ;;  %9329 = vst [vmem:[#allocation86_spill] sm:$0xff] %v7905_v41 }
 0x335   : > { %4168 = vmatpush.msrb.mxu0 %v7810_v10  ;;  %4213 = vmatpush.msrb.mxu1 %v4212_v0  ;;  %v9327_v0 = vld [vmem:[#allocation83_spill] sm:$0xff]  ;;  %v7900_v52 = vpop.f32.mrf.mxu2 }
 0x336   : > { %v1619_v23 = vadd.f32 %v9327_v0, %v1379_v29  ;;  %9328 = vst [vmem:[#allocation48_spill] sm:$0xff] %v7900_v52  ;;  %v2023_v14 = vadd.f32 %v7640_v54, %v1844_v33  ;;  %v7909_v29 = vand.u32 4294901760, %v7558_v35  ;;  %v9341_v33 = vld [vmem:[#allocation63_spill] sm:$0xff] }
 0x337   : > { %4331 = vmatpush.msra.mxu1 %v7810_v10  ;;  %4170 = vmatpush.msrb.mxu0 %v7818_v25  ;;  %v1903_v10 = vpop.f32.mrf.mxu0 }
 0x338   : > { %2995 = vmatmul.f32.vlgmr.msra.gmra.mxu3 %v7414_v57  ;;  %9330 = vst [vmem:[#allocation82_spill] sm:$0xff] %v7909_v29  ;;  %v7923_v54 = vsub.f32 %v7558_v35, %v7909_v29 }
 0x339   : > { %4302 = vmatpush.msra.mxu0 %v4204_v49  ;;  %4333 = vmatpush.msra.mxu1 %v7818_v25  ;;  %v1840_v49 = vadd.f32 %v7636_v30, %v1619_v23  ;;  %v7917_v30 = vand.u32 4294901760, %v2023_v14  ;;  %v9340_v23 = vld [vmem:[#allocation64_spill] sm:$0xff] }
 0x33a   : > { %2970 = vmatmul.f32.gmra.mxu2 %v7426_v50  ;;  %3182 = vmatpush.msra.mxu3 %v3181_v21  ;;  %9333 = vst [vmem:[#allocation118_spill] sm:$0xff] %v7923_v54 }
 0x33b   : > { %4306 = vmatpush.msra.mxu0 %v4210_v16  ;;  %4026 = vmatmul.f32.gmra.mxu1 %v7434_v46  ;;  %v2019_v4 = vadd.f32 %v7620_v45, %v1840_v49  ;;  %v7915_v16 = vand.u32 4294901760, %v7542_v37  ;;  %9332 = vst [vmem:[#allocation83_spill] sm:$0xff] %v7917_v30  ;;  %v7937_v20 = vsub.f32 %v2023_v14, %v7917_v30  ;;  %v7941_v35 = vpop.f32.mrf.mxu3  ;;  %v9342_v49 = vld [vmem:[#allocation66_spill] sm:$0xff]  ;;  %v9343_v14 = vld [vmem:[#allocation65_spill] sm:$0xff] }
 0x33c   : > { %3188 = vmatpush.msra.mxu3 %v3187_v13  ;;  %3995 = vmatmul.f32.gmra.mxu0 %v7426_v50  ;;  %9338 = vst [vmem:[#allocation123_spill] sm:$0xff] %v7941_v35  ;;  %v1209_v13 = vadd.f32 %v9341_v33, %v9340_v23  ;;  %v9347_v33 = vld [vmem:[#allocation31_spill] sm:$0xff] }
 0x33d   : > { %9331 = vst [vmem:[#allocation89_spill] sm:$0xff] %v7915_v16  ;;  %v7925_v21 = vand.u32 4294901760, %v2019_v4  ;;  %v7929_v45 = vpop.f32.mrf.mxu2  ;;  %v7934_v47 = vsub.f32 %v7542_v37, %v7915_v16  ;;  %v9041_v37 = vand.u32 4294901760, %v7937_v20 }
 0x33e   : > { %9335 = vst [vmem:[#allocation120_spill] sm:$0xff] %v7929_v45  ;;  %v9371_v45 = vand.u32 4294901760, %v7937_v20 }
 0x33f   : > { %9334 = vst [vmem:[#allocation119_spill] sm:$0xff] %v7925_v21  ;;  %v7944_v59 = vsub.f32 %v2019_v4, %v7925_v21  ;;  %v1213_v4 = vadd.f32 %v9343_v14, %v9342_v49  ;;  %v9348_v14 = vand.u32 4294901760, %v7845_v6 }
 0x340   : > { %3001 = vmatmul.f32.gmra.mxu3 %v7434_v46  ;;  %9336 = vst [vmem:[#allocation121_spill] sm:$0xff] %v7934_v47 }
 0x341   : > { %9337 = vst [vmem:[#allocation122_spill] sm:$0xff] %v7937_v20  ;;  %v9043_v0 = vand.u32 4294901760, %v7944_v59  ;;  %v1424_v49 = vadd.f32 %v9347_v33, %v1213_v4  ;;  %v9353_v4 = vld [vmem:[#allocation79_spill] sm:$0xff] }
 0x342   : > { %3028 = vmatmul.f32.vlgmr.msrb.gmra.mxu2 %v7397_v15  ;;  %9339 = vst [vmem:[#allocation124_spill] sm:$0xff] %v7944_v59  ;;  %v1241_v33 = vadd.f32 %v9353_v4, %v9352_v34  ;;  %v6470_v4 = vld [vmem:[%s6641_s9] sm:$0xff] }
 0x343   : > { %3214 = vmatpush.msrb.mxu2 %v7845_v6  ;;  %4215 = vmatmul.f32.vlgmr.msrb.gmra.mxu1 %v7397_v15  ;;  %v7970_v23 = vpop.f32.mrf.mxu3  ;;  %v9354_v6 = vld [vmem:[#allocation84_spill] sm:$0xff] }
 0x344   : > { %4459 = vmatpush.msrb.mxu1 %v7909_v29  ;;  %4176 = vmatmul.f32.vlgmr.msrb.gmra.mxu0 %v7428_v28  ;;  %v4597_v29 = vsub.f32 %v7944_v59, %v9043_v0  ;;  %9346 = vst [vmem:[#allocation63_spill] sm:$0xff] %v7970_v23  ;;  %v9349_v0 = vand.u32 4294901760, %v7854_v48  ;;  %v1673_v23 = vadd.f32 %v9351_v2, %v1424_v49  ;;  %v9360_v49 = vand.u32 4294901760, %v7531_v1 }
 0x345   : > { %3217 = vmatpush.msrb.mxu2 %v7854_v48  ;;  %4429 = vmatpush.msrb.mxu0 %v7923_v54  ;;  %v9345_v54 = vld [vmem:[#allocation29_spill] sm:$0xff]  ;;  %v1459_v34 = vadd.f32 %v7596_v44, %v1241_v33  ;;  %v6471_v33 = vld [vmem:[%s6937_s12] sm:$0xff] }
 0x346   : > { %4461 = vmatpush.msrb.mxu1 %v7915_v16  ;;  %v4591_v16 = vsub.f32 %v7937_v20, %v9041_v37  ;;  %v1419_v25 = vadd.f32 %v9345_v54, %v1209_v13  ;;  %v4598_v54 = vand.u32 4294901760, %v4597_v29  ;;  %v9350_v13 = vld [vmem:[#allocation101_spill] sm:$0xff]  ;;  %v1876_v48 = vadd.f32 %v7754_v12, %v1673_v23  ;;  %v2082_v29 = vpop.f32.mrf.mxu1  ;;  %v6478_v20 = vld [vmem:[%s6641_s9 + $0x20] sm:$0xff] }
 0x347   : > { %4432 = vmatpush.msrb.mxu0 %v7934_v47  ;;  %v7962_v47 = vpop.f32.mrf.mxu2  ;;  %v1715_v44 = vadd.f32 %v7599_v60, %v1459_v34  ;;  %v9362_v60 = vld [vmem:[#allocation12_spill] sm:$0xff]  ;;  %v268_v58 = vmax.f32 %v6478_v20, 0.0 }
 0x348   : > { %3055 = vmatmul.f32.vlgmr.msrb.gmra.mxu3 %v7397_v15  ;;  %9344 = vst [vmem:[#allocation64_spill] sm:$0xff] %v7962_v47  ;;  %v4592_v37 = vand.u32 4294901760, %v4591_v16  ;;  %v1667_v3 = vadd.f32 %v9350_v13, %v1419_v25  ;;  %v2055_v12 = vadd.f32 %v7745_v36, %v1876_v48  ;;  %v8012_v36 = vsub.f32 %v7531_v1, %v9360_v49 }
 0x349   : > { %3244 = vmatpush.msrb.mxu3 %v7830_v22  ;;  %v1904_v48 = vadd.f32 %v1903_v10, %v1715_v44  ;;  %v264_v44 = vmax.f32 %v6470_v4, 0.0 }
 0x34a   : > { %3032 = vmatmul.f32.gmra.mxu2 %v7417_v40 }
 0x34b   : > { %4219 = vmatmul.f32.gmra.mxu1 %v7417_v40  ;;  %3246 = vmatpush.msrb.mxu3 %v7838_v56  ;;  %v8058_v43 = vadd.f32 %v2082_v29, %v1904_v48  ;;  %v6477_v29 = vld [vmem:[%s6937_s12 + $0x18] sm:$0xff] }
 0x34c   : > { %4184 = vmatmul.f32.gmra.mxu0 %v7446_v7 }
 0x34f   : > { %v7989_v25 = vpop.f32.mrf.mxu2 }
 0x350   : > { %3059 = vmatmul.f32.gmra.mxu3 %v7417_v40  ;;  %9356 = vst [vmem:[#allocation66_spill] sm:$0xff] %v7989_v25 }
 0x352   : > { %3151 = vmatmul.f32.vlgmr.msra.gmra.mxu2 %v7428_v28 }
 0x353   : > { %3277 = vmatpush.msra.mxu2 %v9348_v14  ;;  %4335 = vmatmul.f32.vlgmr.msra.gmra.mxu1 %v7397_v15  ;;  %v9355_v14 = vld [vmem:[#allocation81_spill] sm:$0xff] }
 0x354   : > { %4593 = vmatpush.msra.mxu1 %v4592_v37  ;;  %4308 = vmatmul.f32.vlgmr.msra.gmra.mxu0 %v7397_v15  ;;  %v1245_v16 = vadd.f32 %v9355_v14, %v9354_v6  ;;  %v1872_v37 = vadd.f32 %v7739_v26, %v1667_v3  ;;  %v7998_v26 = vpop.f32.mrf.mxu3  ;;  %v9358_v3 = vld [vmem:[#allocation10_spill] sm:$0xff]  ;;  %v272_v6 = vmul.f32 %v6471_v33, %v6470_v4  ;;  %v8026_v14 = vand.u32 4294901760, %v2055_v12 }
 0x355   : > { %3281 = vmatpush.msra.mxu2 %v9349_v0  ;;  %4554 = vmatpush.msra.mxu0 %v7917_v30  ;;  %9357 = vst [vmem:[#allocation65_spill] sm:$0xff] %v7998_v26  ;;  %6432 = vlog2.f32 %v9358_v3  ;;  %v6472_v3 = vld [vmem:[%s6641_s9 + $0x8] sm:$0xff]  ;;  %v9368_v26 = vld [vmem:[#allocation14_spill] sm:$0xff] }
 0x356   : > { %4599 = vmatpush.msra.mxu1 %v4598_v54  ;;  %v1464_v2 = vadd.f32 %v7607_v31, %v1245_v16  ;;  %v2051_v0 = vadd.f32 %v7722_v5, %v1872_v37  ;;  %v9359_v5 = vld [vmem:[#allocation11_spill] sm:$0xff]  ;;  %v9364_v16 = vld [vmem:[#allocation17_spill] sm:$0xff]  ;;  %v8052_v35 = vsub.f32 %v2055_v12, %v8026_v14  ;;  %v6474_v4 = vld [vmem:[%s6641_s9 + $0x10] sm:$0xff]  ;;  %v280_v47 = vsub.f32 %v264_v44, %v272_v6 }
 0x357   : > { %4556 = vmatpush.msra.mxu0 %v7925_v21  ;;  %6434 = vlog2.f32 %v9359_v5  ;;  %v8030_v37 = vsel %vm320_vm5, %v9364_v16, 0.0  ;;  %v6473_v5 = vld [vmem:[%s6937_s12 + $0x8] sm:$0xff]  ;;  %v8042_v10 = vpop.f32.mrf.mxu2 }
 0x358   : > { %3190 = vmatmul.f32.vlgmr.msra.gmra.mxu3 %v7397_v15  ;;  %v1721_v31 = vadd.f32 %v7610_v55, %v1464_v2  ;;  %v8007_v23 = vand.u32 4294901760, %v2051_v0  ;;  %6436 = vlog2.f32 %v9362_v60  ;;  %v9363_v55 = vld [vmem:[#allocation16_spill] sm:$0xff]  ;;  %v9365_v2 = vld [vmem:[#allocation13_spill] sm:$0xff]  ;;  %v273_v49 = vmul.f32 %v6473_v5, %v6472_v3  ;;  %9367 = vst [vmem:[#allocation29_spill] sm:$0xff] %v8042_v10 }
 0x359   : > { %3306 = vmatpush.msra.mxu3 %v7830_v22  ;;  %v1907_v22 = vpop.f32.mrf.mxu0  ;;  %v8022_v13 = vsel %vm320_vm5, %v9363_v55, 0.0  ;;  %6438 = vlog2.f32 %v9365_v2  ;;  %v2086_v55 = vpop.f32.mrf.mxu1  ;;  %v3371_v2 = vand.u32 4294901760, %v8012_v36 }
 0x35a   : > { %3159 = vmatmul.f32.gmra.mxu2 %v7446_v7  ;;  %v1908_v34 = vadd.f32 %v1907_v22, %v1721_v31  ;;  %v265_v31 = vmax.f32 %v6472_v3, 0.0  ;;  %v8045_v16 = vsub.f32 %v2051_v0, %v8007_v23  ;;  %6440 = vlog2.f32 %v9368_v26  ;;  %v6475_v3 = vld [vmem:[%s6937_s12 + $0x10] sm:$0xff] }
 0x35b   : > { %4339 = vmatmul.f32.gmra.mxu1 %v7417_v40  ;;  %3308 = vmatpush.msra.mxu3 %v7838_v56  ;;  %v9361_v56 = vand.u32 4294901760, %v7537_v63  ;;  %v6433_v22 = vpop.eup %6432  ;;  %v266_v0 = vmax.f32 %v6474_v4, 0.0  ;;  %v274_v10 = vmul.f32 %v6475_v3, %v6474_v4  ;;  %v6476_v4 = vld [vmem:[%s6641_s9 + $0x18] sm:$0xff] }
 0x35c   : > { %4312 = vmatmul.f32.gmra.mxu0 %v7417_v40  ;;  %v8063_v26 = vpop.f32.mrf.mxu3  ;;  %v297_v12 = vmul.f32 0.6931472, %v6433_v22  ;;  %v267_v6 = vmax.f32 %v6476_v4, 0.0  ;;  %v275_v48 = vmul.f32 %v6477_v29, %v6476_v4  ;;  %v6479_v4 = vld [vmem:[%s6937_s12 + $0x20] sm:$0xff] }
 0x35d   : > { %v8017_v54 = vsub.f32 %v7537_v63, %v9361_v56  ;;  %v9366_v56 = vld [vmem:[#allocation44_spill] sm:$0xff]  ;;  %v6435_v25 = vpop.eup %6434  ;;  %9369 = vst [vmem:[#allocation31_spill] sm:$0xff] %v8063_v26  ;;  %v282_v41 = vsub.f32 %v266_v0, %v274_v10  ;;  %v9372_v26 = vld [vmem:[#allocation21_spill] sm:$0xff]  ;;  %v9374_v0 = vld [vmem:[#allocation22_spill] sm:$0xff] }
 0x35e   : > { %v8039_v60 = vsel %vm320_vm5, %v9366_v56, 0.0  ;;  %v6437_v36 = vpop.eup %6436  ;;  %v312_v22 = vadd.f32 %v297_v12, %v280_v47  ;;  %v283_v47 = vsub.f32 %v267_v6, %v275_v48  ;;  %v6481_v12 = vld [vmem:[%s6937_s12 + $0x28] sm:$0xff] }
 0x35f   : > { %v3377_v56 = vand.u32 4294901760, %v8017_v54  ;;  %v8060_v54 = vadd.f32 %v2086_v55, %v1908_v34  ;;  %v281_v34 = vsub.f32 %v265_v31, %v273_v49  ;;  %v299_v55 = vmul.f32 0.6931472, %v6435_v25  ;;  %v6439_v44 = vpop.eup %6438 }
 0x360   : > { %3194 = vmatmul.f32.gmra.mxu3 %v7417_v40  ;;  %v301_v52 = vmul.f32 0.6931472, %v6437_v36  ;;  %v276_v49 = vmul.f32 %v6479_v4, %v6478_v20  ;;  %v6441_v25 = vpop.eup %6440  ;;  %v303_v31 = vmul.f32 0.6931472, %v6439_v44  ;;  %v6480_v36 = vld [vmem:[%s6641_s9 + $0x28] sm:$0xff]  ;;  %v6482_v44 = vld [vmem:[%s6641_s9 + $0x30] sm:$0xff] }
 0x361   : > { %v277_v20 = vmul.f32 %v6481_v12, %v6480_v36  ;;  %v305_v6 = vmul.f32 0.6931472, %v6441_v25 }
 0x362   : > { %3220 = vmatmul.f32.vlgmr.msrb.gmra.mxu2 %v7405_v27  ;;  %v314_v48 = vadd.f32 %v301_v52, %v282_v41  ;;  %v315_v53 = vadd.f32 %v303_v31, %v283_v47  ;;  %v528_v41 = vsel %vm320_vm5, %v6479_v4, 0.0  ;;  %v8096_v47 = vand.u32 4294901760, %v8060_v54 }
 0x363   : > { %3333 = vmatpush.msrb.mxu2 %v7527_v8  ;;  %4465 = vmatmul.f32.vlgmr.msrb.gmra.mxu1 %v7414_v57 }
 0x364   : > { %4717 = vmatpush.msrb.mxu1 %v7917_v30  ;;  %4435 = vmatmul.f32.vlgmr.msrb.gmra.mxu0 %v7405_v27  ;;  %v9370_v30 = vld [vmem:[#allocation15_spill] sm:$0xff] }
 0x365   : > { %3335 = vmatpush.msrb.mxu2 %v7522_v61  ;;  %6442 = vlog2.f32 %v9370_v30  ;;  %4688 = vmatpush.msrb.mxu0 %v9371_v45  ;;  %v9373_v30 = vand.u32 4294901760, %v7944_v59  ;;  %v521_v45 = vsel %vm320_vm5, %v6471_v33, 0.0  ;;  %v2705_v33 = vpop.f32.mrf.mxu2 }
 0x366   : > { %4719 = vmatpush.msrb.mxu1 %v7925_v21  ;;  %6444 = vlog2.f32 %v9372_v26  ;;  %v522_v21 = vsel %vm320_vm5, %v6473_v5, 0.0  ;;  %v524_v5 = vsel %vm320_vm5, %v6475_v3, 0.0  ;;  %v269_v26 = vmax.f32 %v6480_v36, 0.0 }
 0x367   : > { %4692 = vmatpush.msrb.mxu0 %v9373_v30  ;;  %v523_v10 = vadd.f32 %v522_v21, %v521_v45  ;;  %6446 = vlog2.f32 %v9374_v0  ;;  %v313_v30 = vadd.f32 %v299_v55, %v281_v34  ;;  %v284_v21 = vsub.f32 %v268_v58, %v276_v49  ;;  %v6483_v45 = vld [vmem:[%s6937_s12 + $0x30] sm:$0xff]  ;;  %v6485_v49 = vld [vmem:[%s6937_s12 + $0x38] sm:$0xff] }
 0x368   : > { %3250 = vmatmul.f32.vlgmr.msrb.gmra.mxu3 %v7414_v57  ;;  %v270_v3 = vmax.f32 %v6482_v44, 0.0  ;;  %v278_v0 = vmul.f32 %v6483_v45, %v6482_v44  ;;  %v285_v36 = vsub.f32 %v269_v26, %v277_v20  ;;  %v321_v58 = vsel %vm320_vm5, %v312_v22, 0.0 }
 0x369   : > { %3372 = vmatpush.msrb.mxu3 %v3371_v2  ;;  %v525_v51 = vadd.f32 %v524_v5, %v523_v10  ;;  %v526_v2 = vsel %vm320_vm5, %v6477_v29, 0.0  ;;  %v316_v22 = vadd.f32 %v305_v6, %v284_v21 }
 0x36a   : > { %3225 = vmatmul.f32.gmra.mxu2 %v7426_v50  ;;  %v286_v44 = vsub.f32 %v270_v3, %v278_v0 }
 0x36b   : > { %v6443_v59 = vpop.eup %6442  ;;  %4471 = vmatmul.f32.gmra.mxu1 %v7434_v46  ;;  %3378 = vmatpush.msrb.mxu3 %v3377_v56  ;;  %v2744_v34 = vpop.f32.mrf.mxu3  ;;  %v527_v55 = vadd.f32 %v526_v2, %v525_v51  ;;  %v6484_v56 = vld [vmem:[%s6641_s9 + $0x38] sm:$0xff]  ;;  %v8099_v51 = vand.u32 4294901760, %v8058_v43  ;;  %v324_v2 = vsel %vm320_vm5, %v314_v48, 0.0  ;;  %v534_v48 = vsel %vm320_vm5, %v6485_v49, 0.0 }
 0x36c   : > { %v6445_v11 = vpop.eup %6444  ;;  %4440 = vmatmul.f32.gmra.mxu0 %v7426_v50  ;;  %v307_v10 = vmul.f32 0.6931472, %v6443_v59  ;;  %v8090_v52 = vadd.f32 %v2744_v34, %v2705_v33  ;;  %v271_v29 = vmax.f32 %v6484_v56, 0.0  ;;  %v279_v25 = vmul.f32 %v6485_v49, %v6484_v56 }
 0x36d   : > { %v6447_v5 = vpop.eup %6446  ;;  %v529_v31 = vadd.f32 %v528_v41, %v527_v55  ;;  %v309_v24 = vmul.f32 0.6931472, %v6445_v11  ;;  %v530_v59 = vsel %vm320_vm5, %v6481_v12, 0.0  ;;  %v322_v33 = vsel %vm320_vm5, %v313_v30, 0.0 }
 0x36e   : > { %v317_v26 = vadd.f32 %v307_v10, %v285_v36  ;;  %v323_v20 = vadd.f32 %v322_v33, %v321_v58  ;;  %v532_v11 = vsel %vm320_vm5, %v6483_v45, 0.0  ;;  %v287_v3 = vsub.f32 %v271_v29, %v279_v25  ;;  %v9376_v10 = vld [vmem:[#allocation19_spill] sm:$0xff]  ;;  %v9378_v29 = vld [vmem:[#allocation45_spill] sm:$0xff]  ;;  %v9380_v33 = vld [vmem:[#allocation46_spill] sm:$0xff] }
 0x36f   : > { %v531_v4 = vadd.f32 %v530_v59, %v529_v31  ;;  %v311_v0 = vmul.f32 0.6931472, %v6447_v5  ;;  %v326_v12 = vsel %vm320_vm5, %v315_v53, 0.0  ;;  %v8111_v30 = vsub.f32 %v8060_v54, %v8096_v47  ;;  %v9375_v54 = vld [vmem:[#allocation18_spill] sm:$0xff]  ;;  %v9379_v5 = vld [vmem:[#allocation20_spill] sm:$0xff] }
 0x370   : > { %3256 = vmatmul.f32.gmra.mxu3 %v7434_v46  ;;  %v318_v6 = vadd.f32 %v309_v24, %v286_v44  ;;  %v325_v34 = vadd.f32 %v324_v2, %v323_v20  ;;  %v328_v45 = vsel %vm320_vm5, %v316_v22, 0.0  ;;  %v547_v53 = vadd.f32 %v8030_v37, %v8022_v13  ;;  %v9381_v20 = vld [vmem:[#allocation23_spill] sm:$0xff] }
 0x371   : > { %v533_v21 = vadd.f32 %v532_v11, %v531_v4  ;;  %v548_v55 = vsel %vm320_vm5, %v9375_v54, 0.0  ;;  %v550_v58 = vsel %vm320_vm5, %v9376_v10, 0.0  ;;  %v319_v56 = vadd.f32 %v311_v0, %v287_v3 }
 0x372   : > { %3283 = vmatmul.f32.vlgmr.msra.gmra.mxu2 %v7397_v15  ;;  %v327_v36 = vadd.f32 %v326_v12, %v325_v34  ;;  %v330_v13 = vsel %vm320_vm5, %v317_v26, 0.0  ;;  %v549_v37 = vadd.f32 %v548_v55, %v547_v53  ;;  %v504_v49 = vsel %vm320_vm5, %v9378_v29, 0.0 }
 0x373   : > { %3404 = vmatpush.msra.mxu2 %v7531_v1  ;;  %4601 = vmatmul.f32.vlgmr.msra.gmra.mxu1 %v7397_v15  ;;  %v8116_v1 = vpop.f32.mrf.mxu2  ;;  %v535_v24 = vadd.f32 %v534_v48, %v533_v21  ;;  %v552_v31 = vsel %vm320_vm5, %v9379_v5, 0.0  ;;  %v332_v59 = vsel %vm320_vm5, %v318_v6, 0.0  ;;  %v506_v4 = vsel %vm320_vm5, %v9380_v33, 0.0  ;;  %v8152_v0 = vpop.f32.mrf.mxu3  ;;  %v9382_v21 = vld [vmem:[#allocation24_spill] sm:$0xff] }
 0x374   : > { %4847 = vmatpush.msra.mxu1 %v8026_v14  ;;  %4562 = vmatmul.f32.vlgmr.msra.gmra.mxu0 %v7428_v28  ;;  %v329_v25 = vadd.f32 %v328_v45, %v327_v36  ;;  %v551_v22 = vadd.f32 %v550_v58, %v549_v37  ;;  %v554_v2 = vsel %vm320_vm5, %v9381_v20, 0.0  ;;  %v4974_v11 = vand.u32 4294901760, %v8111_v30  ;;  %v8156_v48 = vpop.f32.mrf.mxu1  ;;  %v9385_v37 = vld [vmem:[#allocation50_spill] sm:$0xff] }
 0x375   : > { %3407 = vmatpush.msra.mxu2 %v7537_v63  ;;  %v9377_v63 = vld [vmem:[#allocation43_spill] sm:$0xff]  ;;  %4817 = vmatpush.msra.mxu0 %v8052_v35  ;;  %v556_v6 = vsel %vm320_vm5, %v9382_v21, 0.0  ;;  %v510_v29 = vsel %vm320_vm5, %v9385_v37, 0.0  ;;  %v3571_v5 = vand.u32 4294901760, %v7643_v42 }
 0x376   : > { %v503_v41 = vadd.f32 %v8039_v60, %v9377_v63  ;;  %4849 = vmatpush.msra.mxu1 %v8007_v23  ;;  %536 = vadd.xlane.f32.xlu1 %v535_v24  ;;  %v8138_v60 = vsub.f32 %v8058_v43, %v8099_v51  ;;  %v331_v26 = vadd.f32 %v330_v13, %v329_v25  ;;  %v334_v43 = vsel %vm320_vm5, %v319_v56, 0.0  ;;  %v9384_v24 = vld [vmem:[#allocation25_spill] sm:$0xff] }
 0x377   : > { %4820 = vmatpush.msra.mxu0 %v8045_v16  ;;  %v553_v3 = vadd.f32 %v552_v31, %v551_v22  ;;  %v558_v36 = vsel %vm320_vm5, %v9384_v24, 0.0  ;;  %v4975_v10 = vsub.f32 %v8111_v30, %v4974_v11  ;;  %v9388_v24 = vld [vmem:[#allocation109_spill] sm:$0xff] }
 0x378   : > { %v505_v44 = vadd.f32 %v504_v49, %v503_v41  ;;  %3310 = vmatmul.f32.vlgmr.msra.gmra.mxu3 %v7397_v15  ;;  %v333_v12 = vadd.f32 %v332_v59, %v331_v26  ;;  %v4980_v45 = vand.u32 4294901760, %v8138_v60  ;;  %v3565_v41 = vand.u32 4294901760, %v7633_v9  ;;  %v8176_v49 = vpop.f32.mrf.mxu0 }
 0x379   : > { %3434 = vmatpush.msra.mxu3 %v7527_v8  ;;  %v555_v53 = vadd.f32 %v554_v2, %v553_v3  ;;  %v9383_v8 = vld [vmem:[#allocation47_spill] sm:$0xff]  ;;  %v4976_v25 = vand.u32 4294901760, %v4975_v10  ;;  %v9392_v10 = vld [vmem:[#allocation34_spill] sm:$0xff] }
 0x37a   : > { %3287 = vmatmul.f32.gmra.mxu2 %v7417_v40  ;;  %v507_v34 = vadd.f32 %v506_v4, %v505_v44  ;;  %v508_v54 = vsel %vm320_vm5, %v9383_v8, 0.0  ;;  %v335_v55 = vadd.f32 %v334_v43, %v333_v12  ;;  %v4981_v56 = vsub.f32 %v8138_v60, %v4980_v45 }
 0x37b   : > { %4605 = vmatmul.f32.gmra.mxu1 %v7417_v40  ;;  %3436 = vmatpush.msra.mxu3 %v7522_v61  ;;  %v8168_v58 = vpop.f32.mrf.mxu2  ;;  %v557_v63 = vadd.f32 %v556_v6, %v555_v53  ;;  %v3566_v59 = vsub.f32 %v7633_v9, %v3565_v41  ;;  %v8184_v22 = vpop.f32.mrf.mxu3  ;;  %v3572_v4 = vsub.f32 %v7643_v42, %v3571_v5 }
 0x37c   : > { %4570 = vmatmul.f32.gmra.mxu0 %v7446_v7  ;;  %336 = vadd.xlane.f32.xlu0 %v335_v55  ;;  %v509_v61 = vadd.f32 %v508_v54, %v507_v34  ;;  %v4982_v44 = vand.u32 4294901760, %v4981_v56  ;;  %v8186_v33 = vpop.f32.mrf.mxu1  ;;  %v2357_v34 = vadd.f32 %v7759_v38, %v7752_v39  ;;  %v2167_v53 = vadd.f32 %v7664_v32, %v7660_v62  ;;  %v9387_v55 = vld [vmem:[#allocation107_spill] sm:$0xff]  ;;  %v9390_v38 = vld [vmem:[#allocation52_spill] sm:$0xff]  ;;  %v9391_v62 = vld [vmem:[#allocation49_spill] sm:$0xff] }
 0x37d   : > { %v559_v13 = vadd.f32 %v558_v36, %v557_v63  ;;  %v3567_v26 = vand.u32 4294901760, %v3566_v59  ;;  %v3573_v9 = vand.u32 4294901760, %v3572_v4  ;;  %v2171_v36 = vadd.f32 %v9388_v24, %v9387_v55  ;;  %v9396_v56 = vld [vmem:[#allocation48_spill] sm:$0xff]  ;;  %v9408_v24 = vld [vmem:[#allocation37_spill] sm:$0xff] }
 0x37e   : > { %v511_v31 = vadd.f32 %v510_v29, %v509_v61  ;;  %v2553_v32 = vadd.f32 %v9391_v62, %v9390_v38  ;;  %v8241_v63 = vand.u32 4294901760, %v9392_v10  ;;  %v9403_v59 = vld [vmem:[#allocation96_spill] sm:$0xff] }
 0x37f   : > { %560 = vadd.xlane.f32.xlu1 %v559_v13  ;;  %v9397_v13 = vld [vmem:[#allocation86_spill] sm:$0xff]  ;;  %v2202_v4 = vadd.f32 %v9403_v59, %v2171_v36  ;;  %v9409_v36 = vld [vmem:[#allocation57_spill] sm:$0xff]  ;;  %v9417_v59 = vld [vmem:[#allocation123_spill] sm:$0xff] }
 0x380   : > { %3314 = vmatmul.f32.gmra.mxu3 %v7417_v40  ;;  %v8196_v2 = vpop.f32.mrf.mxu0  ;;  %9393 = vst [vmem:[#allocation101_spill] sm:$0xff] %v8241_v63  ;;  %v2557_v37 = vadd.f32 %v9397_v13, %v9396_v56  ;;  %v8265_v55 = vsub.f32 %v9392_v10, %v8241_v63  ;;  %v9415_v13 = vld [vmem:[#allocation97_spill] sm:$0xff] }
 0x382   : > { %3341 = vmatmul.f32.vlgmr.msrb.gmra.mxu2 %v7428_v28  ;;  %9407 = vst [vmem:[#allocation84_spill] sm:$0xff] %v8265_v55 }
 0x383   : > { %3529 = vmatpush.msrb.mxu2 %v7627_v18  ;;  %4721 = vmatmul.f32.vlgmr.msrb.gmra.mxu1 %v7397_v15  ;;  %v8191_v20 = vpop.f32.mrf.mxu2  ;;  %v8201_v43 = vpop.f32.mrf.mxu3 }
 0x384   : > { %4977 = vmatpush.msrb.mxu1 %v4976_v25  ;;  %4694 = vmatmul.f32.vlgmr.msrb.gmra.mxu0 %v7397_v15  ;;  %v8199_v42 = vpop.f32.mrf.mxu1  ;;  %v9399_v25 = vld [vmem:[#allocation32_spill] sm:$0xff] }
 0x385   : > { %3531 = vmatpush.msrb.mxu2 %v7630_v17  ;;  %4938 = vmatpush.msrb.mxu0 %v8096_v47 }
 0x386   : > { %4983 = vmatpush.msrb.mxu1 %v4982_v44  ;;  %512 = vadd.xlane.f32.xlu0 %v511_v31  ;;  %v9401_v31 = vld [vmem:[#allocation42_spill] sm:$0xff] }
 0x387   : > { %4940 = vmatpush.msrb.mxu0 %v8099_v51  ;;  %v8253_v44 = vand.u32 4294901760, %v9401_v31 }
 0x388   : > { %3380 = vmatmul.f32.vlgmr.msrb.gmra.mxu3 %v7397_v15  ;;  %v8209_v12 = vpop.f32.mrf.mxu0 }
 0x389   : > { %3568 = vmatpush.msrb.mxu3 %v3567_v26  ;;  %9402 = vst [vmem:[#allocation79_spill] sm:$0xff] %v8253_v44  ;;  %v9404_v26 = vld [vmem:[#allocation114_spill] sm:$0xff] }
 0x38a   : > { %3349 = vmatmul.f32.gmra.mxu2 %v7446_v7 }
 0x38b   : > { %4725 = vmatmul.f32.gmra.mxu1 %v7417_v40  ;;  %3574 = vmatpush.msrb.mxu3 %v3573_v9  ;;  %v8205_v3 = vpop.f32.mrf.mxu2  ;;  %v8219_v6 = vpop.f32.mrf.mxu3 }
 0x38c   : > { %4698 = vmatmul.f32.gmra.mxu0 %v7417_v40  ;;  %v8215_v21 = vpop.f32.mrf.mxu1 }
 0x390   : > { %3384 = vmatmul.f32.gmra.mxu3 %v7417_v40  ;;  %v8232_v54 = vpop.f32.mrf.mxu0 }
 0x392   : > { %3410 = vmatmul.f32.vlgmr.msra.gmra.mxu2 %v7405_v27 }
 0x393   : > { %3663 = vmatpush.msra.mxu2 %v3565_v41  ;;  %4853 = vmatmul.f32.vlgmr.msra.gmra.mxu1 %v7414_v57  ;;  %v8230_v8 = vpop.f32.mrf.mxu2  ;;  %v2868_v62 = vpop.f32.mrf.mxu3 }
 0x394   : > { %5101 = vmatpush.msra.mxu1 %v8096_v47  ;;  %4823 = vmatmul.f32.vlgmr.msra.gmra.mxu0 %v7405_v27  ;;  %v8247_v29 = vpop.f32.mrf.mxu1 }
 0x395   : > { %3667 = vmatpush.msra.mxu2 %v3571_v5  ;;  %5072 = vmatpush.msra.mxu0 %v4974_v11  ;;  %v9386_v11 = vld [vmem:[#allocation113_spill] sm:$0xff]  ;;  %9398 = vst [vmem:[#allocation36_spill] sm:$0xff] %v8247_v29  ;;  %v8250_v5 = vand.u32 4294901760, %v9399_v25 }
 0x396   : > { %5103 = vmatpush.msra.mxu1 %v8099_v51 }
 0x397   : > { %5076 = vmatpush.msra.mxu0 %v4980_v45  ;;  %v2361_v45 = vadd.f32 %v9386_v11, %v7770_v19  ;;  %v9394_v19 = vld [vmem:[#allocation58_spill] sm:$0xff]  ;;  %9400 = vst [vmem:[#allocation80_spill] sm:$0xff] %v8250_v5  ;;  %v2749_v11 = vadd.f32 %v8152_v0, %v8116_v1  ;;  %v2775_v1 = vadd.f32 %v8168_v58, %v8090_v52  ;;  %v9416_v52 = vld [vmem:[#allocation76_spill] sm:$0xff] }
 0x398   : > { %3440 = vmatmul.f32.vlgmr.msra.gmra.mxu3 %v7414_v57  ;;  %v2197_v61 = vadd.f32 %v9394_v19, %v2167_v53  ;;  %v9412_v0 = vld [vmem:[#allocation62_spill] sm:$0xff]  ;;  %v8280_v56 = vpop.f32.mrf.mxu0 }
 0x399   : > { %3692 = vmatpush.msra.mxu3 %v7627_v18  ;;  %v9389_v18 = vld [vmem:[#allocation71_spill] sm:$0xff]  ;;  %9413 = vst [vmem:[#allocation81_spill] sm:$0xff] %v8280_v56 }
 0x39a   : > { %3415 = vmatmul.f32.gmra.mxu2 %v7426_v50  ;;  %v2387_v39 = vadd.f32 %v9389_v18, %v2357_v34  ;;  %v9405_v34 = vld [vmem:[#allocation120_spill] sm:$0xff]  ;;  %v8268_v18 = vand.u32 4294901760, %v9408_v24  ;;  %v2227_v38 = vadd.f32 %v9409_v36, %v2197_v61  ;;  %v8284_v61 = vsub.f32 %v9399_v25, %v8250_v5  ;;  %v9419_v36 = vld [vmem:[#allocation98_spill] sm:$0xff] }
 0x39b   : > { %4859 = vmatmul.f32.gmra.mxu1 %v7434_v46  ;;  %3694 = vmatpush.msra.mxu3 %v7630_v17  ;;  %v9395_v17 = vld [vmem:[#allocation74_spill] sm:$0xff]  ;;  %v2583_v53 = vadd.f32 %v9405_v34, %v2553_v32  ;;  %v9411_v32 = vld [vmem:[#allocation64_spill] sm:$0xff]  ;;  %v2780_v34 = vadd.f32 %v8191_v20, %v2749_v11 }
 0x39c   : > { %4828 = vmatmul.f32.gmra.mxu0 %v7426_v50  ;;  %v2392_v41 = vadd.f32 %v9395_v17, %v2361_v45  ;;  %v2417_v9 = vadd.f32 %v9404_v26, %v2387_v39  ;;  %v9406_v45 = vld [vmem:[#allocation26_spill] sm:$0xff]  ;;  %v9410_v39 = vld [vmem:[#allocation73_spill] sm:$0xff]  ;;  %v2588_v17 = vadd.f32 %v9411_v32, %v2557_v37  ;;  %9414 = vst [vmem:[#allocation10_spill] sm:$0xff] %v8284_v61 }
 0x39d   : > { %v2233_v37 = vadd.f32 %v9415_v13, %v2202_v4  ;;  %v2613_v26 = vadd.f32 %v9417_v59, %v2583_v53  ;;  %v8299_v25 = vsub.f32 %v9408_v24, %v8268_v18  ;;  %v9421_v53 = vld [vmem:[#allocation100_spill] sm:$0xff]  ;;  %v8310_v24 = vpop.f32.mrf.mxu1 }
 0x39e   : > { %v2423_v19 = vadd.f32 %v9410_v39, %v2392_v41  ;;  %v8288_v41 = vsub.f32 %v9401_v31, %v8253_v44  ;;  %v2450_v58 = vadd.f32 %v9416_v52, %v2417_v9  ;;  %v9418_v31 = vld [vmem:[#allocation60_spill] sm:$0xff]  ;;  %v9420_v39 = vld [vmem:[#allocation63_spill] sm:$0xff]  ;;  %v2805_v9 = vadd.f32 %v8184_v22, %v2775_v1  ;;  %9422 = vst [vmem:[#allocation11_spill] sm:$0xff] %v8310_v24  ;;  %v9425_v1 = vld [vmem:[#allocation61_spill] sm:$0xff] }
 0x39f   : > { %v2619_v32 = vadd.f32 %v9420_v39, %v2588_v17  ;;  %v2264_v11 = vadd.f32 %v9421_v53, %v2233_v37  ;;  %v2811_v17 = vadd.f32 %v8201_v43, %v2780_v34  ;;  %v9426_v52 = vld [vmem:[#allocation59_spill] sm:$0xff]  ;;  %v9052_v37 = vand.u32 4294901760, %v8299_v25 }
 0x3a0   : > { %3446 = vmatmul.f32.gmra.mxu3 %v7434_v46  ;;  %v2454_v4 = vadd.f32 %v9419_v36, %v2423_v19  ;;  %v9053_v20 = vand.u32 4294901760, %v8288_v41  ;;  %v9424_v19 = vld [vmem:[#allocation66_spill] sm:$0xff]  ;;  %v2838_v22 = vadd.f32 %v8205_v3, %v2805_v9  ;;  %v9429_v34 = vld [vmem:[#allocation99_spill] sm:$0xff] }
 0x3a1   : > { %v2646_v13 = vadd.f32 %v9424_v19, %v2613_v26  ;;  %v2842_v43 = vadd.f32 %v8230_v8, %v2811_v17  ;;  %v9431_v53 = vld [vmem:[#allocation27_spill] sm:$0xff]  ;;  %v9432_v8 = vld [vmem:[#allocation65_spill] sm:$0xff] }
 0x3a2   : > { %3537 = vmatmul.f32.vlgmr.msrb.gmra.mxu2 %v7428_v28  ;;  %v2865_v26 = vadd.f32 %v8219_v6, %v2838_v22  ;;  %v5426_v22 = vsub.f32 %v8299_v25, %v9052_v37  ;;  %v9436_v37 = vld [vmem:[#allocation51_spill] sm:$0xff] }
 0x3a3   : > { %3792 = vmatpush.msrb.mxu2 %v9406_v45  ;;  %4985 = vmatmul.f32.vlgmr.msrb.gmra.mxu1 %v7397_v15  ;;  %v8278_v10 = vpop.f32.mrf.mxu2  ;;  %v2260_v45 = vadd.f32 %v9418_v31, %v2227_v38  ;;  %v9427_v31 = vld [vmem:[#allocation95_spill] sm:$0xff]  ;;  %v2869_v19 = vadd.f32 %v2868_v62, %v2842_v43 }
 0x3a4   : > { %5294 = vmatpush.msrb.mxu1 %v8241_v63  ;;  %4946 = vmatmul.f32.vlgmr.msrb.gmra.mxu0 %v7428_v28  ;;  %v8325_v36 = vadd.f32 %v9427_v31, %v2454_v4  ;;  %v8339_v4 = vpop.f32.mrf.mxu0  ;;  %v9448_v63 = vld [vmem:[#allocation67_spill] sm:$0xff] }
 0x3a5   : > { %3795 = vmatpush.msrb.mxu2 %v9412_v0  ;;  %5264 = vmatpush.msrb.mxu0 %v8265_v55  ;;  %v9423_v0 = vld [vmem:[#allocation78_spill] sm:$0xff]  ;;  %v8320_v59 = vadd.f32 %v9426_v52, %v2260_v45  ;;  %v5420_v45 = vsub.f32 %v8288_v41, %v9053_v20  ;;  %9430 = vst [vmem:[#allocation12_spill] sm:$0xff] %v8339_v4  ;;  %v3955_v20 = vand.u32 4294901760, %v9436_v37  ;;  %v3769_v24 = vpop.f32.mrf.mxu1 }
 0x3a6   : > { %5296 = vmatpush.msrb.mxu1 %v8250_v5  ;;  %v8313_v38 = vadd.f32 %v9423_v0, %v2450_v58  ;;  %v9428_v58 = vld [vmem:[#allocation29_spill] sm:$0xff]  ;;  %v2673_v0 = vadd.f32 %v9432_v8, %v2646_v13  ;;  %v2486_v31 = vmul.f32 %v8325_v36, %v8325_v36  ;;  %v9435_v8 = vld [vmem:[#allocation115_spill] sm:$0xff] }
 0x3a7   : > { %5267 = vmatpush.msrb.mxu0 %v8284_v61  ;;  %v2650_v39 = vadd.f32 %v9428_v58, %v2619_v32  ;;  %v8342_v32 = vadd.f32 %v9431_v53, %v2264_v11  ;;  %v2483_v17 = vmul.f32 %v8320_v59, %v8320_v59  ;;  %v9434_v11 = vld [vmem:[#allocation31_spill] sm:$0xff]  ;;  %v5421_v62 = vand.u32 4294901760, %v5420_v45 }
 0x3a8   : > { %3576 = vmatmul.f32.vlgmr.msrb.gmra.mxu3 %v7397_v15  ;;  %v2485_v6 = vmul.f32 %v8313_v38, %v8313_v38  ;;  %v2872_v53 = vsub.f32 %v2869_v19, %v2486_v31 }
 0x3a9   : > { %3822 = vmatpush.msrb.mxu3 %v9425_v1  ;;  %v9433_v1 = vld [vmem:[#allocation117_spill] sm:$0xff]  ;;  %v2677_v58 = vadd.f32 %v9434_v11, %v2650_v39  ;;  %v2484_v13 = vmul.f32 %v8342_v32, %v8342_v32  ;;  %v2679_v43 = vsub.f32 %v2673_v0, %v2483_v17  ;;  %v5427_v11 = vand.u32 4294901760, %v5426_v22 }
 0x3aa   : > { %3545 = vmatmul.f32.gmra.mxu2 %v7446_v7  ;;  %v3949_v52 = vand.u32 4294901760, %v9433_v1  ;;  %v3075_v0 = vadd.f32 %v2485_v6, %v2483_v17 }
 0x3ab   : > { %4989 = vmatmul.f32.gmra.mxu1 %v7417_v40  ;;  %3824 = vmatpush.msrb.mxu3 %v9429_v34  ;;  %v8331_v3 = vpop.f32.mrf.mxu3  ;;  %v8333_v9 = vpop.f32.mrf.mxu2  ;;  %v2871_v34 = vsub.f32 %v2865_v26, %v2485_v6  ;;  %v2680_v4 = vsub.f32 %v2677_v58, %v2484_v13  ;;  %v9437_v26 = vld [vmem:[#allocation116_spill] sm:$0xff]  ;;  %v3956_v58 = vsub.f32 %v9436_v37, %v3955_v20 }
 0x3ac   : > { %4954 = vmatmul.f32.gmra.mxu0 %v7446_v7  ;;  %v3950_v45 = vsub.f32 %v9433_v1, %v3949_v52  ;;  %v3730_v19 = vpop.f32.mrf.mxu0  ;;  %v3077_v6 = vadd.f32 0.0001, %v3075_v0  ;;  %v9442_v0 = vld [vmem:[#allocation55_spill] sm:$0xff] }
 0x3ad   : > { %v3079_v39 = vadd.f32 %v2871_v34, %v2679_v43  ;;  %v3080_v5 = vadd.f32 %v2872_v53, %v2680_v4  ;;  %v8370_v34 = vadd.f32 %v3769_v24, %v3730_v19  ;;  %v3957_v4 = vand.u32 4294901760, %v3956_v58  ;;  %v9441_v19 = vld [vmem:[#allocation56_spill] sm:$0xff]  ;;  %v9444_v58 = vld [vmem:[#allocation69_spill] sm:$0xff] }
 0x3ae   : > { %v3951_v22 = vand.u32 4294901760, %v3950_v45 }
 0x3af   : > { %9438 = vst [vmem:[#allocation16_spill] sm:$0xff] %v8370_v34  ;;  %v3081_v43 = vadd.f32 0.0009, %v3079_v39  ;;  %v3082_v17 = vadd.f32 0.0009, %v3080_v5  ;;  %v1189_v5 = vadd.f32 %v9442_v0, %v9441_v19  ;;  %v9449_v0 = vld [vmem:[#allocation35_spill] sm:$0xff] }
 0x3b0   : > { %3580 = vmatmul.f32.gmra.mxu3 %v7417_v40 }
 0x3b1   : > { %v8376_v53 = vmul.f32 %v3081_v43, %v3077_v6  ;;  %v9445_v43 = vld [vmem:[#allocation91_spill] sm:$0xff] }
 0x3b2   : > { %3669 = vmatmul.f32.vlgmr.msra.gmra.mxu2 %v7397_v15 }
 0x3b3   : > { %3913 = vmatpush.msra.mxu2 %v9435_v8  ;;  %5105 = vmatmul.f32.vlgmr.msra.gmra.mxu1 %v7397_v15  ;;  %v8364_v29 = vpop.f32.mrf.mxu3  ;;  %6448 = vrcp.f32 %v8376_v53  ;;  %vm3090_vm12 = vweird.f32 %v8376_v53 }
 0x3b4   : > { %5422 = vmatpush.msra.mxu1 %v5421_v62  ;;  %v2966_v56 = vpop.f32.mrf.mxu2  ;;  %5078 = vmatmul.f32.vlgmr.msra.gmra.mxu0 %v7397_v15  ;;  %v3076_v62 = vadd.f32 %v2486_v31, %v2484_v13  ;;  %v9439_v31 = vld [vmem:[#allocation54_spill] sm:$0xff]  ;;  %v9440_v13 = vld [vmem:[#allocation53_spill] sm:$0xff]  ;;  %v3738_v45 = vpop.f32.mrf.mxu0 }
 0x3b5   : > { %3915 = vmatpush.msra.mxu2 %v9437_v26  ;;  %5383 = vmatpush.msra.mxu0 %v8253_v44  ;;  %v1185_v39 = vadd.f32 %v9440_v13, %v9439_v31  ;;  %v9447_v13 = vld [vmem:[#allocation68_spill] sm:$0xff] }
 0x3b6   : > { %5428 = vmatpush.msra.mxu1 %v5427_v11  ;;  %v3078_v1 = vadd.f32 0.0001, %v3076_v62  ;;  %v3773_v11 = vpop.f32.mrf.mxu1  ;;  %v1217_v19 = vadd.f32 %v9448_v63, %v9447_v13  ;;  %v9455_v13 = vld [vmem:[#allocation105_spill] sm:$0xff] }
 0x3b7   : > { %5385 = vmatpush.msra.mxu0 %v8268_v18  ;;  %v8387_v62 = vadd.f32 %v3773_v11, %v3738_v45  ;;  %v1389_v6 = vadd.f32 %v9445_v43, %v1185_v39  ;;  %v9450_v39 = vld [vmem:[#allocation92_spill] sm:$0xff]  ;;  %v2937_v45 = vadd.f32 %v8331_v3, %v8278_v10 }
 0x3b8   : > { %3696 = vmatmul.f32.vlgmr.msra.gmra.mxu3 %v7397_v15  ;;  %v8385_v61 = vmul.f32 %v3082_v17, %v3078_v1  ;;  %v9456_v3 = vld [vmem:[#allocation108_spill] sm:$0xff] }
 0x3b9   : > { %3952 = vmatpush.msra.mxu3 %v3951_v22  ;;  %v9443_v22 = vld [vmem:[#allocation70_spill] sm:$0xff]  ;;  %v1631_v11 = vadd.f32 %v9450_v39, %v1389_v6  ;;  %v8404_v63 = vpop.eup %6448  ;;  %v9457_v39 = vld [vmem:[#allocation72_spill] sm:$0xff] }
 0x3ba   : > { %3673 = vmatmul.f32.gmra.mxu2 %v7417_v40  ;;  %v1221_v34 = vadd.f32 %v9444_v58, %v9443_v22  ;;  %6450 = vrcp.f32 %v8385_v61  ;;  %v9452_v22 = vld [vmem:[#allocation33_spill] sm:$0xff]  ;;  %v9453_v58 = vld [vmem:[#allocation40_spill] sm:$0xff]  ;;  %vm3091_vm11 = vweird.f32 %v8404_v63  ;;  %vm3105_vm15 = vweird.f32 %v8385_v61 }
 0x3bb   : > { %5109 = vmatmul.f32.gmra.mxu1 %v7417_v40  ;;  %3958 = vmatpush.msra.mxu3 %v3957_v4  ;;  %v2996_v24 = vpop.f32.mrf.mxu3  ;;  %v9446_v4 = vld [vmem:[#allocation93_spill] sm:$0xff]  ;;  %v1848_v10 = vadd.f32 %v9455_v13, %v1631_v11  ;;  %vm8480_vm14 = vmor %vm3090_vm12, %vm3091_vm11 }
 0x3bc   : > { %5082 = vmatmul.f32.gmra.mxu0 %v7417_v40  ;;  %v1394_v31 = vadd.f32 %v9446_v4, %v1189_v5  ;;  %v1434_v55 = vadd.f32 %v9449_v0, %v1221_v34  ;;  %v9451_v34 = vld [vmem:[#allocation94_spill] sm:$0xff]  ;;  %v9454_v4 = vand.u32 4294901760, %v8288_v41 }
 0x3bd   : > { %v2971_v37 = vpop.f32.mrf.mxu2 }
 0x3be   : > { %v1637_v5 = vadd.f32 %v9451_v34, %v1394_v31  ;;  %v1685_v43 = vadd.f32 %v9453_v58, %v1434_v55  ;;  %v9458_v31 = vand.u32 4294901760, %v8299_v25  ;;  %v3086_v55 = vmul.f32 %v8404_v63, %v8376_v53 }
 0x3c0   : > { %3700 = vmatmul.f32.gmra.mxu3 %v7417_v40  ;;  %v8412_v6 = vpop.eup %6450  ;;  %v1852_v0 = vadd.f32 %v9456_v3, %v1637_v5  ;;  %v9460_v5 = vld [vmem:[#allocation104_spill] sm:$0xff] }
 0x3c1   : > { %v3101_v34 = vmul.f32 %v8412_v6, %v8385_v61  ;;  %vm3106_vm13 = vweird.f32 %v8412_v6 }
 0x3c2   : > { %3798 = vmatmul.f32.vlgmr.msrb.gmra.mxu2 %v7405_v27  ;;  %vm8498_vm0 = vmor %vm3105_vm15, %vm3106_vm13 }
 0x3c3   : > { %4047 = vmatpush.msrb.mxu2 %v3949_v52  ;;  %5300 = vmatmul.f32.vlgmr.msrb.gmra.mxu1 %v7414_v57  ;;  %v3002_v17 = vpop.f32.mrf.mxu3  ;;  %v1429_v52 = vadd.f32 %v9452_v22, %v1217_v19  ;;  %v2027_v22 = vadd.f32 %v9460_v5, %v1848_v10  ;;  %v3087_v10 = vsub.f32 1.0, %v3086_v55 }
 0x3c4   : > { %5546 = vmatpush.msrb.mxu1 %v8253_v44  ;;  %5270 = vmatmul.f32.vlgmr.msrb.gmra.mxu0 %v7405_v27  ;;  %v1884_v44 = vadd.f32 %v9457_v39, %v1685_v43  ;;  %v9462_v43 = vld [vmem:[#allocation111_spill] sm:$0xff] }
 0x3c5   : > { %4051 = vmatpush.msrb.mxu2 %v3955_v20  ;;  %v3029_v1 = vpop.f32.mrf.mxu2  ;;  %5517 = vmatpush.msrb.mxu0 %v9454_v4  ;;  %v2967_v20 = vadd.f32 %v2966_v56, %v2937_v45  ;;  %v9459_v56 = vld [vmem:[#allocation38_spill] sm:$0xff] }
 0x3c6   : > { %5548 = vmatpush.msrb.mxu1 %v8268_v18  ;;  %v1679_v45 = vadd.f32 %v9459_v56, %v1429_v52  ;;  %v8438_v56 = vand.u32 4294901760, %v2027_v22 }
 0x3c7   : > { %5521 = vmatpush.msrb.mxu0 %v9458_v31  ;;  %v2997_v19 = vadd.f32 %v2996_v24, %v2967_v20  ;;  %v9461_v24 = vld [vmem:[#allocation106_spill] sm:$0xff]  ;;  %v9463_v20 = vld [vmem:[#allocation112_spill] sm:$0xff] }
 0x3c8   : > { %3828 = vmatmul.f32.vlgmr.msrb.gmra.mxu3 %v7414_v57  ;;  %v2031_v58 = vadd.f32 %v9461_v24, %v1852_v0  ;;  %v1880_v4 = vadd.f32 %v9462_v43, %v1679_v45  ;;  %v2063_v13 = vadd.f32 %v9463_v20, %v1884_v44  ;;  %9464 = vst [vmem:[#allocation17_spill] sm:$0xff] %v8438_v56 }
 0x3c9   : > { %4076 = vmatpush.msrb.mxu3 %v9435_v8  ;;  %v3030_v11 = vadd.f32 %v3029_v1, %v2997_v19  ;;  %v2487_v8 = vmul.f32 %v8313_v38, %v8320_v59  ;;  %v2941_v1 = vadd.f32 %v8364_v29, %v8333_v9  ;;  %v3102_v19 = vsub.f32 1.0, %v3101_v34 }
 0x3ca   : > { %3803 = vmatmul.f32.gmra.mxu2 %v7426_v50  ;;  %v8440_v44 = vand.u32 4294901760, %v2031_v58  ;;  %v8443_v5 = vand.u32 4294901760, %v2063_v13  ;;  %v3088_v29 = vmul.f32 %v8404_v63, %v3087_v10  ;;  %v2488_v9 = vmul.f32 %v8325_v36, %v8342_v32  ;;  %v9472_v36 = vld [vmem:[#allocation28_spill] sm:$0xff] }
 0x3cb   : > { %5306 = vmatmul.f32.gmra.mxu1 %v7434_v46  ;;  %4078 = vmatpush.msrb.mxu3 %v9437_v26  ;;  %v3056_v3 = vpop.f32.mrf.mxu3  ;;  %v2972_v31 = vadd.f32 %v2971_v37, %v2941_v1  ;;  %v9466_v26 = vld [vmem:[#allocation110_spill] sm:$0xff]  ;;  %v3065_v59 = vmul.f32 2.0, %v2487_v8 }
 0x3cc   : > { %5275 = vmatmul.f32.gmra.mxu0 %v7426_v50  ;;  %v3057_v39 = vadd.f32 %v3056_v3, %v3030_v11  ;;  %9465 = vst [vmem:[#allocation13_spill] sm:$0xff] %v8440_v44  ;;  %v2059_v45 = vadd.f32 %v9466_v26, %v1880_v4  ;;  %v9468_v37 = vld [vmem:[#allocation30_spill] sm:$0xff]  ;;  %v3103_v11 = vmul.f32 %v8412_v6, %v3102_v19  ;;  %v3111_v19 = vand.u32 2147483648, %v8385_v61 }
 0x3cd   : > { %v3033_v52 = vpop.f32.mrf.mxu2  ;;  %9467 = vst [vmem:[#allocation44_spill] sm:$0xff] %v8443_v5  ;;  %v3003_v24 = vadd.f32 %v3002_v17, %v2972_v31  ;;  %v8454_v17 = vsub.f32 %v2027_v22, %v8438_v56  ;;  %v8457_v34 = vsub.f32 %v2031_v58, %v8440_v44  ;;  %v8462_v4 = vsub.f32 %v2063_v13, %v8443_v5 }
 0x3ce   : > { %v3063_v0 = vsub.f32 %v3057_v39, %v2487_v8  ;;  %v8459_v43 = vand.u32 4294901760, %v2059_v45  ;;  %v3089_v22 = vadd.f32 %v8404_v63, %v3088_v29  ;;  %v3067_v58 = vadd.f32 0.0001, %v3065_v59  ;;  %v9476_v59 = vld [vmem:[#allocation75_spill] sm:$0xff] }
 0x3cf   : > { %v3034_v55 = vadd.f32 %v3033_v52, %v3003_v24  ;;  %9469 = vst [vmem:[#allocation14_spill] sm:$0xff] %v8454_v17  ;;  %v3066_v8 = vmul.f32 2.0, %v2488_v9  ;;  %v3096_v13 = vand.u32 2147483648, %v8376_v53  ;;  %v3094_v39 = vand.u32 2147483647, %v8376_v53  ;;  %v8488_v53 = vpop.f32.mrf.mxu1 }
 0x3d0   : > { %v3069_v38 = vmul.f32 2.0, %v3063_v0  ;;  %3834 = vmatmul.f32.gmra.mxu3 %v7434_v46  ;;  %9470 = vst [vmem:[#allocation15_spill] sm:$0xff] %v8459_v43  ;;  %v3104_v10 = vadd.f32 %v8412_v6, %v3103_v11  ;;  %v8477_v31 = vsub.f32 %v2059_v45, %v8459_v43  ;;  %v3093_v45 = vsel %vm8480_vm14, %v8404_v63, %v3089_v22  ;;  %v9479_v63 = vld [vmem:[#allocation77_spill] sm:$0xff] }
 0x3d1   : > { %9471 = vst [vmem:[#allocation21_spill] sm:$0xff] %v8462_v4  ;;  %v9064_v29 = vand.u32 4294901760, %v8462_v4  ;;  %vm3095_vm2 = vcmp.eq.f32.partialorder %v3094_v39, 8.507059e+37 }
 0x3d2   : > { %3921 = vmatmul.f32.vlgmr.msra.gmra.mxu2 %v7428_v28  ;;  %v3071_v3 = vadd.f32 0.0009, %v3069_v38  ;;  %9473 = vst [vmem:[#allocation22_spill] sm:$0xff] %v8477_v31  ;;  %v3109_v38 = vand.u32 2147483647, %v8385_v61  ;;  %v3108_v61 = vsel %vm8498_vm0, %v8412_v6, %v3104_v10  ;;  %v9480_v10 = vld [vmem:[#allocation118_spill] sm:$0xff] }
 0x3d3   : > { %4239 = vmatpush.msra.mxu2 %v9468_v37  ;;  %5430 = vmatmul.f32.vlgmr.msra.gmra.mxu1 %v7397_v15  ;;  %v3060_v32 = vpop.f32.mrf.mxu3  ;;  %v5808_v39 = vsub.f32 %v8462_v4, %v9064_v29 }
 0x3d4   : > { %5680 = vmatpush.msra.mxu1 %v8440_v44  ;;  %5391 = vmatmul.f32.vlgmr.msra.gmra.mxu0 %v7428_v28  ;;  %v3061_v52 = vadd.f32 %v3060_v32, %v3034_v55  ;;  %v3073_v24 = vmul.f32 %v3071_v3, %v3067_v58  ;;  %v3068_v55 = vadd.f32 0.0001, %v3066_v8  ;;  %v3112_v58 = vor.u32 1.1754944e-38, %v3111_v19 }
 0x3d5   : > { %4242 = vmatpush.msra.mxu2 %v9472_v36  ;;  %v3152_v20 = vpop.f32.mrf.mxu2  ;;  %5650 = vmatpush.msra.mxu0 %v8457_v34  ;;  %v8503_v36 = vpop.f32.mrf.mxu0  ;;  %vm3110_vm6 = vcmp.eq.f32.partialorder %v3109_v38, 8.507059e+37  ;;  %v9482_v38 = vld [vmem:[#allocation121_spill] sm:$0xff] }
 0x3d6   : > { %5682 = vmatpush.msra.mxu1 %v8438_v56  ;;  %v3064_v1 = vsub.f32 %v3061_v52, %v2488_v9  ;;  %v3097_v9 = vor.u32 1.1754944e-38, %v3096_v13  ;;  %v9063_v52 = vand.u32 4294901760, %v8477_v31  ;;  %v3113_v0 = vsel %vm3110_vm6, %v3112_v58, %v3108_v61 }
 0x3d7   : > { %5653 = vmatpush.msra.mxu0 %v8454_v17  ;;  %v9491_v56 = vand.u32 4294901760, %v8462_v4 }
 0x3d8   : > { %v3070_v26 = vmul.f32 2.0, %v3064_v1  ;;  %3960 = vmatmul.f32.vlgmr.msra.gmra.mxu3 %v7397_v15  ;;  %v3098_v22 = vsel %vm3095_vm2, %v3097_v9, %v3093_v45  ;;  %v5809_v45 = vand.u32 4294901760, %v5808_v39  ;;  %v4400_v9 = vand.u32 4294901760, %v9482_v38 }
 0x3d9   : > { %4269 = vmatpush.msra.mxu3 %v9476_v59  ;;  %v3099_v1 = vmul.f32 %v3098_v22, %v3073_v24  ;;  %v5814_v59 = vsub.f32 %v8477_v31, %v9063_v52  ;;  %v9481_v24 = vld [vmem:[#allocation82_spill] sm:$0xff] }
 0x3da   : > { %3929 = vmatmul.f32.gmra.mxu2 %v7446_v7  ;;  %v3072_v11 = vadd.f32 0.0009, %v3070_v26  ;;  %v4394_v26 = vand.u32 4294901760, %v9480_v10  ;;  %v4401_v39 = vsub.f32 %v9482_v38, %v4400_v9  ;;  %v9485_v38 = vld [vmem:[#allocation88_spill] sm:$0xff] }
 0x3db   : > { %5434 = vmatmul.f32.gmra.mxu1 %v7417_v40  ;;  %4271 = vmatpush.msra.mxu3 %v9479_v63  ;;  %v3191_v32 = vpop.f32.mrf.mxu3  ;;  %v5815_v61 = vand.u32 4294901760, %v5814_v59 }
 0x3dc   : > { %5399 = vmatmul.f32.gmra.mxu0 %v7446_v7  ;;  %v3192_v8 = vadd.f32 %v3191_v32, %v3152_v20  ;;  %v3074_v13 = vmul.f32 %v3072_v11, %v3068_v55  ;;  %v3115_v20 = vsel %vm320_vm5, %v3099_v1, 0.0  ;;  %v8525_v55 = vpop.f32.mrf.mxu1  ;;  %v9483_v11 = vld [vmem:[#allocation89_spill] sm:$0xff]  ;;  %v4395_v32 = vsub.f32 %v9480_v10, %v4394_v26 }
 0x3dd   : > { %v3160_v3 = vpop.f32.mrf.mxu2  ;;  %v8530_v1 = vpop.f32.mrf.mxu0 }
 0x3de   : > { %v3114_v6 = vmul.f32 %v3113_v0, %v3074_v13  ;;  %v4396_v0 = vand.u32 4294901760, %v4395_v32  ;;  %v9487_v32 = vld [vmem:[#allocation85_spill] sm:$0xff] }
 0x3e0   : > { %3964 = vmatmul.f32.gmra.mxu3 %v7417_v40  ;;  %v3116_v19 = vsel %vm320_vm5, %v3114_v6, 0.0  ;;  %v4402_v6 = vand.u32 4294901760, %v4401_v39  ;;  %v9488_v39 = vld [vmem:[#allocation102_spill] sm:$0xff] }
 0x3e1   : > { %v3117_v37 = vadd.f32 %v3116_v19, %v3115_v20 }
 0x3e2   : > { %4053 = vmatmul.f32.vlgmr.msrb.gmra.mxu2 %v7397_v15 }
 0x3e3   : > { %4358 = vmatpush.msrb.mxu2 %v9481_v24  ;;  %5550 = vmatmul.f32.vlgmr.msrb.gmra.mxu1 %v7397_v15  ;;  %v3195_v63 = vpop.f32.mrf.mxu3 }
 0x3e4   : > { %5810 = vmatpush.msrb.mxu1 %v5809_v45  ;;  %5523 = vmatmul.f32.vlgmr.msrb.gmra.mxu0 %v7397_v15  ;;  %v3196_v58 = vadd.f32 %v3195_v63, %v3160_v3  ;;  %v8539_v20 = vpop.f32.mrf.mxu1  ;;  %v9484_v45 = vld [vmem:[#allocation90_spill] sm:$0xff]  ;;  %v9486_v63 = vld [vmem:[#allocation87_spill] sm:$0xff] }
 0x3e5   : > { %4360 = vmatpush.msrb.mxu2 %v9483_v11  ;;  %v3221_v22 = vpop.f32.mrf.mxu2  ;;  %3118 = vadd.xlane.f32.xlu2 %v3117_v37  ;;  %v1253_v37 = vadd.f32 %v9485_v38, %v9484_v45 }
 0x3e6   : > { %v3222_v13 = vadd.f32 %v3221_v22, %v3192_v8  ;;  %5771 = vmatpush.msrb.mxu0 %v8443_v5  ;;  %5816 = vmatpush.msrb.mxu1 %v5815_v61  ;;  %v8543_v61 = vpop.f32.mrf.mxu0  ;;  %v1249_v22 = vadd.f32 %v9487_v32, %v9486_v63 }
 0x3e8   : > { %5773 = vmatpush.msrb.mxu0 %v8459_v43  ;;  %4080 = vmatmul.f32.vlgmr.msrb.gmra.mxu3 %v7397_v15 }
 0x3e9   : > { %4397 = vmatpush.msrb.mxu3 %v4396_v0  ;;  %v537_v3 = vpop.xlane.xlu1 %536  ;;  %v1474_v0 = vadd.f32 %v9488_v39, %v1253_v37 }
 0x3ea   : > { %4057 = vmatmul.f32.gmra.mxu2 %v7417_v40 }
 0x3eb   : > { %5554 = vmatmul.f32.gmra.mxu1 %v7417_v40  ;;  %4403 = vmatpush.msrb.mxu3 %v4402_v6  ;;  %v3251_v8 = vpop.f32.mrf.mxu3 }
 0x3ec   : > { %5527 = vmatmul.f32.gmra.mxu0 %v7417_v40  ;;  %v3252_v59 = vadd.f32 %v3251_v8, %v3222_v13  ;;  %v538_v13 = vrot.slane %v537_v3, 4  ;;  %v9489_v8 = vld [vmem:[#allocation39_spill] sm:$0xff] }
 0x3ed   : > { %v3226_v10 = vpop.f32.mrf.mxu2 }
 0x3ee   : > { %v3227_v19 = vadd.f32 %v3226_v10, %v3196_v58  ;;  %v1469_v10 = vadd.f32 %v9489_v8, %v1249_v22  ;;  %v539_v52 = vadd.f32 %v538_v13, %v537_v3  ;;  %v8558_v8 = vpop.f32.mrf.mxu1 }
 0x3ef   : > { %v337_v6 = vpop.xlane.xlu0 %336 }
 0x3f0   : > { %4084 = vmatmul.f32.gmra.mxu3 %v7417_v40  ;;  %v338_v58 = vrot.slane %v337_v6, 4  ;;  %v540_v3 = vrot.slane %v539_v52, 2 }
 0x3f2   : > { %4245 = vmatmul.f32.vlgmr.msra.gmra.mxu2 %v7405_v27  ;;  %v339_v29 = vadd.f32 %v338_v58, %v337_v6  ;;  %v561_v37 = vpop.xlane.xlu1 %560 }
 0x3f3   : > { %4492 = vmatpush.msra.mxu2 %v4394_v26  ;;  %5686 = vmatmul.f32.vlgmr.msra.gmra.mxu1 %v7414_v57  ;;  %v3257_v45 = vpop.f32.mrf.mxu3  ;;  %v9490_v26 = vld [vmem:[#allocation103_spill] sm:$0xff]  ;;  %v562_v22 = vrot.slane %v561_v37, 4 }
 0x3f4   : > { %5934 = vmatpush.msra.mxu1 %v8443_v5  ;;  %5656 = vmatmul.f32.vlgmr.msra.gmra.mxu0 %v7405_v27  ;;  %v3258_v63 = vadd.f32 %v3257_v45, %v3227_v19  ;;  %v1733_v39 = vadd.f32 %v9490_v26, %v1474_v0  ;;  %v9492_v5 = vld [vmem:[#allocation41_spill] sm:$0xff] }
 0x3f5   : > { %4496 = vmatpush.msra.mxu2 %v4400_v9  ;;  %v3284_v38 = vpop.f32.mrf.mxu2  ;;  %5905 = vmatpush.msra.mxu0 %v9491_v56  ;;  %v340_v9 = vrot.slane %v339_v29, 2  ;;  %v1727_v17 = vadd.f32 %v9492_v5, %v1469_v10  ;;  %v563_v19 = vadd.f32 %v562_v22, %v561_v37  ;;  %v8566_v56 = vpop.f32.mrf.mxu0  ;;  %v541_v37 = vadd.f32 %v540_v3, %v539_v52 }
 0x3f6   : > { %v3285_v32 = vadd.f32 %v3284_v38, %v3252_v59  ;;  %5936 = vmatpush.msra.mxu1 %v8459_v43  ;;  %v1916_v44 = vadd.f32 %v8196_v2, %v1733_v39  ;;  %v9493_v59 = vand.u32 4294901760, %v8477_v31 }
 0x3f7   : > { %v341_v0 = vadd.f32 %v340_v9, %v339_v29  ;;  %v1912_v6 = vadd.f32 %v8176_v49, %v1727_v17  ;;  %v564_v13 = vrot.slane %v563_v19, 2 }
 0x3f8   : > { %5909 = vmatpush.msra.mxu0 %v9493_v59  ;;  %4275 = vmatmul.f32.vlgmr.msra.gmra.mxu3 %v7414_v57  ;;  %v2095_v10 = vadd.f32 %v8186_v33, %v1916_v44  ;;  %v542_v33 = vrot.slane %v541_v37, 1  ;;  %v8579_v44 = vpop.f32.mrf.mxu1 }
 0x3f9   : > { %4521 = vmatpush.msra.mxu3 %v9481_v24  ;;  %v513_v5 = vpop.xlane.xlu0 %512  ;;  %v342_v58 = vrot.slane %v341_v0, 1  ;;  %v565_v26 = vadd.f32 %v564_v13, %v563_v19  ;;  %v2091_v39 = vadd.f32 %v8156_v48, %v1912_v6  ;;  %v9498_v19 = vld [vmem:[#allocation124_spill] sm:$0xff] }
 0x3fa   : > { %4250 = vmatmul.f32.gmra.mxu2 %v7426_v50  ;;  %v514_v2 = vrot.slane %v513_v5, 4  ;;  %v8577_v9 = vand.u32 4294901760, %v2095_v10  ;;  %v543_v13 = vadd.f32 %v542_v33, %v541_v37 }
 0x3fb   : > { %5692 = vmatmul.f32.gmra.mxu1 %v7434_v46  ;;  %4523 = vmatpush.msra.mxu3 %v9483_v11  ;;  %v3311_v45 = vpop.f32.mrf.mxu3  ;;  %v343_v24 = vadd.f32 %v342_v58, %v341_v0  ;;  %v566_v11 = vrot.slane %v565_v26, 1 }
 0x3fc   : > { %5661 = vmatmul.f32.gmra.mxu0 %v7426_v50  ;;  %v8574_v29 = vadd.f32 %v3311_v45, %v3285_v32  ;;  %v515_v17 = vadd.f32 %v514_v2, %v513_v5  ;;  %9494 = vst [vmem:[#allocation18_spill] sm:$0xff] %v8577_v9  ;;  %v8583_v32 = vand.u32 4294901760, %v2091_v39  ;;  %v8590_v3 = vsub.f32 %v2095_v10, %v8577_v9  ;;  %v9500_v10 = vld [vmem:[#allocation83_spill] sm:$0xff] }
 0x3fd   : > { %v3288_v38 = vpop.f32.mrf.mxu2  ;;  %6337 = vpush %v343_v24  ;;  %v8587_v48 = vpop.f32.mrf.mxu0  ;;  %v567_v58 = vadd.f32 %v566_v11, %v565_v26  ;;  %v4788_v24 = vand.u32 4294901760, %v8045_v16 }
 0x3fe   : > { %v3289_v49 = vadd.f32 %v3288_v38, %v3258_v63  ;;  %v516_v22 = vrot.slane %v515_v17, 2  ;;  %9495 = vst [vmem:[#allocation19_spill] sm:$0xff] %v8583_v32  ;;  %v9496_v63 = vld [vmem:[#allocation122_spill] sm:$0xff]  ;;  %v8596_v45 = vsub.f32 %v2091_v39, %v8583_v32  ;;  %v9501_v38 = vld [vmem:[#allocation119_spill] sm:$0xff] }
 0x3ff   : > { %9497 = vst [vmem:[#allocation43_spill] sm:$0xff] %v8590_v3 }
 0x400   : > { %4281 = vmatmul.f32.gmra.mxu3 %v7434_v46  ;;  %v517_v52 = vadd.f32 %v516_v22, %v515_v17  ;;  %9499 = vst [vmem:[#allocation45_spill] sm:$0xff] %v8596_v45  ;;  %v4782_v17 = vand.u32 4294901760, %v8052_v35 }
 0x402   : > { %4366 = vmatmul.f32.vlgmr.msrb.gmra.mxu2 %v7428_v28  ;;  %v518_v59 = vrot.slane %v517_v52, 1  ;;  %v4783_v22 = vsub.f32 %v8052_v35, %v4782_v17 }
 0x403   : > { %4625 = vmatpush.msrb.mxu2 %v9496_v63  ;;  %5818 = vmatmul.f32.vlgmr.msrb.gmra.mxu1 %v7397_v15  ;;  %v3315_v0 = vpop.f32.mrf.mxu3  ;;  %v4789_v63 = vsub.f32 %v8045_v16, %v4788_v24  ;;  %v8621_v16 = vmul.f32 %v8574_v29, %v8574_v29 }
 0x404   : > { %6064 = vmatpush.msrb.mxu1 %v8577_v9  ;;  %5779 = vmatmul.f32.vlgmr.msrb.gmra.mxu0 %v7428_v28  ;;  %v3316_v5 = vadd.f32 %v3315_v0, %v3289_v49  ;;  %v519_v2 = vadd.f32 %v518_v59, %v517_v52  ;;  %v4784_v59 = vand.u32 4294901760, %v4783_v22  ;;  %v9509_v9 = vld [vmem:[#allocation16_spill] sm:$0xff] }
 0x405   : > { %4628 = vmatpush.msrb.mxu2 %v9498_v19  ;;  %v3342_v6 = vpop.f32.mrf.mxu2  ;;  %6034 = vmatpush.msrb.mxu0 %v8590_v3  ;;  %v4790_v19 = vand.u32 4294901760, %v4789_v63  ;;  %v9505_v63 = vld [vmem:[#allocation10_spill] sm:$0xff] }
 0x406   : > { %6066 = vmatpush.msrb.mxu1 %v8583_v32  ;;  %6339 = vpush %v519_v2  ;;  %v9508_v32 = vld [vmem:[#allocation36_spill] sm:$0xff] }
 0x407   : > { %6037 = vmatpush.msrb.mxu0 %v8596_v45  ;;  %6341 = vpush %v543_v13 }
 0x408   : > { %4405 = vmatmul.f32.vlgmr.msrb.gmra.mxu3 %v7397_v15  ;;  %6343 = vpush %v567_v58 }
 0x409   : > { %4655 = vmatpush.msrb.mxu3 %v9500_v10 }
 0x40a   : > { %4374 = vmatmul.f32.gmra.mxu2 %v7446_v7 }
 0x40b   : > { %4657 = vmatpush.msrb.mxu3 %v9501_v38  ;;  %v3381_v37 = vpop.f32.mrf.mxu3 }
 0x40c   : > { %v3382_v49 = vadd.f32 %v3381_v37, %v3342_v6 }
 0x40d   : > { %v3350_v26 = vpop.f32.mrf.mxu2 }
 0x410   : > { %4409 = vmatmul.f32.gmra.mxu3 %v7417_v40 }
 0x412   : > { %4498 = vmatmul.f32.vlgmr.msra.gmra.mxu2 %v7397_v15 }
 0x413   : > { %4746 = vmatpush.msra.mxu2 %v8026_v14  ;;  %v3385_v39 = vpop.f32.mrf.mxu3 }
 0x414   : > { %v3386_v52 = vadd.f32 %v3385_v39, %v3350_v26 }
 0x415   : > { %4748 = vmatpush.msra.mxu2 %v8007_v23  ;;  %v3411_v33 = vpop.f32.mrf.mxu2 }
 0x416   : > { %v3412_v11 = vadd.f32 %v3411_v33, %v3382_v49 }
 0x418   : > { %4525 = vmatmul.f32.vlgmr.msra.gmra.mxu3 %v7397_v15 }
 0x419   : > { %4785 = vmatpush.msra.mxu3 %v4784_v59  ;;  %v5235_v59 = vand.u32 4294901760, %v9505_v63 }
 0x41a   : > { %4502 = vmatmul.f32.gmra.mxu2 %v7417_v40 }
 0x41b   : > { %4791 = vmatpush.msra.mxu3 %v4790_v19  ;;  %v3441_v0 = vpop.f32.mrf.mxu3  ;;  %v9506_v19 = vld [vmem:[#allocation80_spill] sm:$0xff] }
 0x41c   : > { %v3442_v13 = vadd.f32 %v3441_v0, %v3412_v11  ;;  %v9504_v11 = vld [vmem:[#allocation101_spill] sm:$0xff] }
 0x41d   : > { %v3416_v6 = vpop.f32.mrf.mxu2 }
 0x41e   : > { %v3475_v2 = vadd.f32 %v8209_v12, %v3442_v13  ;;  %v3417_v10 = vadd.f32 %v3416_v6, %v3386_v52 }
 0x420   : > { %v3502_v35 = vadd.f32 %v8199_v42, %v3475_v2  ;;  %4529 = vmatmul.f32.gmra.mxu3 %v7417_v40  ;;  %v5236_v2 = vsub.f32 %v9505_v63, %v5235_v59 }
 0x422   : > { %4631 = vmatmul.f32.vlgmr.msrb.gmra.mxu2 %v7405_v27  ;;  %v8623_v58 = vmul.f32 %v3502_v35, %v3502_v35  ;;  %v8626_v38 = vmul.f32 %v3502_v35, %v8574_v29  ;;  %v8637_v29 = vmul.f32 %v3316_v5, %v3316_v5  ;;  %v9507_v35 = vld [vmem:[#allocation81_spill] sm:$0xff] }
 0x423   : > { %4880 = vmatpush.msrb.mxu2 %v4782_v17  ;;  %v3447_v37 = vpop.f32.mrf.mxu3 }
 0x424   : > { %v8630_v42 = vadd.f32 %v8623_v58, %v8621_v16  ;;  %v3448_v26 = vadd.f32 %v3447_v37, %v3417_v10 }
 0x425   : > { %4884 = vmatpush.msrb.mxu2 %v4788_v24  ;;  %v3538_v12 = vpop.f32.mrf.mxu2 }
 0x426   : > { %v3479_v49 = vadd.f32 %v8232_v54, %v3448_v26 }
 0x428   : > { %v3506_v17 = vadd.f32 %v8215_v21, %v3479_v49  ;;  %4661 = vmatmul.f32.vlgmr.msrb.gmra.mxu3 %v7414_v57 }
 0x429   : > { %4909 = vmatpush.msrb.mxu3 %v8026_v14 }
 0x42a   : > { %4636 = vmatmul.f32.gmra.mxu2 %v7426_v50  ;;  %v8639_v24 = vmul.f32 %v3506_v17, %v3506_v17  ;;  %v8641_v39 = vmul.f32 %v3506_v17, %v3316_v5  ;;  %v9503_v5 = vld [vmem:[#allocation84_spill] sm:$0xff] }
 0x42b   : > { %4911 = vmatpush.msrb.mxu3 %v8007_v23  ;;  %v3577_v22 = vpop.f32.mrf.mxu3  ;;  %v5229_v52 = vand.u32 4294901760, %v9503_v5 }
 0x42c   : > { %9502 = vst [vmem:[#allocation20_spill] sm:$0xff] %v8641_v39  ;;  %v8646_v54 = vadd.f32 %v8639_v24, %v8637_v29 }
 0x42d   : > { %v3546_v33 = vpop.f32.mrf.mxu2 }
 0x42e   : > { %s8652_s23 = spop %6337 }
 0x430   : > { %4667 = vmatmul.f32.gmra.mxu3 %v7434_v46 }
 0x432   : > { %4754 = vmatmul.f32.vlgmr.msra.gmra.mxu2 %v7428_v28 }
 0x433   : > { %5009 = vmatpush.msra.mxu2 %v8111_v30  ;;  %v3581_v14 = vpop.f32.mrf.mxu3 }
 0x435   : > { %5012 = vmatpush.msra.mxu2 %v8138_v60  ;;  %v3670_v21 = vpop.f32.mrf.mxu2 }
 0x437   : > { %s8654_s27 = spop %6339 }
 0x438   : > { %4793 = vmatmul.f32.vlgmr.msra.gmra.mxu3 %v7397_v15  ;;  %s6342_s28 = spop %6341 }
 0x439   : > { %5039 = vmatpush.msra.mxu3 %v8096_v47  ;;  %s6344_s29 = spop %6343  ;;  %v3578_v47 = vadd.f32 %v3577_v22, %v3538_v12  ;;  %v5237_v22 = vand.u32 4294901760, %v5236_v2 }
 0x43a   : > { %4762 = vmatmul.f32.gmra.mxu2 %v7446_v7  ;;  %s569_s30 = sadd.f32 %s6344_s29, %s6342_s28 }
 0x43b   : > { %5041 = vmatpush.msra.mxu3 %v8099_v51  ;;  %v3697_v23 = vpop.f32.mrf.mxu3  ;;  %v5230_v51 = vsub.f32 %v9503_v5, %v5229_v52  ;;  %v3608_v10 = vadd.f32 %v9507_v35, %v3578_v47  ;;  %v3582_v5 = vadd.f32 %v3581_v14, %v3546_v33 }
 0x43c   : > { %s570_s5 = ssub.f32 %s569_s30, %s8654_s27  ;;  %s6246_s30 = scalar_lea.hbm %s8971_s4, %s6332_s13 }
 0x43d   : > { %v3674_v30 = vpop.f32.mrf.mxu2  ;;  %v5231_v26 = vand.u32 4294901760, %v5230_v51  ;;  %v3638_v45 = vadd.f32 %v9508_v32, %v3608_v10  ;;  %s6250_s21 = sshll.u32 %s6246_s30, 4  ;;  %s6251_s21 = int_to_ptr.hbm [resolvable:$true] %s6250_s21 }
 0x43e   : > { %v571_v60 = vstv %s570_s5 }
 0x43f   : > { %6452 = vrcp.f32 %v571_v60  ;;  %v583_v49 = vand.u32 2147483648, %v571_v60  ;;  %vm577_vm1 = vweird.f32 %v571_v60  ;;  %v581_v12 = vand.u32 2147483647, %v571_v60 }
 0x440   : > { %4797 = vmatmul.f32.gmra.mxu3 %v7417_v40  ;;  %v3671_v43 = vadd.f32 %v3670_v21, %v3638_v45  ;;  %v9511_v45 = vld [vmem:[#allocation11_spill] sm:$0xff] }
 0x441   : > { %v584_v35 = vor.u32 1.1754944e-38, %v583_v49  ;;  %vm582_vm7 = vcmp.eq.f32.partialorder %v581_v12, 8.507059e+37  ;;  %v4103_v12 = vadd.f32 0.0001, %v8646_v54 }
 0x442   : > { %4886 = vmatmul.f32.vlgmr.msrb.gmra.mxu2 %v7397_v15 }
 0x443   : > { %5193 = vmatpush.msrb.mxu2 %v9504_v11  ;;  %v3701_v0 = vpop.f32.mrf.mxu3 }
 0x445   : > { %5195 = vmatpush.msrb.mxu2 %v9506_v19  ;;  %v3799_v6 = vpop.f32.mrf.mxu2  ;;  %v6453_v13 = vpop.eup %6452 }
 0x446   : > { %v573_v37 = vmul.f32 %v6453_v13, %v571_v60  ;;  %vm578_vm3 = vweird.f32 %v6453_v13  ;;  %v3800_v63 = vadd.f32 %v3799_v6, %v9509_v9  ;;  %v3698_v60 = vadd.f32 %v3697_v23, %v3671_v43 }
 0x447   : > { %vm579_vm4 = vmor %vm577_vm1, %vm578_vm3  ;;  %v4102_v6 = vadd.f32 0.0001, %v8630_v42 }
 0x448   : > { %4913 = vmatmul.f32.vlgmr.msrb.gmra.mxu3 %v7397_v15  ;;  %v574_v17 = vsub.f32 1.0, %v573_v37  ;;  %v9510_v37 = vld [vmem:[#allocation12_spill] sm:$0xff]  ;;  %v3704_v9 = vsub.f32 %v3698_v60, %v8621_v16 }
 0x449   : > { %5232 = vmatpush.msrb.mxu3 %v5231_v26  ;;  %v3613_v39 = vadd.f32 %v9510_v37, %v3582_v5 }
 0x44a   : > { %4890 = vmatmul.f32.gmra.mxu2 %v7417_v40  ;;  %v575_v3 = vmul.f32 %v6453_v13, %v574_v17 }
 0x44b   : > { %5238 = vmatpush.msrb.mxu3 %v5237_v22  ;;  %v3829_v47 = vpop.f32.mrf.mxu3 }
 0x44c   : > { %v3830_v31 = vadd.f32 %v3829_v47, %v3800_v63  ;;  %v576_v4 = vadd.f32 %v6453_v13, %v575_v3  ;;  %v3644_v3 = vadd.f32 %v9511_v45, %v3613_v39  ;;  %v9512_v45 = vld [vmem:[#allocation79_spill] sm:$0xff] }
 0x44d   : > { %v3804_v51 = vpop.f32.mrf.mxu2 }
 0x44e   : > { %v3863_v2 = vadd.f32 %v8503_v36, %v3830_v31  ;;  %v580_v33 = vsel %vm579_vm4, %v6453_v13, %v576_v4  ;;  %v3805_v43 = vadd.f32 %v3804_v51, %v8387_v62  ;;  %v3675_v36 = vadd.f32 %v3674_v30, %v3644_v3 }
 0x44f   : > { %v585_v14 = vsel %vm582_vm7, %v584_v35, %v580_v33 }
 0x450   : > { %v3890_v32 = vadd.f32 %v8488_v53, %v3863_v2  ;;  %4917 = vmatmul.f32.gmra.mxu3 %v7417_v40  ;;  %6345 = vpush %v585_v14  ;;  %v3702_v13 = vadd.f32 %v3701_v0, %v3675_v36  ;;  %v4090_v36 = vmul.f32 2.0, %v8626_v38 }
 0x452   : > { %5015 = vmatmul.f32.vlgmr.msra.gmra.mxu2 %v7405_v27  ;;  %v3896_v21 = vsub.f32 %v3890_v32, %v8623_v58  ;;  %v4185_v58 = vpop.f32.mrf.mxu0  ;;  %5787 = vmatmul.f32.gmra.mxu0 %v7446_v7  ;;  %v3705_v42 = vsub.f32 %v3702_v13, %v8637_v29  ;;  %v5615_v13 = vand.u32 4294901760, %v8457_v34 }
 0x453   : > { %5327 = vmatpush.msra.mxu2 %v5229_v52  ;;  %v3835_v31 = vpop.f32.mrf.mxu3 }
 0x454   : > { %v4104_v23 = vadd.f32 %v3896_v21, %v3704_v9  ;;  %v3836_v53 = vadd.f32 %v3835_v31, %v3805_v43 }
 0x455   : > { %5331 = vmatpush.msra.mxu2 %v5235_v59  ;;  %v3922_v4 = vpop.f32.mrf.mxu2  ;;  %v4220_v59 = vpop.f32.mrf.mxu1  ;;  %5822 = vmatmul.f32.gmra.mxu1 %v7417_v40 }
 0x456   : > { %v4106_v10 = vadd.f32 0.0009, %v4104_v23  ;;  %v3867_v52 = vadd.f32 %v8530_v1, %v3836_v53  ;;  %v8697_v49 = vadd.f32 %v4220_v59, %v4185_v58 }
 0x458   : > { %v3119_v26 = vpop.xlane.xlu2 %3118  ;;  %v8685_v16 = vmul.f32 %v4106_v10, %v4102_v6  ;;  %v3894_v39 = vadd.f32 %v8525_v55, %v3867_v52  ;;  %5045 = vmatmul.f32.vlgmr.msra.gmra.mxu3 %v7414_v57 }
 0x459   : > { %v3120_v62 = vrot.slane %v3119_v26, 4  ;;  %5356 = vmatpush.msra.mxu3 %v9504_v11 }
 0x45a   : > { %5020 = vmatmul.f32.gmra.mxu2 %v7426_v50  ;;  %6454 = vrcp.f32 %v8685_v16  ;;  %v3897_v1 = vsub.f32 %v3894_v39, %v8639_v24  ;;  %v8706_v47 = vpop.f32.mrf.mxu0  ;;  %5911 = vmatmul.f32.vlgmr.msra.gmra.mxu0 %v7397_v15  ;;  %v4121_v10 = vand.u32 2147483648, %v8685_v16  ;;  %vm4115_vm9 = vweird.f32 %v8685_v16  ;;  %v9513_v39 = vld [vmem:[#allocation13_spill] sm:$0xff] }
 0x45b   : > { %v3121_v30 = vadd.f32 %v3120_v62, %v3119_v26  ;;  %5358 = vmatpush.msra.mxu3 %v9506_v19  ;;  %v3961_v55 = vpop.f32.mrf.mxu3  ;;  %v4092_v26 = vadd.f32 0.0001, %v4090_v36  ;;  %v9514_v62 = vld [vmem:[#allocation14_spill] sm:$0xff] }
 0x45c   : > { %v4105_v17 = vadd.f32 %v3897_v1, %v3705_v42  ;;  %v3962_v24 = vadd.f32 %v3961_v55, %v3922_v4  ;;  %v5621_v58 = vand.u32 4294901760, %v9514_v62  ;;  %v9517_v55 = vld [vmem:[#allocation17_spill] sm:$0xff] }
 0x45d   : > { %v3930_v0 = vpop.f32.mrf.mxu2  ;;  %v3122_v11 = vrot.slane %v3121_v30, 2  ;;  %v8711_v51 = vpop.f32.mrf.mxu1  ;;  %5938 = vmatmul.f32.vlgmr.msra.gmra.mxu1 %v7397_v15 }
 0x45e   : > { %v4107_v22 = vadd.f32 0.0009, %v4105_v17  ;;  %v3992_v2 = vadd.f32 %v8543_v61, %v3962_v24  ;;  %v5616_v17 = vsub.f32 %v8457_v34, %v5615_v13  ;;  %v9518_v24 = vld [vmem:[#allocation20_spill] sm:$0xff] }
 0x45f   : > { %v3123_v29 = vadd.f32 %v3122_v11, %v3121_v30 }
 0x460   : > { %v8700_v5 = vpop.eup %6454  ;;  %v8702_v63 = vmul.f32 %v4107_v22, %v4103_v12  ;;  %5051 = vmatmul.f32.gmra.mxu3 %v7434_v46  ;;  %v4022_v32 = vadd.f32 %v8539_v20, %v3992_v2  ;;  %v4122_v12 = vor.u32 1.1754944e-38, %v4121_v10 }
 0x461   : > { %v3124_v19 = vrot.slane %v3123_v29, 1  ;;  %v4111_v35 = vmul.f32 %v8700_v5, %v8685_v16  ;;  %vm4116_vm8 = vweird.f32 %v8700_v5 }
 0x462   : > { %5201 = vmatmul.f32.vlgmr.msrb.gmra.mxu2 %v7428_v28  ;;  %6456 = vrcp.f32 %v8702_v63  ;;  %v8723_v9 = vpop.f32.mrf.mxu0  ;;  %5915 = vmatmul.f32.gmra.mxu0 %v7417_v40  ;;  %vm8750_vm10 = vmor %vm4115_vm9, %vm4116_vm8  ;;  %vm4130_vm13 = vweird.f32 %v8702_v63 }
 0x463   : > { %5454 = vmatpush.msrb.mxu2 %v8288_v41  ;;  %v3125_v54 = vadd.f32 %v3124_v19, %v3123_v29  ;;  %v3965_v37 = vpop.f32.mrf.mxu3  ;;  %v4112_v41 = vsub.f32 1.0, %v4111_v35  ;;  %v4091_v19 = vmul.f32 2.0, %v9518_v24 }
 0x464   : > { %v3966_v14 = vadd.f32 %v3965_v37, %v3930_v0 }
 0x465   : > { %5457 = vmatpush.msrb.mxu2 %v8299_v25  ;;  %v4054_v60 = vpop.f32.mrf.mxu2  ;;  %6347 = vpush %v3125_v54  ;;  %v4113_v61 = vmul.f32 %v8700_v5, %v4112_v41  ;;  %v8730_v21 = vpop.f32.mrf.mxu1  ;;  %5942 = vmatmul.f32.gmra.mxu1 %v7417_v40  ;;  %v5622_v54 = vsub.f32 %v9514_v62, %v5621_v58  ;;  %v5617_v41 = vand.u32 4294901760, %v5616_v17 }
 0x466   : > { %v4055_v25 = vadd.f32 %v4054_v60, %v4022_v32  ;;  %v3997_v31 = vadd.f32 %v8566_v56, %v3966_v14  ;;  %v4119_v56 = vand.u32 2147483647, %v8685_v16  ;;  %v4136_v14 = vand.u32 2147483648, %v8702_v63 }
 0x467   : > { %v4114_v53 = vadd.f32 %v8700_v5, %v4113_v61  ;;  %v4093_v61 = vadd.f32 0.0001, %v4091_v19 }
 0x468   : > { %v8718_v33 = vpop.eup %6456  ;;  %5240 = vmatmul.f32.vlgmr.msrb.gmra.mxu3 %v7397_v15  ;;  %vm4120_vm11 = vcmp.eq.f32.partialorder %v4119_v56, 8.507059e+37  ;;  %v4137_v36 = vor.u32 1.1754944e-38, %v4136_v14 }
 0x469   : > { %5484 = vmatpush.msrb.mxu3 %v9512_v45  ;;  %v4126_v3 = vmul.f32 %v8718_v33, %v8702_v63  ;;  %vm4131_vm12 = vweird.f32 %v8718_v33  ;;  %v5623_v45 = vand.u32 4294901760, %v5622_v54 }
 0x46a   : > { %5209 = vmatmul.f32.gmra.mxu2 %v7446_v7  ;;  %vm8778_vm14 = vmor %vm4130_vm13, %vm4131_vm12 }
 0x46b   : > { %5486 = vmatpush.msrb.mxu3 %v8268_v18  ;;  %v4081_v43 = vpop.f32.mrf.mxu3  ;;  %v4127_v6 = vsub.f32 1.0, %v4126_v3  ;;  %v4028_v18 = vadd.f32 %v8558_v8, %v3997_v31  ;;  %v4118_v8 = vsel %vm8750_vm10, %v8700_v5, %v4114_v53  ;;  %v4217_v5 = vadd.f32 %v8579_v44, %v8587_v48 }
 0x46c   : > { %v4082_v4 = vadd.f32 %v4081_v43, %v4055_v25  ;;  %v4123_v35 = vsel %vm4120_vm11, %v4122_v12, %v4118_v8  ;;  %v4134_v44 = vand.u32 2147483647, %v8702_v63  ;;  %v9522_v12 = vld [vmem:[#allocation22_spill] sm:$0xff] }
 0x46d   : > { %v4058_v20 = vpop.f32.mrf.mxu2  ;;  %v4128_v16 = vmul.f32 %v8718_v33, %v4127_v6  ;;  %v8759_v59 = vpop.f32.mrf.mxu1  ;;  %6070 = vmatmul.f32.vlgmr.msrb.gmra.mxu1 %v7414_v57 }
 0x46e   : > { %v4088_v23 = vsub.f32 %v4082_v4, %v8626_v38  ;;  %v8746_v38 = vpop.f32.mrf.mxu0  ;;  %6040 = vmatmul.f32.vlgmr.msrb.gmra.mxu0 %v7405_v27  ;;  %v4059_v30 = vadd.f32 %v4058_v20, %v4028_v18  ;;  %vm4135_vm15 = vcmp.eq.f32.partialorder %v4134_v44, 8.507059e+37  ;;  %v9525_v44 = vld [vmem:[#allocation43_spill] sm:$0xff] }
 0x46f   : > { %v4129_v2 = vadd.f32 %v8718_v33, %v4128_v16 }
 0x470   : > { %v4094_v52 = vmul.f32 2.0, %v4088_v23  ;;  %5244 = vmatmul.f32.gmra.mxu3 %v7417_v40 }
 0x471   : > { %v4133_v20 = vsel %vm8778_vm14, %v8718_v33, %v4129_v2 }
 0x472   : > { %5333 = vmatmul.f32.vlgmr.msra.gmra.mxu2 %v7397_v15  ;;  %v4096_v1 = vadd.f32 0.0009, %v4094_v52  ;;  %v4138_v10 = vsel %vm4135_vm15, %v4137_v36, %v4133_v20 }
 0x473   : > { %5579 = vmatpush.msra.mxu2 %v9513_v39  ;;  %v4085_v0 = vpop.f32.mrf.mxu3 }
 0x474   : > { %v4086_v22 = vadd.f32 %v4085_v0, %v4059_v30  ;;  %v4098_v29 = vmul.f32 %v4096_v1, %v4092_v26 }
 0x475   : > { %5581 = vmatpush.msra.mxu2 %v9517_v55  ;;  %v4246_v11 = vpop.f32.mrf.mxu2  ;;  %v4472_v31 = vpop.f32.mrf.mxu1  ;;  %6076 = vmatmul.f32.gmra.mxu1 %v7434_v46 }
 0x476   : > { %v4089_v37 = vsub.f32 %v4086_v22, %v9518_v24  ;;  %v4124_v60 = vmul.f32 %v4123_v35, %v4098_v29  ;;  %v4441_v48 = vpop.f32.mrf.mxu0  ;;  %6045 = vmatmul.f32.gmra.mxu0 %v7426_v50  ;;  %v4247_v43 = vadd.f32 %v4246_v11, %v4217_v5  ;;  %v9521_v11 = vld [vmem:[#allocation21_spill] sm:$0xff]  ;;  %v9524_v35 = vld [vmem:[#allocation15_spill] sm:$0xff] }
 0x478   : > { %v4095_v32 = vmul.f32 2.0, %v4089_v37  ;;  %5360 = vmatmul.f32.vlgmr.msra.gmra.mxu3 %v7397_v15  ;;  %v4140_v33 = vsel %vm320_vm5, %v4124_v60, 0.0 }
 0x479   : > { %5618 = vmatpush.msra.mxu3 %v5617_v41 }
 0x47a   : > { %5337 = vmatmul.f32.gmra.mxu2 %v7417_v40  ;;  %v4097_v3 = vadd.f32 0.0009, %v4095_v32 }
 0x47b   : > { %5624 = vmatpush.msra.mxu3 %v5623_v45  ;;  %v4276_v63 = vpop.f32.mrf.mxu3 }
 0x47c   : > { %v4277_v23 = vadd.f32 %v4276_v63, %v4247_v43  ;;  %v4099_v6 = vmul.f32 %v4097_v3, %v4093_v61  ;;  %v9526_v61 = vld [vmem:[#allocation18_spill] sm:$0xff]  ;;  %v9527_v3 = vld [vmem:[#allocation45_spill] sm:$0xff]  ;;  %v9528_v63 = vld [vmem:[#allocation19_spill] sm:$0xff] }
 0x47d   : > { %v4251_v4 = vpop.f32.mrf.mxu2  ;;  %v8798_v42 = vpop.f32.mrf.mxu1  ;;  %v6005_v43 = vand.u32 4294901760, %v9527_v3 }
 0x47e   : > { %v4252_v53 = vadd.f32 %v4251_v4, %v8697_v49  ;;  %v4310_v52 = vadd.f32 %v8706_v47, %v4277_v23  ;;  %v4139_v18 = vmul.f32 %v4138_v10, %v4099_v6  ;;  %v8794_v62 = vpop.f32.mrf.mxu0 }
 0x47f   : > { %v6006_v6 = vsub.f32 %v9527_v3, %v6005_v43 }
 0x480   : > { %v4337_v56 = vadd.f32 %v8711_v51, %v4310_v52  ;;  %5364 = vmatmul.f32.gmra.mxu3 %v7417_v40  ;;  %v4141_v26 = vsel %vm320_vm5, %v4139_v18, 0.0 }
 0x481   : > { %v4142_v49 = vadd.f32 %v4141_v26, %v4140_v33  ;;  %s6346_s6 = spop %6345 }
 0x482   : > { %5460 = vmatmul.f32.vlgmr.msrb.gmra.mxu2 %v7405_v27  ;;  %v8828_v41 = vmul.f32 %v4337_v56, %v4337_v56  ;;  %s587_s14 = smul.f32 %s6346_s6, %s8654_s27  ;;  %s6236_s27 = scalar_lea.sflag [#allocation3], %s203_s8 }
 0x483   : > { %5713 = vmatpush.msrb.mxu2 %v5615_v13  ;;  %v4282_v47 = vpop.f32.mrf.mxu3  ;;  %4143 = vadd.xlane.f32.xlu2 %v4142_v49  ;;  %v6007_v49 = vand.u32 4294901760, %v6006_v6  ;;  %s6500_s6 = sshra.s32 %s6251_s21, 4  ;;  %s6501_s6 = int_to_ptr.hbm [resolvable:$true] %s6500_s6 }
 0x484   : > { %v4283_v1 = vadd.f32 %v4282_v47, %v4252_v53  ;;  %s588_s3 = ssub.f32 1.0, %s587_s14  ;;  %p6507_p0 = scmp.lt.s32.totalorder %s6501_s6, %s8971_s4 }
 0x485   : > { %5717 = vmatpush.msrb.mxu2 %v5621_v58  ;;  %v4367_v51 = vpop.f32.mrf.mxu2  ;;  %v8807_v34 = vpop.f32.mrf.mxu1 }
 0x486   : > { %v4314_v30 = vadd.f32 %v8723_v9, %v4283_v1  ;;  %v8804_v16 = vpop.f32.mrf.mxu0 }
 0x488   : > { %v4341_v8 = vadd.f32 %v8730_v21, %v4314_v30  ;;  %5490 = vmatmul.f32.vlgmr.msrb.gmra.mxu3 %v7414_v57 }
 0x489   : > { %5742 = vmatpush.msrb.mxu3 %v9513_v39 }
 0x48a   : > { %5465 = vmatmul.f32.gmra.mxu2 %v7426_v50  ;;  %v8846_v10 = vmul.f32 %v4341_v8, %v4341_v8 }
 0x48b   : > { %5744 = vmatpush.msrb.mxu3 %v9517_v55  ;;  %v4406_v13 = vpop.f32.mrf.mxu3 }
 0x48c   : > { %v4407_v0 = vadd.f32 %v4406_v13, %v4367_v51 }
 0x48d   : > { %v4375_v58 = vpop.f32.mrf.mxu2  ;;  %v8817_v39 = vpop.f32.mrf.mxu1 }
 0x48e   : > { %v4437_v17 = vadd.f32 %v8746_v38, %v4407_v0  ;;  %v8814_v21 = vpop.f32.mrf.mxu0 }
 0x490   : > { %v4467_v9 = vadd.f32 %v8759_v59, %v4437_v17  ;;  %5496 = vmatmul.f32.gmra.mxu3 %v7434_v46  ;;  %v9523_v59 = vld [vmem:[#allocation44_spill] sm:$0xff] }
 0x492   : > { %5587 = vmatmul.f32.vlgmr.msra.gmra.mxu2 %v7428_v28 }
 0x493   : > { %5842 = vmatpush.msra.mxu2 %v9521_v11  ;;  %v4410_v55 = vpop.f32.mrf.mxu3  ;;  %v4603_v11 = vadd.f32 %v8798_v42, %v8794_v62 }
 0x494   : > { %v4411_v29 = vadd.f32 %v4410_v55, %v4375_v58 }
 0x495   : > { %5845 = vmatpush.msra.mxu2 %v9522_v12  ;;  %v4499_v22 = vpop.f32.mrf.mxu2  ;;  %v8825_v54 = vpop.f32.mrf.mxu1 }
 0x496   : > { %v4442_v5 = vadd.f32 %v4441_v48, %v4411_v29  ;;  %v8822_v38 = vpop.f32.mrf.mxu0  ;;  %v4500_v19 = vadd.f32 %v4499_v22, %v4467_v9  ;;  %v5999_v48 = vand.u32 4294901760, %v9525_v44  ;;  %s6348_s7 = spop %6347 }
 0x498   : > { %v4473_v24 = vadd.f32 %v4472_v31, %v4442_v5  ;;  %5626 = vmatmul.f32.vlgmr.msra.gmra.mxu3 %v7397_v15  ;;  %v6000_v36 = vsub.f32 %v9525_v44, %v5999_v48 }
 0x499   : > { %5872 = vmatpush.msra.mxu3 %v9523_v59 }
 0x49a   : > { %5595 = vmatmul.f32.gmra.mxu2 %v7446_v7 }
 0x49b   : > { %5874 = vmatpush.msra.mxu3 %v9524_v35  ;;  %v4526_v37 = vpop.f32.mrf.mxu3 }
 0x49c   : > { %v4527_v2 = vadd.f32 %v4526_v37, %v4500_v19 }
 0x49d   : > { %v4503_v60 = vpop.f32.mrf.mxu2  ;;  %v4854_v31 = vpop.f32.mrf.mxu1 }
 0x49e   : > { %v8830_v14 = vmul.f32 %v4527_v2, %v4527_v2  ;;  %v8832_v32 = vmul.f32 %v4527_v2, %v4337_v56  ;;  %v4824_v25 = vpop.f32.mrf.mxu0  ;;  %v4504_v20 = vadd.f32 %v4503_v60, %v4473_v24  ;;  %v6001_v56 = vand.u32 4294901760, %v6000_v36 }
 0x49f   : > { %v4607_v24 = vadd.f32 %v8807_v34, %v8804_v16 }
 0x4a0   : > { %v8837_v45 = vadd.f32 %v8830_v14, %v8828_v41  ;;  %5630 = vmatmul.f32.gmra.mxu3 %v7417_v40 }
 0x4a2   : > { %5719 = vmatmul.f32.vlgmr.msrb.gmra.mxu2 %v7397_v15 }
 0x4a3   : > { %5963 = vmatpush.msrb.mxu2 %v9526_v61  ;;  %v4530_v4 = vpop.f32.mrf.mxu3 }
 0x4a4   : > { %v4531_v53 = vadd.f32 %v4530_v4, %v4504_v20 }
 0x4a5   : > { %5965 = vmatpush.msrb.mxu2 %v9528_v63  ;;  %v4632_v23 = vpop.f32.mrf.mxu2  ;;  %v4860_v47 = vpop.f32.mrf.mxu1 }
 0x4a6   : > { %v8848_v52 = vmul.f32 %v4531_v53, %v4531_v53  ;;  %v8850_v18 = vmul.f32 %v4531_v53, %v4341_v8  ;;  %v4829_v26 = vpop.f32.mrf.mxu0  ;;  %v4633_v12 = vadd.f32 %v4632_v23, %v4603_v11 }
 0x4a8   : > { %v8854_v33 = vadd.f32 %v8848_v52, %v8846_v10  ;;  %5746 = vmatmul.f32.vlgmr.msrb.gmra.mxu3 %v7397_v15 }
 0x4a9   : > { %6002 = vmatpush.msrb.mxu3 %v6001_v56 }
 0x4aa   : > { %5723 = vmatmul.f32.gmra.mxu2 %v7417_v40 }
 0x4ab   : > { %6008 = vmatpush.msrb.mxu3 %v6007_v49  ;;  %v4662_v51 = vpop.f32.mrf.mxu3 }
 0x4ad   : > { %v4637_v1 = vpop.f32.mrf.mxu2  ;;  %v4986_v8 = vpop.f32.mrf.mxu1 }
 0x4ae   : > { %v4947_v30 = vpop.f32.mrf.mxu0  ;;  %v4638_v35 = vadd.f32 %v4637_v1, %v4607_v24 }
 0x4af   : > { %v4987_v53 = vadd.f32 %v4986_v8, %v4947_v30 }
 0x4b0   : > { %5750 = vmatmul.f32.gmra.mxu3 %v7417_v40 }
 0x4b2   : > { %5848 = vmatmul.f32.vlgmr.msra.gmra.mxu2 %v7405_v27 }
 0x4b3   : > { %6097 = vmatpush.msra.mxu2 %v5999_v48  ;;  %v4668_v13 = vpop.f32.mrf.mxu3 }
 0x4b4   : > { %v4669_v42 = vadd.f32 %v4668_v13, %v4638_v35 }
 0x4b5   : > { %6101 = vmatpush.msra.mxu2 %v6005_v43  ;;  %v4755_v58 = vpop.f32.mrf.mxu2  ;;  %v8865_v17 = vpop.f32.mrf.mxu1  ;;  %v5127_v43 = vadd.f32 0.0001, %v8837_v45 }
 0x4b6   : > { %v8862_v0 = vpop.f32.mrf.mxu0 }
 0x4b8   : > { %5878 = vmatmul.f32.vlgmr.msra.gmra.mxu3 %v7414_v57  ;;  %v4663_v57 = vadd.f32 %v4662_v51, %v4633_v12 }
 0x4b9   : > { %6126 = vmatpush.msra.mxu3 %v9526_v61 }
 0x4ba   : > { %5853 = vmatmul.f32.gmra.mxu2 %v7426_v50  ;;  %v4696_v19 = vadd.f32 %v8814_v21, %v4663_v57 }
 0x4bb   : > { %6128 = vmatpush.msra.mxu3 %v9528_v63  ;;  %v4794_v9 = vpop.f32.mrf.mxu3 }
 0x4bc   : > { %v4795_v55 = vadd.f32 %v4794_v9, %v4755_v58 }
 0x4bd   : > { %v4763_v27 = vpop.f32.mrf.mxu2  ;;  %v5106_v22 = vpop.f32.mrf.mxu1 }
 0x4be   : > { %v5079_v50 = vpop.f32.mrf.mxu0  ;;  %v4825_v59 = vadd.f32 %v4824_v25, %v4795_v55  ;;  %v4700_v25 = vadd.f32 %v8822_v38, %v4669_v42 }
 0x4c0   : > { %5884 = vmatmul.f32.gmra.mxu3 %v7434_v46  ;;  %v4855_v37 = vadd.f32 %v4854_v31, %v4825_v59  ;;  %v4727_v20 = vadd.f32 %v8825_v54, %v4700_v25  ;;  %v5128_v54 = vadd.f32 0.0001, %v8854_v33  ;;  %v5115_v33 = vmul.f32 2.0, %v8832_v32 }
 0x4c2   : > { %5971 = vmatmul.f32.vlgmr.msrb.gmra.mxu2 %v7428_v28  ;;  %v4723_v28 = vadd.f32 %v8817_v39, %v4696_v19  ;;  %v4730_v23 = vsub.f32 %v4727_v20, %v8846_v10 }
 0x4c3   : > { %v4798_v29 = vpop.f32.mrf.mxu3 }
 0x4c4   : > { %v4799_v62 = vadd.f32 %v4798_v29, %v4763_v27  ;;  %v4729_v21 = vsub.f32 %v4723_v28, %v8828_v41 }
 0x4c5   : > { %v4887_v5 = vpop.f32.mrf.mxu2  ;;  %v8880_v2 = vpop.f32.mrf.mxu1 }
 0x4c6   : > { %v8877_v46 = vpop.f32.mrf.mxu0  ;;  %v4888_v60 = vadd.f32 %v4887_v5, %v4855_v37  ;;  %v4830_v34 = vadd.f32 %v4829_v26, %v4799_v62 }
 0x4c8   : > { %6010 = vmatmul.f32.vlgmr.msrb.gmra.mxu3 %v7397_v15  ;;  %v4861_v3 = vadd.f32 %v4860_v47, %v4830_v34 }
 0x4ca   : > { %5979 = vmatmul.f32.gmra.mxu2 %v7446_v7 }
 0x4cb   : > { %v4914_v44 = vpop.f32.mrf.mxu3 }
 0x4cc   : > { %v4915_v48 = vadd.f32 %v4914_v44, %v4888_v60 }
 0x4cd   : > { %v4891_v16 = vpop.f32.mrf.mxu2  ;;  %v8891_v4 = vpop.f32.mrf.mxu1 }
 0x4ce   : > { %v4921_v61 = vsub.f32 %v4915_v48, %v8830_v14  ;;  %v8887_v39 = vpop.f32.mrf.mxu0  ;;  %v4892_v63 = vadd.f32 %v4891_v16, %v4861_v3  ;;  %v5116_v48 = vmul.f32 2.0, %v8850_v18 }
 0x4d0   : > { %v5129_v7 = vadd.f32 %v4921_v61, %v4729_v21  ;;  %6014 = vmatmul.f32.gmra.mxu3 %v7417_v40 }
 0x4d2   : > { %6103 = vmatmul.f32.vlgmr.msra.gmra.mxu2 %v7397_v15  ;;  %v5131_v31 = vadd.f32 0.0009, %v5129_v7 }
 0x4d3   : > { %v4918_v41 = vpop.f32.mrf.mxu3 }
 0x4d4   : > { %v5133_v36 = vmul.f32 %v5131_v31, %v5127_v43  ;;  %v4919_v14 = vadd.f32 %v4918_v41, %v4892_v63  ;;  %v5118_v63 = vadd.f32 0.0001, %v5116_v48 }
 0x4d5   : > { %v5016_v38 = vpop.f32.mrf.mxu2  ;;  %v8900_v47 = vpop.f32.mrf.mxu1 }
 0x4d6   : > { %6458 = vrcp.f32 %v5133_v36  ;;  %v4922_v6 = vsub.f32 %v4919_v14, %v8848_v52  ;;  %v5017_v26 = vadd.f32 %v5016_v38, %v4987_v53  ;;  %v8898_v49 = vpop.f32.mrf.mxu0  ;;  %v5146_v5 = vand.u32 2147483648, %v5133_v36 }
 0x4d7   : > { %vm5140_vm2 = vweird.f32 %v5133_v36 }
 0x4d8   : > { %v5130_v56 = vadd.f32 %v4922_v6, %v4730_v23  ;;  %6130 = vmatmul.f32.vlgmr.msra.gmra.mxu3 %v7397_v15  ;;  %v4991_v15 = vadd.f32 %v8865_v17, %v8862_v0  ;;  %v5144_v0 = vand.u32 2147483647, %v5133_v36  ;;  %v5117_v17 = vadd.f32 0.0001, %v5115_v33 }
 0x4d9   : > { %v5147_v28 = vor.u32 1.1754944e-38, %v5146_v5 }
 0x4da   : > { %6107 = vmatmul.f32.gmra.mxu2 %v7417_v40  ;;  %v5132_v45 = vadd.f32 0.0009, %v5130_v56  ;;  %vm5145_vm1 = vcmp.eq.f32.partialorder %v5144_v0, 8.507059e+37 }
 0x4db   : > { %v5046_v51 = vpop.f32.mrf.mxu3 }
 0x4dc   : > { %v6459_v10 = vpop.eup %6458  ;;  %v5134_v13 = vmul.f32 %v5132_v45, %v5128_v54  ;;  %v5047_v30 = vadd.f32 %v5046_v51, %v5017_v26 }
 0x4dd   : > { %v5021_v1 = vpop.f32.mrf.mxu2  ;;  %v5136_v8 = vmul.f32 %v6459_v10, %v5133_v36  ;;  %vm5141_vm0 = vweird.f32 %v6459_v10 }
 0x4de   : > { %6460 = vrcp.f32 %v5134_v13  ;;  %v5080_v52 = vadd.f32 %v5079_v50, %v5047_v30  ;;  %v5022_v12 = vadd.f32 %v5021_v1, %v4991_v15  ;;  %vm5142_vm6 = vmor %vm5140_vm2, %vm5141_vm0  ;;  %vm5155_vm4 = vweird.f32 %v5134_v13 }
 0x4df   : > { %v5137_v58 = vsub.f32 1.0, %v5136_v8  ;;  %v5159_v31 = vand.u32 2147483647, %v5134_v13 }
 0x4e0   : > { %v5107_v9 = vadd.f32 %v5106_v22, %v5080_v52  ;;  %6134 = vmatmul.f32.gmra.mxu3 %v7417_v40  ;;  %v5392_v40 = vpop.f32.mrf.mxu0  ;;  %v5431_v22 = vpop.f32.mrf.mxu1 }
 0x4e1   : > { %v5138_v27 = vmul.f32 %v6459_v10, %v5137_v58  ;;  %v5432_v62 = vadd.f32 %v5431_v22, %v5392_v40  ;;  %vm5160_vm8 = vcmp.eq.f32.partialorder %v5159_v31, 8.507059e+37 }
 0x4e2   : > { %v5113_v11 = vsub.f32 %v5107_v9, %v8832_v32 }
 0x4e3   : > { %v5052_v55 = vpop.f32.mrf.mxu3  ;;  %v5139_v29 = vadd.f32 %v6459_v10, %v5138_v27 }
 0x4e4   : > { %v6461_v24 = vpop.eup %6460  ;;  %v5119_v59 = vmul.f32 2.0, %v5113_v11  ;;  %v5053_v19 = vadd.f32 %v5052_v55, %v5022_v12 }
 0x4e5   : > { %v5202_v57 = vpop.f32.mrf.mxu2  ;;  %v5151_v50 = vmul.f32 %v6461_v24, %v5134_v13  ;;  %v5143_v32 = vsel %vm5142_vm6, %v6459_v10, %v5139_v29  ;;  %vm5156_vm3 = vweird.f32 %v6461_v24 }
 0x4e6   : > { %v5121_v35 = vadd.f32 0.0009, %v5119_v59  ;;  %v5084_v37 = vadd.f32 %v8877_v46, %v5053_v19  ;;  %v5148_v16 = vsel %vm5145_vm1, %v5147_v28, %v5143_v32  ;;  %v5161_v46 = vand.u32 2147483648, %v5134_v13  ;;  %vm5157_vm7 = vmor %vm5155_vm4, %vm5156_vm3 }
 0x4e7   : > { %v5152_v42 = vsub.f32 1.0, %v5151_v50 }
 0x4e8   : > { %v5123_v60 = vmul.f32 %v5121_v35, %v5117_v17  ;;  %v5111_v44 = vadd.f32 %v8880_v2, %v5084_v37  ;;  %v5162_v36 = vor.u32 1.1754944e-38, %v5161_v46  ;;  %v5400_v6 = vpop.f32.mrf.mxu0  ;;  %v5435_v10 = vpop.f32.mrf.mxu1 }
 0x4e9   : > { %v5153_v34 = vmul.f32 %v6461_v24, %v5152_v42 }
 0x4ea   : > { %v5114_v21 = vsub.f32 %v5111_v44, %v8850_v18  ;;  %v5149_v25 = vmul.f32 %v5148_v16, %v5123_v60 }
 0x4eb   : > { %v5241_v61 = vpop.f32.mrf.mxu3  ;;  %v5154_v7 = vadd.f32 %v6461_v24, %v5153_v34 }
 0x4ec   : > { %v5120_v43 = vmul.f32 2.0, %v5114_v21  ;;  %v5242_v20 = vadd.f32 %v5241_v61, %v5202_v57  ;;  %v5165_v26 = vsel %vm320_vm5, %v5149_v25, 0.0 }
 0x4ed   : > { %v5210_v3 = vpop.f32.mrf.mxu2  ;;  %v5158_v38 = vsel %vm5157_vm7, %v6461_v24, %v5154_v7 }
 0x4ee   : > { %v5122_v2 = vadd.f32 0.0009, %v5120_v43  ;;  %v5272_v41 = vadd.f32 %v8887_v39, %v5242_v20  ;;  %v5163_v23 = vsel %vm5160_vm8, %v5162_v36, %v5158_v38 }
 0x4f0   : > { %v5124_v14 = vmul.f32 %v5122_v2, %v5118_v63  ;;  %v5302_v18 = vadd.f32 %v8891_v4, %v5272_v41  ;;  %v5524_v11 = vpop.f32.mrf.mxu0  ;;  %v5551_v55 = vpop.f32.mrf.mxu1  ;;  %v5436_v2 = vadd.f32 %v5435_v10, %v5400_v6 }
 0x4f2   : > { %v5164_v53 = vmul.f32 %v5163_v23, %v5124_v14 }
 0x4f3   : > { %v5245_v56 = vpop.f32.mrf.mxu3 }
 0x4f4   : > { %v5246_v45 = vadd.f32 %v5245_v56, %v5210_v3  ;;  %v5166_v51 = vsel %vm320_vm5, %v5164_v53, 0.0 }
 0x4f5   : > { %v5334_v54 = vpop.f32.mrf.mxu2  ;;  %v5167_v13 = vadd.f32 %v5166_v51, %v5165_v26 }
 0x4f6   : > { %v5335_v1 = vadd.f32 %v5334_v54, %v5302_v18  ;;  %v4144_v39 = vpop.xlane.xlu2 %4143  ;;  %v5277_v30 = vadd.f32 %v8898_v49, %v5246_v45 }
 0x4f7   : > { %v4145_v8 = vrot.slane %v4144_v39, 4  ;;  %5168 = vadd.xlane.f32.xlu0 %v5167_v13 }
 0x4f8   : > { %v5308_v4 = vadd.f32 %v8900_v47, %v5277_v30  ;;  %v5528_v19 = vpop.f32.mrf.mxu0  ;;  %v5555_v0 = vpop.f32.mrf.mxu1 }
 0x4f9   : > { %v4146_v15 = vadd.f32 %v4145_v8, %v4144_v39 }
 0x4fb   : > { %v4147_v52 = vrot.slane %v4146_v15, 2  ;;  %v5361_v58 = vpop.f32.mrf.mxu3 }
 0x4fc   : > { %v5362_v33 = vadd.f32 %v5361_v58, %v5335_v1 }
 0x4fd   : > { %v5338_v9 = vpop.f32.mrf.mxu2  ;;  %v4148_v12 = vadd.f32 %v4147_v52, %v4146_v15 }
 0x4fe   : > { %v5339_v27 = vadd.f32 %v5338_v9, %v5308_v4  ;;  %v5558_v37 = vmul.f32 %v5362_v33, %v5362_v33 }
 0x4ff   : > { %v4149_v57 = vrot.slane %v4148_v12, 1 }
 0x500   : > { %v5657_v35 = vpop.f32.mrf.mxu0  ;;  %v5687_v42 = vpop.f32.mrf.mxu1 }
 0x501   : > { %v4150_v29 = vadd.f32 %v4149_v57, %v4148_v12 }
 0x503   : > { %6349 = vpush %v4150_v29  ;;  %v5365_v5 = vpop.f32.mrf.mxu3 }
 0x504   : > { %v8917_v59 = vadd.f32 %v5365_v5, %v5339_v27 }
 0x505   : > { %v5461_v24 = vpop.f32.mrf.mxu2 }
 0x506   : > { %v5462_v49 = vadd.f32 %v5461_v24, %v5432_v62 }
 0x508   : > { %v5662_v34 = vpop.f32.mrf.mxu0  ;;  %v5693_v62 = vpop.f32.mrf.mxu1 }
 0x50b   : > { %v5491_v47 = vpop.f32.mrf.mxu3 }
 0x50c   : > { %v5492_v50 = vadd.f32 %v5491_v47, %v5462_v49 }
 0x50d   : > { %v5466_v17 = vpop.f32.mrf.mxu2 }
 0x50e   : > { %v5525_v40 = vadd.f32 %v5524_v11, %v5492_v50  ;;  %v5467_v18 = vadd.f32 %v5466_v17, %v5436_v2 }
 0x510   : > { %v5552_v22 = vadd.f32 %v5551_v55, %v5525_v40  ;;  %v5780_v3 = vpop.f32.mrf.mxu0  ;;  %v5819_v7 = vpop.f32.mrf.mxu1 }
 0x511   : > { %v5820_v14 = vadd.f32 %v5819_v7, %v5780_v3 }
 0x512   : > { %v5560_v32 = vmul.f32 %v5552_v22, %v5552_v22  ;;  %v8919_v28 = vmul.f32 %v5552_v22, %v5362_v33 }
 0x513   : > { %v5497_v60 = vpop.f32.mrf.mxu3 }
 0x514   : > { %v6150_v16 = vadd.f32 %v5560_v32, %v5558_v37  ;;  %v5498_v53 = vadd.f32 %v5497_v60, %v5467_v18 }
 0x515   : > { %v5588_v44 = vpop.f32.mrf.mxu2 }
 0x516   : > { %v5529_v30 = vadd.f32 %v5528_v19, %v5498_v53  ;;  %v6152_v24 = vadd.f32 0.0001, %v6150_v16 }
 0x518   : > { %v5788_v20 = vpop.f32.mrf.mxu0  ;;  %v5823_v31 = vpop.f32.mrf.mxu1  ;;  %v8921_v52 = vadd.f32 %v5555_v0, %v5529_v30  ;;  %v5559_v0 = vmul.f32 %v8917_v59, %v8917_v59 }
 0x519   : > { %v5824_v15 = vadd.f32 %v5823_v31, %v5788_v20 }
 0x51a   : > { %v5561_v19 = vmul.f32 %v8921_v52, %v8921_v52 }
 0x51b   : > { %v5627_v48 = vpop.f32.mrf.mxu3 }
 0x51c   : > { %v5628_v63 = vadd.f32 %v5627_v48, %v5588_v44 }
 0x51d   : > { %v5596_v21 = vpop.f32.mrf.mxu2 }
 0x51e   : > { %v5658_v36 = vadd.f32 %v5657_v35, %v5628_v63  ;;  %v6151_v35 = vadd.f32 %v5561_v19, %v5559_v0 }
 0x520   : > { %v5912_v23 = vpop.f32.mrf.mxu0  ;;  %v5688_v54 = vadd.f32 %v5687_v42, %v5658_v36  ;;  %v5939_v26 = vpop.f32.mrf.mxu1  ;;  %v6153_v16 = vadd.f32 0.0001, %v6151_v35 }
 0x523   : > { %v5631_v25 = vpop.f32.mrf.mxu3 }
 0x524   : > { %v5632_v56 = vadd.f32 %v5631_v25, %v5596_v21 }
 0x525   : > { %v5720_v61 = vpop.f32.mrf.mxu2 }
 0x526   : > { %v5721_v13 = vadd.f32 %v5720_v61, %v5688_v54  ;;  %v5663_v4 = vadd.f32 %v5662_v34, %v5632_v56  ;;  %v6140_v56 = vmul.f32 2.0, %v8919_v28 }
 0x528   : > { %v5694_v9 = vadd.f32 %v5693_v62, %v5663_v4  ;;  %v5916_v11 = vpop.f32.mrf.mxu0  ;;  %v5943_v49 = vpop.f32.mrf.mxu1  ;;  %v6142_v4 = vadd.f32 0.0001, %v6140_v56 }
 0x52b   : > { %v5747_v46 = vpop.f32.mrf.mxu3 }
 0x52c   : > { %v5748_v8 = vadd.f32 %v5747_v46, %v5721_v13 }
 0x52d   : > { %v5724_v43 = vpop.f32.mrf.mxu2 }
 0x52e   : > { %v5754_v58 = vsub.f32 %v5748_v8, %v5558_v37  ;;  %v5725_v57 = vadd.f32 %v5724_v43, %v5694_v9 }
 0x530   : > { %v6041_v48 = vpop.f32.mrf.mxu0  ;;  %v6071_v7 = vpop.f32.mrf.mxu1 }
 0x533   : > { %v5751_v41 = vpop.f32.mrf.mxu3 }
 0x534   : > { %v5752_v47 = vadd.f32 %v5751_v41, %v5725_v57  ;;  %s6350_s9 = spop %6349 }
 0x535   : > { %v5849_v38 = vpop.f32.mrf.mxu2  ;;  %s4152_s12 = sadd.f32 %s6350_s9, %s6348_s7  ;;  %s6502_s9 = scalar_lea.hbm %s6501_s6, 8 }
 0x536   : > { %v5850_v45 = vadd.f32 %v5849_v38, %v5820_v14  ;;  %v5755_v37 = vsub.f32 %v5752_v47, %v5559_v0  ;;  %p6503_p11 = scmp.ne.s32.totalorder %s6501_s6, %s6502_s9 }
 0x538   : > { %v6046_v41 = vpop.f32.mrf.mxu0  ;;  %v6077_v54 = vpop.f32.mrf.mxu1  ;;  %p6504_p12 = pnand %p6503_p11, %p6615_p5 }
 0x53a   : > { %p6505_p13 = pneg %p6504_p12 }
 0x53b   : > { %v5879_v51 = vpop.f32.mrf.mxu3 }
 0x53c   : > { %v5880_v39 = vadd.f32 %v5879_v51, %v5850_v45 }
 0x53d   : > { %v5854_v1 = vpop.f32.mrf.mxu2 }
 0x53e   : > { %v5913_v6 = vadd.f32 %v5912_v23, %v5880_v39  ;;  %v5855_v33 = vadd.f32 %v5854_v1, %v5824_v15  ;;  %v5563_v15 = vmul.f32 %v8921_v52, %v8917_v59 }
 0x540   : > { %v5940_v10 = vadd.f32 %v5939_v26, %v5913_v6 }
 0x542   : > { %v5946_v27 = vsub.f32 %v5940_v10, %v5560_v32 }
 0x543   : > { %v5885_v12 = vpop.f32.mrf.mxu3 }
 0x544   : > { %v5886_v29 = vadd.f32 %v5885_v12, %v5855_v33  ;;  %v6154_v5 = vadd.f32 %v5946_v27, %v5754_v58  ;;  %v6141_v12 = vmul.f32 2.0, %v5563_v15 }
 0x545   : > { %v5972_v55 = vpop.f32.mrf.mxu2 }
 0x546   : > { %v6156_v17 = vadd.f32 0.0009, %v6154_v5  ;;  %v5917_v50 = vadd.f32 %v5916_v11, %v5886_v29  ;;  %v6143_v52 = vadd.f32 0.0001, %v6141_v12 }
 0x548   : > { %v6158_v40 = vmul.f32 %v6156_v17, %v6152_v24  ;;  %v5944_v22 = vadd.f32 %v5943_v49, %v5917_v50 }
 0x54a   : > { %6462 = vrcp.f32 %v6158_v40  ;;  %v5947_v32 = vsub.f32 %v5944_v22, %v5561_v19  ;;  %v6171_v13 = vand.u32 2147483648, %v6158_v40  ;;  %vm6165_vm10 = vweird.f32 %v6158_v40 }
 0x54b   : > { %v6011_v42 = vpop.f32.mrf.mxu3  ;;  %v6169_v8 = vand.u32 2147483647, %v6158_v40 }
 0x54c   : > { %v6155_v44 = vadd.f32 %v5947_v32, %v5755_v37  ;;  %v6012_v62 = vadd.f32 %v6011_v42, %v5972_v55 }
 0x54d   : > { %v5980_v60 = vpop.f32.mrf.mxu2  ;;  %vm6170_vm12 = vcmp.eq.f32.partialorder %v6169_v8, 8.507059e+37 }
 0x54e   : > { %v6157_v34 = vadd.f32 0.0009, %v6155_v44  ;;  %v6042_v46 = vadd.f32 %v6041_v48, %v6012_v62  ;;  %v6551_v62 = vmov 2.0  }
 0x550   : > { %v6463_v21 = vpop.eup %6462  ;;  %v6159_v25 = vmul.f32 %v6157_v34, %v6153_v16  ;;  %v6072_v2 = vadd.f32 %v6071_v7, %v6042_v46 }
 0x551   : > { %v6161_v61 = vmul.f32 %v6463_v21, %v6158_v40  ;;  %vm6166_vm9 = vweird.f32 %v6463_v21 }
 0x552   : > { %6464 = vrcp.f32 %v6159_v25  ;;  %vm6167_vm11 = vmor %vm6165_vm10, %vm6166_vm9  ;;  %v6186_v24 = vand.u32 2147483648, %v6159_v25  ;;  %vm6180_vm14 = vweird.f32 %v6159_v25  ;;  %v6184_v59 = vand.u32 2147483647, %v6159_v25 }
 0x553   : > { %v6015_v3 = vpop.f32.mrf.mxu3  ;;  %v6162_v20 = vsub.f32 1.0, %v6161_v61 }
 0x554   : > { %v6016_v63 = vadd.f32 %v6015_v3, %v5980_v60  ;;  %v6187_v0 = vor.u32 1.1754944e-38, %v6186_v24  ;;  %vm6185_vm0 = vcmp.eq.f32.partialorder %v6184_v59, 8.507059e+37 }
 0x555   : > { %v6104_v43 = vpop.f32.mrf.mxu2  ;;  %v6163_v36 = vmul.f32 %v6463_v21, %v6162_v20 }
 0x556   : > { %v6105_v38 = vadd.f32 %v6104_v43, %v6072_v2  ;;  %v6047_v53 = vadd.f32 %v6046_v41, %v6016_v63 }
 0x557   : > { %v6164_v26 = vadd.f32 %v6463_v21, %v6163_v36 }
 0x558   : > { %v6465_v31 = vpop.eup %6464  ;;  %v6078_v30 = vadd.f32 %v6077_v54, %v6047_v53 }
 0x559   : > { %v6176_v14 = vmul.f32 %v6465_v31, %v6159_v25  ;;  %v6168_v58 = vsel %vm6167_vm11, %v6463_v21, %v6164_v26  ;;  %vm6181_vm13 = vweird.f32 %v6465_v31  ;;  %v6550_v21 = vmov 2048.0  }
 0x55a   : > { %vm6182_vm15 = vmor %vm6180_vm14, %vm6181_vm13  ;;  %6466 = vrcp.f32 %v6550_v21 }
 0x55b   : > { %v6131_v18 = vpop.f32.mrf.mxu3  ;;  %v6177_v51 = vsub.f32 1.0, %v6176_v14  ;;  %6468 = vrcp.f32 %v6551_v62 }
 0x55c   : > { %v6132_v23 = vadd.f32 %v6131_v18, %v6105_v38 }
 0x55d   : > { %v6108_v1 = vpop.f32.mrf.mxu2  ;;  %v6178_v9 = vmul.f32 %v6465_v31, %v6177_v51 }
 0x55e   : > { %v6138_v45 = vsub.f32 %v6132_v23, %v8919_v28  ;;  %v6109_v10 = vadd.f32 %v6108_v1, %v6078_v30  ;;  %v6172_v28 = vor.u32 1.1754944e-38, %v6171_v13 }
 0x55f   : > { %v6179_v5 = vadd.f32 %v6465_v31, %v6178_v9 }
 0x560   : > { %v6144_v39 = vmul.f32 2.0, %v6138_v45  ;;  %v6173_v55 = vsel %vm6170_vm12, %v6172_v28, %v6168_v58  ;;  %v6467_v25 = vpop.eup %6466 }
 0x561   : > { %v6183_v17 = vsel %vm6182_vm15, %v6465_v31, %v6179_v5  ;;  %v6469_v61 = vpop.eup %6468  ;;  %v6204_v3 = vmul.f32 2048.0, %v6467_v25 }
 0x562   : > { %v6146_v6 = vadd.f32 0.0009, %v6144_v39  ;;  %v6188_v35 = vsel %vm6185_vm0, %v6187_v0, %v6183_v17  ;;  %v6223_v7 = vmul.f32 2.0, %v6469_v61  ;;  %vm6227_vm2 = vweird.f32 %v6469_v61 }
 0x563   : > { %v6135_v33 = vpop.f32.mrf.mxu3  ;;  %v6205_v46 = vsub.f32 1.0, %v6204_v3 }
 0x564   : > { %v6148_v27 = vmul.f32 %v6146_v6, %v6142_v4  ;;  %v6136_v11 = vadd.f32 %v6135_v33, %v6109_v10  ;;  %v6224_v20 = vsub.f32 1.0, %v6223_v7 }
 0x565   : > { %v6206_v2 = vmul.f32 %v6467_v25, %v6205_v46 }
 0x566   : > { %v6139_v57 = vsub.f32 %v6136_v11, %v5563_v15  ;;  %v6174_v29 = vmul.f32 %v6173_v55, %v6148_v27  ;;  %v6225_v41 = vmul.f32 %v6469_v61, %v6224_v20 }
 0x567   : > { %v6207_v14 = vadd.f32 %v6467_v25, %v6206_v2 }
 0x568   : > { %v6145_v49 = vmul.f32 2.0, %v6139_v57  ;;  %v6190_v42 = vsel %vm320_vm5, %v6174_v29, 0.0  ;;  %v6226_v18 = vadd.f32 %v6469_v61, %v6225_v41 }
 0x56a   : > { %v6147_v19 = vadd.f32 0.0009, %v6145_v49  ;;  %v5169_v47 = vpop.xlane.xlu0 %5168  ;;  %v6228_v54 = vsel %vm6227_vm2, %v6469_v61, %v6226_v18 }
 0x56b   : > { %v5170_v50 = vrot.slane %v5169_v47, 4 }
 0x56c   : > { %v6149_v40 = vmul.f32 %v6147_v19, %v6143_v52 }
 0x56d   : > { %v5171_v22 = vadd.f32 %v5170_v50, %v5169_v47 }
 0x56e   : > { %v6189_v37 = vmul.f32 %v6188_v35, %v6149_v40 }
 0x56f   : > { %v5172_v32 = vrot.slane %v5171_v22, 2 }
 0x570   : > { %v6191_v60 = vsel %vm320_vm5, %v6189_v37, 0.0  ;;  %vm6208_vm5 = vweird.f32 %v6467_v25 }
 0x571   : > { %v5173_v44 = vadd.f32 %v5172_v32, %v5171_v22  ;;  %v6192_v16 = vadd.f32 %v6191_v60, %v6190_v42  ;;  %v6209_v56 = vsel %vm6208_vm5, %v6467_v25, %v6207_v14 }
 0x573   : > { %6193 = vadd.xlane.f32.xlu1 %v6192_v16  ;;  %v5174_v34 = vrot.slane %v5173_v44, 1 }
 0x575   : > { %v5175_v48 = vadd.f32 %v5174_v34, %v5173_v44 }
 0x577   : > { %6351 = vpush %v5175_v48 }
 0x5a8   : > { %s6352_s10 = spop %6351 }
 0x5a9   : > { %s5177_s20 = sadd.f32 %s6352_s10, %s4152_s12  ;;  %s6506_s10 = scalar_lea.hbm %s8971_s4, 16 }
 0x5aa   : > { %p6508_p1 = scmp.lt.s32.totalorder %s6506_s10, %s6502_s9 }
 0x5ac   : > { %p6509_p2 = por %p6508_p1, %p6507_p0 }
 0x5ae   : > { %p6510_p3 = pnand %p6509_p2, %p6505_p13 }
 0x5e6   : > { %v6194_v43 = vpop.xlane.xlu1 %6193 }
 0x5e7   : > { %v6195_v31 = vrot.slane %v6194_v43, 4 }
 0x5e9   : > { %v6196_v63 = vadd.f32 %v6195_v31, %v6194_v43 }
 0x5eb   : > { %v6197_v38 = vrot.slane %v6196_v63, 2 }
 0x5ed   : > { %v6198_v36 = vadd.f32 %v6197_v38, %v6196_v63 }
 0x5ef   : > { %v6199_v23 = vrot.slane %v6198_v36, 1 }
 0x5f1   : > { %v6200_v53 = vadd.f32 %v6199_v23, %v6198_v36 }
 0x5f3   : > { %6353 = vpush %v6200_v53 }
 0x5f4   : > { %6355 = vpush %v6209_v56 }
 0x5f5   : > { %6357 = vpush %v6228_v54 }
 0x624   : > { %s6354_s22 = spop %6353 }
 0x625   : > { %s6202_s5 = sadd.f32 %s6354_s22, %s5177_s20  ;;  %s6356_s0 = spop %6355 }
 0x626   : > { %s6211_s1 = smul.f32 %s6356_s0, %s8652_s23  ;;  %s6358_s2 = spop %6357 }
 0x627   : > { %s6220_s24 = smul.f32 %s6356_s0, %s6202_s5 }
 0x628   : > { %s6230_s7 = smul.f32 %s6358_s2, %s588_s3 }
 0x629   : > { %s6221_s26 = ssub.f32 %s6211_s1, %s6220_s24 }
 0x62b   : > { %s6231_s19 = sadd.f32 %s6230_s7, %s6221_s26 }
 0x62d   : > { %v6232_v45 = vstv %s6231_s19 }
 0x62e   : > { %6234 = vst [vmem:[%s205_s17] sm:$0xff] %v6232_v45 }
 0x62f   : > { %6513 = shalt.err (!%p6510_p3)
}
 0x630   : > { %6359 = dma.vmem_to_hbm [thread:$0]  (%p6615_p5), %s6249_s16, 128, %s6251_s21, %s6236_s27  }
 0x631 PF: > { %p6365_p4 = scmp.ge.s32.totalorder %s6548_s18, 2  ;;  %s6262_s3 = sand.u32 1, %s6536_s15  }
 0x632   : > { %s6263_s17 = scalar_lea.sflag [#allocation3], %s6262_s3 }
 0x633   : > { %p6362_p7 = pnand %p6365_p4, %p6619_p6 }
 0x635   : > { %p6363_p8 = pneg %p6362_p7 }
 0x637   : > { %6531 = dma.done.wait (%p6363_p8), %s6263_s17, 128  }
 0x638   : > { %6533 = vsyncadd (%p6363_p8), %s6263_s17, 4294967168  ;;  %s9530_s18 = sld [smem:[#allocation7_spill]] }
 0x639   : > { %s9531_s15 = sld [smem:[#allocation5_spill]] }
 0x63a   : > { %s9532_s16 = sld [smem:[#allocation6_spill]] }
 0x63b   : > { %s9533_s17 = sld [smem:[#allocation8_spill]] }
 0x63e   : > { %p14_p9 = scmp.ge.s32.totalorder %s9530_s18, 4  }
 0x640   :  { %16 = sbr.rel (!%p14_p9) target bundleno = 8 (0x8), region = 74 }
 0x645   :  { %6269 = vsyncpa [#allocation3], 1 }
 0x646   :  { %6271 = vsyncpa [#allocation3 + $0x1], 1 }

</bundles_post_ra>
